<compile_context>
chip_gen: v7x
topology: tpu7x:2x2x1
jax: 0.10.0
libtpu: 0.0.40
codegen_flags: <defaults>
</compile_context>

<pallas_src>
import jax
import jax.numpy as jnp
from jax.experimental import pallas as pl
from jax.experimental.pallas import tpu as pltpu

# ----------------------------- configuration -------------------------------
IN_CHANNELS = 2                    # cfg['in_channels'] (2 cameras, 1 ch each)
IMG = 64                           # NatureEncoder.output_dim == 1024 => 64x64
VISUAL_DIM = IN_CHANNELS * IMG * IMG
STATE_DIM = 16                     # cfg['state_dim']
HIDDEN_DIMS = (64, 64)             # cfg['hidden_dims']
HID = HIDDEN_DIMS[-1]
ENC_OUT = 1024                     # NatureEncoder.output_dim
T, B = 2, 2                        # (seq, batch)
LN_EPS = 1e-5
VIS_DT = jnp.bfloat16              # visual-path MXU operand / storage dtype


# ------------- fused conv-as-matmul kernel (head & neck encoders) ------------
def _conv_mm_kernel(p_ref, w_ref, b_ref, o_ref):
    # p_ref:(1,M,K) bf16 patches  w_ref:(1,K,OC) bf16  b_ref:(1,1,OC) f32
    y = jnp.dot(p_ref[0], w_ref[0], preferred_element_type=jnp.float32)
    y = jnp.maximum(y + b_ref[0], 0.0)                 # bias + ReLU in f32
    o_ref[0] = y.astype(o_ref.dtype)


def conv_layer_pallas(patches, w, b):
    """patches:(2,M,K) w:(2,K,OC) b:(2,1,OC) -> (2,M,OC). Grid axis = encoder."""
    E, M, K = patches.shape
    OC = w.shape[-1]
    return pl.pallas_call(
        _conv_mm_kernel,
        out_shape=jax.ShapeDtypeStruct((E, M, OC), VIS_DT),
        grid=(E,),
        in_specs=[pl.BlockSpec((1, M, K), lambda e: (e, 0, 0)),
                  pl.BlockSpec((1, K, OC), lambda e: (e, 0, 0)),
                  pl.BlockSpec((1, 1, OC), lambda e: (e, 0, 0))],
        out_specs=pl.BlockSpec((1, M, OC), lambda e: (e, 0, 0)),
        compiler_params=pltpu.CompilerParams(dimension_semantics=("parallel",)),
    )(patches, w, b)


# ------ fused projector + state-MLP + hoisted LSTM-input (zx) prefix kernel ---
def _prefix_kernel(vis_ref, st_ref, wp_ref, bp_ref, w1_ref, b1_ref,
                   w2_ref, b2_ref, wxv_ref, wxs_ref, gx_ref, bxb_ref, zx_ref):
    f32 = jnp.float32
    # RLProjection: relu(concat([head, neck]) @ Wp + bp); the concat is folded
    # into two matmuls against the row-split projector weight.
    v = jnp.dot(vis_ref[0], wp_ref[0], preferred_element_type=f32)
    v = v + jnp.dot(vis_ref[1], wp_ref[1], preferred_element_type=f32)
    v = jnp.maximum(v + bp_ref[...], 0.0)
    # MLPBase on the state input (2x Linear+ReLU), f32.
    s = jnp.maximum(jnp.dot(st_ref[...], w1_ref[...],
                            preferred_element_type=f32) + b1_ref[...], 0.0)
    s = jnp.maximum(jnp.dot(s, w2_ref[...],
                            preferred_element_type=f32) + b2_ref[...], 0.0)
    # LSTM input path hoisted out of the recurrence:
    #   zx = LN([visual, state] @ Wx) * gx + (bx + b_lstm)
    zx = jnp.dot(v, wxv_ref[...], preferred_element_type=f32)
    zx = zx + jnp.dot(s, wxs_ref[...], preferred_element_type=f32)
    mu = jnp.mean(zx, axis=-1, keepdims=True)
    var = jnp.mean(jnp.square(zx - mu), axis=-1, keepdims=True)
    zx_ref[...] = (zx - mu) * jax.lax.rsqrt(var + LN_EPS) * gx_ref[...] + bxb_ref[...]


def prefix_pallas(vis, state, p):
    M = state.shape[0]
    args = (vis, state, p['wp'], p['bp'], p['w1'], p['b1'], p['w2'], p['b2'],
            p['wxv'], p['wxs'], p['gx'], p['bxb'])
    full = lambda a: pl.BlockSpec(a.shape, lambda i: (0,) * a.ndim)
    return pl.pallas_call(
        _prefix_kernel,
        out_shape=jax.ShapeDtypeStruct((M, 4 * HID), jnp.float32),
        grid=(1,),
        in_specs=[full(a) for a in args],
        out_specs=pl.BlockSpec((M, 4 * HID), lambda i: (0, 0)),
    )(*args)


# --------------------------- LN-LSTM recurrent kernel ------------------------
def _lnlstm_kernel(zx_ref, m_ref, h0_ref, c0_ref, wh_ref, gh_ref, bh_ref,
                   gc_ref, bc_ref, out_ref, hN_ref, cN_ref, h_scr, c_scr):
    t = pl.program_id(0)

    @pl.when(t == 0)
    def _():
        h_scr[...] = h0_ref[...]
        c_scr[...] = c0_ref[...]

    m = m_ref[0]                                # (B, H); 1 = keep, 0 = reset
    h = h_scr[...] * m
    c = c_scr[...] * m

    H = h_scr.shape[-1]
    # Hidden-path pre-activations: one (B,H)@(H,H) matmul per gate (i, f, o, u).
    zh = [jnp.dot(h, wh_ref[k], preferred_element_type=jnp.float32)
          for k in range(4)]
    # LayerNorm over the concatenated 4H gate axis, computed piecewise so each
    # gate stays a whole (B,H) tile (no 64-wide lane slices).
    inv_4h = 1.0 / (4 * H)
    mu = (zh[0].sum(-1, keepdims=True) + zh[1].sum(-1, keepdims=True) +
          zh[2].sum(-1, keepdims=True) + zh[3].sum(-1, keepdims=True)) * inv_4h
    var = (jnp.square(zh[0] - mu).sum(-1, keepdims=True) +
           jnp.square(zh[1] - mu).sum(-1, keepdims=True) +
           jnp.square(zh[2] - mu).sum(-1, keepdims=True) +
           jnp.square(zh[3] - mu).sum(-1, keepdims=True)) * inv_4h
    inv = jax.lax.rsqrt(var + LN_EPS)
    z = [(zh[k] - mu) * inv * gh_ref[k] + bh_ref[k] + zx_ref[0, k]
         for k in range(4)]

    i_g = jax.nn.sigmoid(z[0])
    f_g = jax.nn.sigmoid(z[1])
    o_g = jax.nn.sigmoid(z[2])
    u_g = jnp.tanh(z[3])
    c_new = f_g * c + i_g * u_g

    mu_c = jnp.mean(c_new, axis=-1, keepdims=True)
    var_c = jnp.mean(jnp.square(c_new - mu_c), axis=-1, keepdims=True)
    c_ln = (c_new - mu_c) * jax.lax.rsqrt(var_c + LN_EPS) * gc_ref[...] + bc_ref[...]
    h_new = o_g * jnp.tanh(c_ln)

    h_scr[...] = h_new
    c_scr[...] = c_new
    out_ref[0] = h_new
    hN_ref[...] = h_new
    cN_ref[...] = c_new


def lnlstm_pallas(zx_pre, states, mask, p, Tn, Bn):
    H = HID
    # gate-major (T, 4, B, H): each per-step gate read is a whole (B,H) tile.
    zx_g = zx_pre.reshape(Tn, Bn, 4, H).transpose(0, 2, 1, 3)
    m_b = jnp.broadcast_to(mask.astype(jnp.float32)[:, :, None], (Tn, Bn, H))
    h0, c0 = states[:, :H], states[:, H:]

    rnn_out, hN, cN = pl.pallas_call(
        _lnlstm_kernel,
        out_shape=(jax.ShapeDtypeStruct((Tn, Bn, H), jnp.float32),
                   jax.ShapeDtypeStruct((Bn, H), jnp.float32),
                   jax.ShapeDtypeStruct((Bn, H), jnp.float32)),
        grid=(Tn,),
        in_specs=[pl.BlockSpec((1, 4, Bn, H), lambda t: (t, 0, 0, 0)),
                  pl.BlockSpec((1, Bn, H), lambda t: (t, 0, 0)),
                  pl.BlockSpec((Bn, H), lambda t: (0, 0)),
                  pl.BlockSpec((Bn, H), lambda t: (0, 0)),
                  pl.BlockSpec((4, H, H), lambda t: (0, 0, 0)),
                  pl.BlockSpec((4, 1, H), lambda t: (0, 0, 0)),
                  pl.BlockSpec((4, 1, H), lambda t: (0, 0, 0)),
                  pl.BlockSpec((1, H), lambda t: (0, 0)),
                  pl.BlockSpec((1, H), lambda t: (0, 0))],
        out_specs=(pl.BlockSpec((1, Bn, H), lambda t: (t, 0, 0)),
                   pl.BlockSpec((Bn, H), lambda t: (0, 0)),
                   pl.BlockSpec((Bn, H), lambda t: (0, 0))),
        scratch_shapes=[pltpu.VMEM((Bn, H), jnp.float32),
                        pltpu.VMEM((Bn, H), jnp.float32)],
        compiler_params=pltpu.CompilerParams(dimension_semantics=("arbitrary",)),
    )(zx_g, m_b, h0, c0, p['whg'], p['ghg'], p['bhg'], p['gc'], p['bc'])
    return rnn_out, jnp.concatenate([hN, cN], axis=-1)


# ------------------------------ full forward --------------------------------
def forward(params, x, states, mask):
    Tn, Bn, _ = x.shape
    N = Tn * Bn
    half = IN_CHANNELS // 2

    state_x = x[..., :STATE_DIM].reshape(N, STATE_DIM)
    visual = x[..., STATE_DIM:].reshape(N, 2, half, IMG, IMG)
    # (encoder, batch, H, W, C) NHWC; bf16 MXU operands for the visual path.
    feat = visual.transpose(1, 0, 3, 4, 2).astype(VIS_DT)
    feat = feat.reshape(2 * N, IMG, IMG, half)

    oh = ow = IMG
    oc = half
    for wk, bk, kk, st in ((params['cw1'], params['cb1'], 8, 4),
                           (params['cw2'], params['cb2'], 4, 2),
                           (params['cw3'], params['cb3'], 3, 1)):
        patches = jax.lax.conv_general_dilated_patches(
            feat, (kk, kk), (st, st), 'VALID',
            dimension_numbers=('NHWC', 'HWIO', 'NHWC'))    # (2N, oh, ow, C*k*k)
        _, oh, ow, K = patches.shape
        oc = wk.shape[-1]
        out = conv_layer_pallas(patches.reshape(2, N * oh * ow, K), wk, bk)
        feat = out.reshape(2 * N, oh, ow, oc)

    # PyTorch Flatten() on NCHW => channel-major features; one small transpose.
    vis_flat = feat.reshape(2, N, oh, ow, oc).transpose(0, 1, 4, 2, 3)
    vis_flat = vis_flat.reshape(2, N, oc * oh * ow)         # (2, T*B, 1024)

    zx_pre = prefix_pallas(vis_flat, state_x, params)       # (T*B, 4H) f32
    return lnlstm_pallas(zx_pre, states, mask, params, Tn, Bn)


# ------------------------------ parameter init -------------------------------
def init_torch_params(key):
    """Random params in the PyTorch module's native shapes."""
    ks = iter(jax.random.split(key, 32))
    rnd = lambda shape, s=0.1: s * jax.random.normal(next(ks), shape, jnp.float32)

    def conv(cin):
        return dict(w1=rnd((32, cin, 8, 8)), b1=rnd((32,)),
                    w2=rnd((64, 32, 4, 4)), b2=rnd((64,)),
                    w3=rnd((64, 64, 3, 3)), b3=rnd((64,)))

    return dict(
        head=conv(IN_CHANNELS // 2),
        neck=conv(IN_CHANNELS // 2),
        proj=dict(w=rnd((2 * ENC_OUT, HID)), b=rnd((HID,))),
        mlp=[dict(w=rnd((STATE_DIM, HIDDEN_DIMS[0])), b=rnd((HIDDEN_DIMS[0],))),
             dict(w=rnd((HIDDEN_DIMS[0], HIDDEN_DIMS[1])), b=rnd((HIDDEN_DIMS[1],)))],
        lstm=dict(wx=rnd((2 * HID, 4 * HID)), wh=rnd((HID, 4 * HID)),
                  b=jnp.zeros((4 * HID,), jnp.float32),
                  gx=jnp.ones((4 * HID,), jnp.float32),
                  bx=jnp.zeros((4 * HID,), jnp.float32),
                  gh=jnp.ones((4 * HID,), jnp.float32),
                  bh=jnp.zeros((4 * HID,), jnp.float32),
                  gc=jnp.ones((HID,), jnp.float32),
                  bc=jnp.zeros((HID,), jnp.float32)),
    )


def prepare_params(tp):
    """One-time conversion from PyTorch-layout params to kernel-ready layout."""
    p = {}
    # Conv weights: PyTorch (OC,C,kh,kw) -> (2, C*kh*kw, OC), head/neck stacked
    # on a leading axis; patch features are (C,kh,kw)-ordered, matching
    # lax.conv_general_dilated_patches' channel-major output ordering.
    for i in (1, 2, 3):
        wpair = jnp.stack([tp['head'][f'w{i}'], tp['neck'][f'w{i}']])
        oc = wpair.shape[1]
        p[f'cw{i}'] = jnp.transpose(wpair.reshape(2, oc, -1), (0, 2, 1)).astype(VIS_DT)
        p[f'cb{i}'] = jnp.stack([tp['head'][f'b{i}'],
                                 tp['neck'][f'b{i}']]).reshape(2, 1, oc)
    # RLProjection weight split into head/neck halves (concat folded away).
    p['wp'] = tp['proj']['w'].reshape(2, ENC_OUT, HID).astype(VIS_DT)
    p['bp'] = tp['proj']['b'].reshape(1, HID)
    # MLPBase
    p['w1'] = tp['mlp'][0]['w']
    p['b1'] = tp['mlp'][0]['b'].reshape(1, -1)
    p['w2'] = tp['mlp'][1]['w']
    p['b2'] = tp['mlp'][1]['b'].reshape(1, -1)
    # LSTM input path (hoisted): Wx split into visual/state halves; LN beta and
    # the shared LSTM bias folded together.
    lstm = tp['lstm']
    p['wxv'] = lstm['wx'][:HID]
    p['wxs'] = lstm['wx'][HID:]
    p['gx'] = lstm['gx'].reshape(1, -1)
    p['bxb'] = (lstm['bx'] + lstm['b']).reshape(1, -1)
    # LSTM hidden path: gate-major (i, f, o, u); each gate is a whole tile.
    p['whg'] = jnp.transpose(lstm['wh'].reshape(HID, 4, HID), (1, 0, 2))
    p['ghg'] = lstm['gh'].reshape(4, 1, HID)
    p['bhg'] = lstm['bh'].reshape(4, 1, HID)
    p['gc'] = lstm['gc'].reshape(1, HID)
    p['bc'] = lstm['bc'].reshape(1, HID)
    return p


if __name__ == "__main__":
    key = jax.random.PRNGKey(0)
    pk, xk, sk = jax.random.split(key, 3)
    params = prepare_params(init_torch_params(pk))
    x = jax.random.normal(xk, (T, B, STATE_DIM + VISUAL_DIM), jnp.float32)
    states = 0.1 * jax.random.normal(sk, (B, 2 * HID), jnp.float32)
    mask = jnp.ones((T, B), jnp.float32)

    rnn_out, new_states = jax.jit(forward)(params, x, states, mask)
    jax.block_until_ready((rnn_out, new_states))

    assert rnn_out.shape == (T, B, HID), rnn_out.shape
    assert new_states.shape == (B, 2 * HID), new_states.shape
    assert bool(jnp.all(jnp.isfinite(rnn_out)))
    assert bool(jnp.all(jnp.isfinite(new_states)))
    print("KERNEL_OK")
</pallas_src>

<mosaic_0001>
module attributes {stable_mosaic.version = 11 : i64} {
  func.func @_conv_mm_kernel(%arg0: i32, %arg1: memref<1x900x64xbf16, #tpu.memory_space<vmem>>, %arg2: memref<1x64x32xbf16, #tpu.memory_space<vmem>>, %arg3: memref<1x1x32xf32, #tpu.memory_space<vmem>>, %arg4: memref<1x900x32xbf16, #tpu.memory_space<vmem>>) attributes {dimension_semantics = [#tpu.dimension_semantics<parallel>], iteration_bounds = array<i64: 2>, scalar_prefetch = 0 : i64, scratch_operands = 0 : i64, tpu.core_type = #tpu.core_type<tc>, window_params = [{transform_indices = @transform_0, window_bounds = array<i64: 1, 900, 64>}, {transform_indices = @transform_1, window_bounds = array<i64: 1, 64, 32>}, {transform_indices = @transform_2, window_bounds = array<i64: 1, 1, 32>}, {transform_indices = @transform_3, window_bounds = array<i64: 1, 900, 32>}]} {
    %c0 = arith.constant 0 : index
    %c0_0 = arith.constant 0 : index
    %c0_1 = arith.constant 0 : index
    %0 = vector.load %arg1[%c0, %c0_0, %c0_1] : memref<1x900x64xbf16, #tpu.memory_space<vmem>>, vector<1x900x64xbf16>
    %1 = vector.shape_cast %0 : vector<1x900x64xbf16> to vector<900x64xbf16>
    %c0_2 = arith.constant 0 : index
    %c0_3 = arith.constant 0 : index
    %c0_4 = arith.constant 0 : index
    %2 = vector.load %arg2[%c0_2, %c0_3, %c0_4] : memref<1x64x32xbf16, #tpu.memory_space<vmem>>, vector<1x64x32xbf16>
    %3 = vector.shape_cast %2 : vector<1x64x32xbf16> to vector<64x32xbf16>
    %cst = arith.constant dense<0.000000e+00> : vector<900x32xf32>
    %4 = tpu.matmul %1, %3, %cst {dimension_numbers = #tpu.dot_dimension_numbers<[1], [0], [0], [1], [0, 0, 1, 1], [], []>} : vector<900x64xbf16>, vector<64x32xbf16>, vector<900x32xf32> -> vector<900x32xf32>
    %c0_5 = arith.constant 0 : index
    %c0_6 = arith.constant 0 : index
    %c0_7 = arith.constant 0 : index
    %5 = vector.load %arg3[%c0_5, %c0_6, %c0_7] : memref<1x1x32xf32, #tpu.memory_space<vmem>>, vector<1x1x32xf32>
    %6 = vector.shape_cast %5 : vector<1x1x32xf32> to vector<1x32xf32>
    %7 = vector.broadcast %6 : vector<1x32xf32> to vector<900x32xf32>
    %8 = arith.addf %4, %7 : vector<900x32xf32>
    %cst_8 = arith.constant 0.000000e+00 : f32
    %9 = vector.broadcast %cst_8 : f32 to vector<900x32xf32>
    %10 = arith.maximumf %8, %9 : vector<900x32xf32>
    %11 = arith.truncf %10 : vector<900x32xf32> to vector<900x32xbf16>
    %c0_9 = arith.constant 0 : index
    %c0_10 = arith.constant 0 : index
    %c0_11 = arith.constant 0 : index
    %12 = vector.load %arg4[%c0_9, %c0_10, %c0_11] : memref<1x900x32xbf16, #tpu.memory_space<vmem>>, vector<1x900x32xbf16>
    %13 = vector.shape_cast %12 : vector<1x900x32xbf16> to vector<900x32xbf16>
    %14 = vector.shape_cast %11 : vector<900x32xbf16> to vector<1x900x32xbf16>
    tpu.vector_store %arg4[%c0_9, %c0_10, %c0_11], %14 {strides = array<i32>} : memref<1x900x32xbf16, #tpu.memory_space<vmem>>, vector<1x900x32xbf16>,
    return
  }
  func.func @transform_0(%arg0: i32) -> (i32, i32, i32) {
    %c0_i32 = arith.constant 0 : i32
    %c0_i32_0 = arith.constant 0 : i32
    %c0_i32_1 = arith.constant 0 : i32
    return %arg0, %c0_i32, %c0_i32_0 : i32, i32, i32
  }
  func.func @transform_1(%arg0: i32) -> (i32, i32, i32) {
    %c0_i32 = arith.constant 0 : i32
    %c0_i32_0 = arith.constant 0 : i32
    %c0_i32_1 = arith.constant 0 : i32
    return %arg0, %c0_i32, %c0_i32_0 : i32, i32, i32
  }
  func.func @transform_2(%arg0: i32) -> (i32, i32, i32) {
    %c0_i32 = arith.constant 0 : i32
    %c0_i32_0 = arith.constant 0 : i32
    %c0_i32_1 = arith.constant 0 : i32
    return %arg0, %c0_i32, %c0_i32_0 : i32, i32, i32
  }
  func.func @transform_3(%arg0: i32) -> (i32, i32, i32) {
    %c0_i32 = arith.constant 0 : i32
    %c0_i32_0 = arith.constant 0 : i32
    %c0_i32_1 = arith.constant 0 : i32
    return %arg0, %c0_i32, %c0_i32_0 : i32, i32, i32
  }
}

module attributes {stable_mosaic.version = 11 : i64} {
  func.func @_conv_mm_kernel(%arg0: i32, %arg1: memref<1x144x512xbf16, #tpu.memory_space<vmem>>, %arg2: memref<1x512x64xbf16, #tpu.memory_space<vmem>>, %arg3: memref<1x1x64xf32, #tpu.memory_space<vmem>>, %arg4: memref<1x144x64xbf16, #tpu.memory_space<vmem>>) attributes {dimension_semantics = [#tpu.dimension_semantics<parallel>], iteration_bounds = array<i64: 2>, scalar_prefetch = 0 : i64, scratch_operands = 0 : i64, tpu.core_type = #tpu.core_type<tc>, window_params = [{transform_indices = @transform_0, window_bounds = array<i64: 1, 144, 512>}, {transform_indices = @transform_1, window_bounds = array<i64: 1, 512, 64>}, {transform_indices = @transform_2, window_bounds = array<i64: 1, 1, 64>}, {transform_indices = @transform_3, window_bounds = array<i64: 1, 144, 64>}]} {
    %c0 = arith.constant 0 : index
    %c0_0 = arith.constant 0 : index
    %c0_1 = arith.constant 0 : index
    %0 = vector.load %arg1[%c0, %c0_0, %c0_1] : memref<1x144x512xbf16, #tpu.memory_space<vmem>>, vector<1x144x512xbf16>
    %1 = vector.shape_cast %0 : vector<1x144x512xbf16> to vector<144x512xbf16>
    %c0_2 = arith.constant 0 : index
    %c0_3 = arith.constant 0 : index
    %c0_4 = arith.constant 0 : index
    %2 = vector.load %arg2[%c0_2, %c0_3, %c0_4] : memref<1x512x64xbf16, #tpu.memory_space<vmem>>, vector<1x512x64xbf16>
    %3 = vector.shape_cast %2 : vector<1x512x64xbf16> to vector<512x64xbf16>
    %cst = arith.constant dense<0.000000e+00> : vector<144x64xf32>
    %4 = tpu.matmul %1, %3, %cst {dimension_numbers = #tpu.dot_dimension_numbers<[1], [0], [0], [1], [0, 0, 1, 1], [], []>} : vector<144x512xbf16>, vector<512x64xbf16>, vector<144x64xf32> -> vector<144x64xf32>
    %c0_5 = arith.constant 0 : index
    %c0_6 = arith.constant 0 : index
    %c0_7 = arith.constant 0 : index
    %5 = vector.load %arg3[%c0_5, %c0_6, %c0_7] : memref<1x1x64xf32, #tpu.memory_space<vmem>>, vector<1x1x64xf32>
    %6 = vector.shape_cast %5 : vector<1x1x64xf32> to vector<1x64xf32>
    %7 = vector.broadcast %6 : vector<1x64xf32> to vector<144x64xf32>
    %8 = arith.addf %4, %7 : vector<144x64xf32>
    %cst_8 = arith.constant 0.000000e+00 : f32
    %9 = vector.broadcast %cst_8 : f32 to vector<144x64xf32>
    %10 = arith.maximumf %8, %9 : vector<144x64xf32>
    %11 = arith.truncf %10 : vector<144x64xf32> to vector<144x64xbf16>
    %c0_9 = arith.constant 0 : index
    %c0_10 = arith.constant 0 : index
    %c0_11 = arith.constant 0 : index
    %12 = vector.load %arg4[%c0_9, %c0_10, %c0_11] : memref<1x144x64xbf16, #tpu.memory_space<vmem>>, vector<1x144x64xbf16>
    %13 = vector.shape_cast %12 : vector<1x144x64xbf16> to vector<144x64xbf16>
    %14 = vector.shape_cast %11 : vector<144x64xbf16> to vector<1x144x64xbf16>
    tpu.vector_store %arg4[%c0_9, %c0_10, %c0_11], %14 {strides = array<i32>} : memref<1x144x64xbf16, #tpu.memory_space<vmem>>, vector<1x144x64xbf16>,
    return
  }
  func.func @transform_0(%arg0: i32) -> (i32, i32, i32) {
    %c0_i32 = arith.constant 0 : i32
    %c0_i32_0 = arith.constant 0 : i32
    %c0_i32_1 = arith.constant 0 : i32
    return %arg0, %c0_i32, %c0_i32_0 : i32, i32, i32
  }
  func.func @transform_1(%arg0: i32) -> (i32, i32, i32) {
    %c0_i32 = arith.constant 0 : i32
    %c0_i32_0 = arith.constant 0 : i32
    %c0_i32_1 = arith.constant 0 : i32
    return %arg0, %c0_i32, %c0_i32_0 : i32, i32, i32
  }
  func.func @transform_2(%arg0: i32) -> (i32, i32, i32) {
    %c0_i32 = arith.constant 0 : i32
    %c0_i32_0 = arith.constant 0 : i32
    %c0_i32_1 = arith.constant 0 : i32
    return %arg0, %c0_i32, %c0_i32_0 : i32, i32, i32
  }
  func.func @transform_3(%arg0: i32) -> (i32, i32, i32) {
    %c0_i32 = arith.constant 0 : i32
    %c0_i32_0 = arith.constant 0 : i32
    %c0_i32_1 = arith.constant 0 : i32
    return %arg0, %c0_i32, %c0_i32_0 : i32, i32, i32
  }
}

module attributes {stable_mosaic.version = 11 : i64} {
  func.func @_conv_mm_kernel(%arg0: i32, %arg1: memref<1x64x576xbf16, #tpu.memory_space<vmem>>, %arg2: memref<1x576x64xbf16, #tpu.memory_space<vmem>>, %arg3: memref<1x1x64xf32, #tpu.memory_space<vmem>>, %arg4: memref<1x64x64xbf16, #tpu.memory_space<vmem>>) attributes {dimension_semantics = [#tpu.dimension_semantics<parallel>], iteration_bounds = array<i64: 2>, scalar_prefetch = 0 : i64, scratch_operands = 0 : i64, tpu.core_type = #tpu.core_type<tc>, window_params = [{transform_indices = @transform_0, window_bounds = array<i64: 1, 64, 576>}, {transform_indices = @transform_1, window_bounds = array<i64: 1, 576, 64>}, {transform_indices = @transform_2, window_bounds = array<i64: 1, 1, 64>}, {transform_indices = @transform_3, window_bounds = array<i64: 1, 64, 64>}]} {
    %c0 = arith.constant 0 : index
    %c0_0 = arith.constant 0 : index
    %c0_1 = arith.constant 0 : index
    %0 = vector.load %arg1[%c0, %c0_0, %c0_1] : memref<1x64x576xbf16, #tpu.memory_space<vmem>>, vector<1x64x576xbf16>
    %1 = vector.shape_cast %0 : vector<1x64x576xbf16> to vector<64x576xbf16>
    %c0_2 = arith.constant 0 : index
    %c0_3 = arith.constant 0 : index
    %c0_4 = arith.constant 0 : index
    %2 = vector.load %arg2[%c0_2, %c0_3, %c0_4] : memref<1x576x64xbf16, #tpu.memory_space<vmem>>, vector<1x576x64xbf16>
    %3 = vector.shape_cast %2 : vector<1x576x64xbf16> to vector<576x64xbf16>
    %cst = arith.constant dense<0.000000e+00> : vector<64x64xf32>
    %4 = tpu.matmul %1, %3, %cst {dimension_numbers = #tpu.dot_dimension_numbers<[1], [0], [0], [1], [0, 0, 1, 1], [], []>} : vector<64x576xbf16>, vector<576x64xbf16>, vector<64x64xf32> -> vector<64x64xf32>
    %c0_5 = arith.constant 0 : index
    %c0_6 = arith.constant 0 : index
    %c0_7 = arith.constant 0 : index
    %5 = vector.load %arg3[%c0_5, %c0_6, %c0_7] : memref<1x1x64xf32, #tpu.memory_space<vmem>>, vector<1x1x64xf32>
    %6 = vector.shape_cast %5 : vector<1x1x64xf32> to vector<1x64xf32>
    %7 = vector.broadcast %6 : vector<1x64xf32> to vector<64x64xf32>
    %8 = arith.addf %4, %7 : vector<64x64xf32>
    %cst_8 = arith.constant 0.000000e+00 : f32
    %9 = vector.broadcast %cst_8 : f32 to vector<64x64xf32>
    %10 = arith.maximumf %8, %9 : vector<64x64xf32>
    %11 = arith.truncf %10 : vector<64x64xf32> to vector<64x64xbf16>
    %c0_9 = arith.constant 0 : index
    %c0_10 = arith.constant 0 : index
    %c0_11 = arith.constant 0 : index
    %12 = vector.load %arg4[%c0_9, %c0_10, %c0_11] : memref<1x64x64xbf16, #tpu.memory_space<vmem>>, vector<1x64x64xbf16>
    %13 = vector.shape_cast %12 : vector<1x64x64xbf16> to vector<64x64xbf16>
    %14 = vector.shape_cast %11 : vector<64x64xbf16> to vector<1x64x64xbf16>
    tpu.vector_store %arg4[%c0_9, %c0_10, %c0_11], %14 {strides = array<i32>} : memref<1x64x64xbf16, #tpu.memory_space<vmem>>, vector<1x64x64xbf16>,
    return
  }
  func.func @transform_0(%arg0: i32) -> (i32, i32, i32) {
    %c0_i32 = arith.constant 0 : i32
    %c0_i32_0 = arith.constant 0 : i32
    %c0_i32_1 = arith.constant 0 : i32
    return %arg0, %c0_i32, %c0_i32_0 : i32, i32, i32
  }
  func.func @transform_1(%arg0: i32) -> (i32, i32, i32) {
    %c0_i32 = arith.constant 0 : i32
    %c0_i32_0 = arith.constant 0 : i32
    %c0_i32_1 = arith.constant 0 : i32
    return %arg0, %c0_i32, %c0_i32_0 : i32, i32, i32
  }
  func.func @transform_2(%arg0: i32) -> (i32, i32, i32) {
    %c0_i32 = arith.constant 0 : i32
    %c0_i32_0 = arith.constant 0 : i32
    %c0_i32_1 = arith.constant 0 : i32
    return %arg0, %c0_i32, %c0_i32_0 : i32, i32, i32
  }
  func.func @transform_3(%arg0: i32) -> (i32, i32, i32) {
    %c0_i32 = arith.constant 0 : i32
    %c0_i32_0 = arith.constant 0 : i32
    %c0_i32_1 = arith.constant 0 : i32
    return %arg0, %c0_i32, %c0_i32_0 : i32, i32, i32
  }
}

module attributes {stable_mosaic.version = 11 : i64} {
  func.func @_prefix_kernel(%arg0: i32, %arg1: memref<2x4x1024xbf16, #tpu.memory_space<vmem>>, %arg2: memref<4x16xf32, #tpu.memory_space<vmem>>, %arg3: memref<2x1024x64xbf16, #tpu.memory_space<vmem>>, %arg4: memref<1x64xf32, #tpu.memory_space<vmem>>, %arg5: memref<16x64xf32, #tpu.memory_space<vmem>>, %arg6: memref<1x64xf32, #tpu.memory_space<vmem>>, %arg7: memref<64x64xf32, #tpu.memory_space<vmem>>, %arg8: memref<1x64xf32, #tpu.memory_space<vmem>>, %arg9: memref<64x256xf32, #tpu.memory_space<vmem>>, %arg10: memref<64x256xf32, #tpu.memory_space<vmem>>, %arg11: memref<1x256xf32, #tpu.memory_space<vmem>>, %arg12: memref<1x256xf32, #tpu.memory_space<vmem>>, %arg13: memref<4x256xf32, #tpu.memory_space<vmem>>) attributes {dimension_semantics = [#tpu.dimension_semantics<arbitrary>], iteration_bounds = array<i64: 1>, scalar_prefetch = 0 : i64, scratch_operands = 0 : i64, tpu.core_type = #tpu.core_type<tc>, window_params = [{pipeline_mode = #tpu.pipeline_mode<synchronous>, transform_indices = @transform_0, window_bounds = array<i64: 2, 4, 1024>}, {pipeline_mode = #tpu.pipeline_mode<synchronous>, transform_indices = @transform_1, window_bounds = array<i64: 4, 16>}, {pipeline_mode = #tpu.pipeline_mode<synchronous>, transform_indices = @transform_2, window_bounds = array<i64: 2, 1024, 64>}, {pipeline_mode = #tpu.pipeline_mode<synchronous>, transform_indices = @transform_3, window_bounds = array<i64: 1, 64>}, {pipeline_mode = #tpu.pipeline_mode<synchronous>, transform_indices = @transform_4, window_bounds = array<i64: 16, 64>}, {pipeline_mode = #tpu.pipeline_mode<synchronous>, transform_indices = @transform_5, window_bounds = array<i64: 1, 64>}, {pipeline_mode = #tpu.pipeline_mode<synchronous>, transform_indices = @transform_6, window_bounds = array<i64: 64, 64>}, {pipeline_mode = #tpu.pipeline_mode<synchronous>, transform_indices = @transform_7, window_bounds = array<i64: 1, 64>}, {pipeline_mode = #tpu.pipeline_mode<synchronous>, transform_indices = @transform_8, window_bounds = array<i64: 64, 256>}, {pipeline_mode = #tpu.pipeline_mode<synchronous>, transform_indices = @transform_9, window_bounds = array<i64: 64, 256>}, {pipeline_mode = #tpu.pipeline_mode<synchronous>, transform_indices = @transform_10, window_bounds = array<i64: 1, 256>}, {pipeline_mode = #tpu.pipeline_mode<synchronous>, transform_indices = @transform_11, window_bounds = array<i64: 1, 256>}, {pipeline_mode = #tpu.pipeline_mode<synchronous>, transform_indices = @transform_12, window_bounds = array<i64: 4, 256>}]} {
    %c0 = arith.constant 0 : index
    %c0_0 = arith.constant 0 : index
    %c0_1 = arith.constant 0 : index
    %0 = vector.load %arg1[%c0, %c0_0, %c0_1] : memref<2x4x1024xbf16, #tpu.memory_space<vmem>>, vector<1x4x1024xbf16>
    %1 = vector.shape_cast %0 : vector<1x4x1024xbf16> to vector<4x1024xbf16>
    %c0_2 = arith.constant 0 : index
    %c0_3 = arith.constant 0 : index
    %c0_4 = arith.constant 0 : index
    %2 = vector.load %arg3[%c0_2, %c0_3, %c0_4] : memref<2x1024x64xbf16, #tpu.memory_space<vmem>>, vector<1x1024x64xbf16>
    %3 = vector.shape_cast %2 : vector<1x1024x64xbf16> to vector<1024x64xbf16>
    %cst = arith.constant dense<0.000000e+00> : vector<4x64xf32>
    %4 = tpu.matmul %1, %3, %cst {dimension_numbers = #tpu.dot_dimension_numbers<[1], [0], [0], [1], [0, 0, 1, 1], [], []>} : vector<4x1024xbf16>, vector<1024x64xbf16>, vector<4x64xf32> -> vector<4x64xf32>
    %c1 = arith.constant 1 : index
    %c0_5 = arith.constant 0 : index
    %c0_6 = arith.constant 0 : index
    %5 = vector.load %arg1[%c1, %c0_5, %c0_6] : memref<2x4x1024xbf16, #tpu.memory_space<vmem>>, vector<1x4x1024xbf16>
    %6 = vector.shape_cast %5 : vector<1x4x1024xbf16> to vector<4x1024xbf16>
    %c1_7 = arith.constant 1 : index
    %c0_8 = arith.constant 0 : index
    %c0_9 = arith.constant 0 : index
    %7 = vector.load %arg3[%c1_7, %c0_8, %c0_9] : memref<2x1024x64xbf16, #tpu.memory_space<vmem>>, vector<1x1024x64xbf16>
    %8 = vector.shape_cast %7 : vector<1x1024x64xbf16> to vector<1024x64xbf16>
    %cst_10 = arith.constant dense<0.000000e+00> : vector<4x64xf32>
    %9 = tpu.matmul %6, %8, %cst_10 {dimension_numbers = #tpu.dot_dimension_numbers<[1], [0], [0], [1], [0, 0, 1, 1], [], []>} : vector<4x1024xbf16>, vector<1024x64xbf16>, vector<4x64xf32> -> vector<4x64xf32>
    %10 = arith.addf %4, %9 : vector<4x64xf32>
    %c0_11 = arith.constant 0 : index
    %c0_12 = arith.constant 0 : index
    %11 = vector.load %arg4[%c0_11, %c0_12] : memref<1x64xf32, #tpu.memory_space<vmem>>, vector<1x64xf32>
    %12 = vector.broadcast %11 : vector<1x64xf32> to vector<4x64xf32>
    %13 = arith.addf %10, %12 : vector<4x64xf32>
    %cst_13 = arith.constant 0.000000e+00 : f32
    %14 = vector.broadcast %cst_13 : f32 to vector<4x64xf32>
    %15 = arith.maximumf %13, %14 : vector<4x64xf32>
    %c0_14 = arith.constant 0 : index
    %c0_15 = arith.constant 0 : index
    %16 = vector.load %arg2[%c0_14, %c0_15] : memref<4x16xf32, #tpu.memory_space<vmem>>, vector<4x16xf32>
    %c0_16 = arith.constant 0 : index
    %c0_17 = arith.constant 0 : index
    %17 = vector.load %arg5[%c0_16, %c0_17] : memref<16x64xf32, #tpu.memory_space<vmem>>, vector<16x64xf32>
    %cst_18 = arith.constant dense<0.000000e+00> : vector<4x64xf32>
    %18 = tpu.matmul %16, %17, %cst_18 {dimension_numbers = #tpu.dot_dimension_numbers<[1], [0], [0], [1], [0, 0, 1, 1], [], []>} : vector<4x16xf32>, vector<16x64xf32>, vector<4x64xf32> -> vector<4x64xf32>
    %c0_19 = arith.constant 0 : index
    %c0_20 = arith.constant 0 : index
    %19 = vector.load %arg6[%c0_19, %c0_20] : memref<1x64xf32, #tpu.memory_space<vmem>>, vector<1x64xf32>
    %20 = vector.broadcast %19 : vector<1x64xf32> to vector<4x64xf32>
    %21 = arith.addf %18, %20 : vector<4x64xf32>
    %cst_21 = arith.constant 0.000000e+00 : f32
    %22 = vector.broadcast %cst_21 : f32 to vector<4x64xf32>
    %23 = arith.maximumf %21, %22 : vector<4x64xf32>
    %c0_22 = arith.constant 0 : index
    %c0_23 = arith.constant 0 : index
    %24 = vector.load %arg7[%c0_22, %c0_23] : memref<64x64xf32, #tpu.memory_space<vmem>>, vector<64x64xf32>
    %cst_24 = arith.constant dense<0.000000e+00> : vector<4x64xf32>
    %25 = tpu.matmul %23, %24, %cst_24 {dimension_numbers = #tpu.dot_dimension_numbers<[1], [0], [0], [1], [0, 0, 1, 1], [], []>} : vector<4x64xf32>, vector<64x64xf32>, vector<4x64xf32> -> vector<4x64xf32>
    %c0_25 = arith.constant 0 : index
    %c0_26 = arith.constant 0 : index
    %26 = vector.load %arg8[%c0_25, %c0_26] : memref<1x64xf32, #tpu.memory_space<vmem>>, vector<1x64xf32>
    %27 = vector.broadcast %26 : vector<1x64xf32> to vector<4x64xf32>
    %28 = arith.addf %25, %27 : vector<4x64xf32>
    %cst_27 = arith.constant 0.000000e+00 : f32
    %29 = vector.broadcast %cst_27 : f32 to vector<4x64xf32>
    %30 = arith.maximumf %28, %29 : vector<4x64xf32>
    %c0_28 = arith.constant 0 : index
    %c0_29 = arith.constant 0 : index
    %31 = vector.load %arg9[%c0_28, %c0_29] : memref<64x256xf32, #tpu.memory_space<vmem>>, vector<64x256xf32>
    %cst_30 = arith.constant dense<0.000000e+00> : vector<4x256xf32>
    %32 = tpu.matmul %15, %31, %cst_30 {dimension_numbers = #tpu.dot_dimension_numbers<[1], [0], [0], [1], [0, 0, 1, 1], [], []>} : vector<4x64xf32>, vector<64x256xf32>, vector<4x256xf32> -> vector<4x256xf32>
    %c0_31 = arith.constant 0 : index
    %c0_32 = arith.constant 0 : index
    %33 = vector.load %arg10[%c0_31, %c0_32] : memref<64x256xf32, #tpu.memory_space<vmem>>, vector<64x256xf32>
    %cst_33 = arith.constant dense<0.000000e+00> : vector<4x256xf32>
    %34 = tpu.matmul %30, %33, %cst_33 {dimension_numbers = #tpu.dot_dimension_numbers<[1], [0], [0], [1], [0, 0, 1, 1], [], []>} : vector<4x64xf32>, vector<64x256xf32>, vector<4x256xf32> -> vector<4x256xf32>
    %35 = arith.addf %32, %34 : vector<4x256xf32>
    %cst_34 = arith.constant dense<0.000000e+00> : vector<4xf32>
    %36 = vector.multi_reduction <add>, %35, %cst_34 [1] : vector<4x256xf32> to vector<4xf32>
    %37 = vector.shape_cast %36 : vector<4xf32> to vector<4x1xf32>
    %cst_35 = arith.constant 2.560000e+02 : f32
    %38 = vector.broadcast %cst_35 : f32 to vector<4x1xf32>
    %39 = arith.divf %37, %38 : vector<4x1xf32>
    %40 = vector.broadcast %39 : vector<4x1xf32> to vector<4x256xf32>
    %41 = arith.subf %35, %40 : vector<4x256xf32>
    %42 = arith.mulf %41, %41 : vector<4x256xf32>
    %cst_36 = arith.constant dense<0.000000e+00> : vector<4xf32>
    %43 = vector.multi_reduction <add>, %42, %cst_36 [1] : vector<4x256xf32> to vector<4xf32>
    %44 = vector.shape_cast %43 : vector<4xf32> to vector<4x1xf32>
    %cst_37 = arith.constant 2.560000e+02 : f32
    %45 = vector.broadcast %cst_37 : f32 to vector<4x1xf32>
    %46 = arith.divf %44, %45 : vector<4x1xf32>
    %47 = vector.broadcast %39 : vector<4x1xf32> to vector<4x256xf32>
    %48 = arith.subf %35, %47 : vector<4x256xf32>
    %cst_38 = arith.constant 9.99999974E-6 : f32
    %49 = vector.broadcast %cst_38 : f32 to vector<4x1xf32>
    %50 = arith.addf %46, %49 : vector<4x1xf32>
    %51 = math.rsqrt %50 : vector<4x1xf32>
    %52 = vector.broadcast %51 : vector<4x1xf32> to vector<4x256xf32>
    %53 = arith.mulf %48, %52 : vector<4x256xf32>
    %c0_39 = arith.constant 0 : index
    %c0_40 = arith.constant 0 : index
    %54 = vector.load %arg11[%c0_39, %c0_40] : memref<1x256xf32, #tpu.memory_space<vmem>>, vector<1x256xf32>
    %55 = vector.broadcast %54 : vector<1x256xf32> to vector<4x256xf32>
    %56 = arith.mulf %53, %55 : vector<4x256xf32>
    %c0_41 = arith.constant 0 : index
    %c0_42 = arith.constant 0 : index
    %57 = vector.load %arg12[%c0_41, %c0_42] : memref<1x256xf32, #tpu.memory_space<vmem>>, vector<1x256xf32>
    %58 = vector.broadcast %57 : vector<1x256xf32> to vector<4x256xf32>
    %59 = arith.addf %56, %58 : vector<4x256xf32>
    %c0_43 = arith.constant 0 : index
    %c0_44 = arith.constant 0 : index
    %60 = vector.load %arg13[%c0_43, %c0_44] : memref<4x256xf32, #tpu.memory_space<vmem>>, vector<4x256xf32>
    tpu.vector_store %arg13[%c0_43, %c0_44], %59 {strides = array<i32>} : memref<4x256xf32, #tpu.memory_space<vmem>>, vector<4x256xf32>,
    return
  }
  func.func @transform_0(%arg0: i32) -> (i32, i32, i32) {
    %c0_i32 = arith.constant 0 : i32
    %c0_i32_0 = arith.constant 0 : i32
    %c0_i32_1 = arith.constant 0 : i32
    %c0_i32_2 = arith.constant 0 : i32
    return %c0_i32, %c0_i32_0, %c0_i32_1 : i32, i32, i32
  }
  func.func @transform_1(%arg0: i32) -> (i32, i32) {
    %c0_i32 = arith.constant 0 : i32
    %c0_i32_0 = arith.constant 0 : i32
    %c0_i32_1 = arith.constant 0 : i32
    return %c0_i32, %c0_i32_0 : i32, i32
  }
  func.func @transform_2(%arg0: i32) -> (i32, i32, i32) {
    %c0_i32 = arith.constant 0 : i32
    %c0_i32_0 = arith.constant 0 : i32
    %c0_i32_1 = arith.constant 0 : i32
    %c0_i32_2 = arith.constant 0 : i32
    return %c0_i32, %c0_i32_0, %c0_i32_1 : i32, i32, i32
  }
  func.func @transform_3(%arg0: i32) -> (i32, i32) {
    %c0_i32 = arith.constant 0 : i32
    %c0_i32_0 = arith.constant 0 : i32
    %c0_i32_1 = arith.constant 0 : i32
    return %c0_i32, %c0_i32_0 : i32, i32
  }
  func.func @transform_4(%arg0: i32) -> (i32, i32) {
    %c0_i32 = arith.constant 0 : i32
    %c0_i32_0 = arith.constant 0 : i32
    %c0_i32_1 = arith.constant 0 : i32
    return %c0_i32, %c0_i32_0 : i32, i32
  }
  func.func @transform_5(%arg0: i32) -> (i32, i32) {
    %c0_i32 = arith.constant 0 : i32
    %c0_i32_0 = arith.constant 0 : i32
    %c0_i32_1 = arith.constant 0 : i32
    return %c0_i32, %c0_i32_0 : i32, i32
  }
  func.func @transform_6(%arg0: i32) -> (i32, i32) {
    %c0_i32 = arith.constant 0 : i32
    %c0_i32_0 = arith.constant 0 : i32
    %c0_i32_1 = arith.constant 0 : i32
    return %c0_i32, %c0_i32_0 : i32, i32
  }
  func.func @transform_7(%arg0: i32) -> (i32, i32) {
    %c0_i32 = arith.constant 0 : i32
    %c0_i32_0 = arith.constant 0 : i32
    %c0_i32_1 = arith.constant 0 : i32
    return %c0_i32, %c0_i32_0 : i32, i32
  }
  func.func @transform_8(%arg0: i32) -> (i32, i32) {
    %c0_i32 = arith.constant 0 : i32
    %c0_i32_0 = arith.constant 0 : i32
    %c0_i32_1 = arith.constant 0 : i32
    return %c0_i32, %c0_i32_0 : i32, i32
  }
  func.func @transform_9(%arg0: i32) -> (i32, i32) {
    %c0_i32 = arith.constant 0 : i32
    %c0_i32_0 = arith.constant 0 : i32
    %c0_i32_1 = arith.constant 0 : i32
    return %c0_i32, %c0_i32_0 : i32, i32
  }
  func.func @transform_10(%arg0: i32) -> (i32, i32) {
    %c0_i32 = arith.constant 0 : i32
    %c0_i32_0 = arith.constant 0 : i32
    %c0_i32_1 = arith.constant 0 : i32
    return %c0_i32, %c0_i32_0 : i32, i32
  }
  func.func @transform_11(%arg0: i32) -> (i32, i32) {
    %c0_i32 = arith.constant 0 : i32
    %c0_i32_0 = arith.constant 0 : i32
    %c0_i32_1 = arith.constant 0 : i32
    return %c0_i32, %c0_i32_0 : i32, i32
  }
  func.func @transform_12(%arg0: i32) -> (i32, i32) {
    %c0_i32 = arith.constant 0 : i32
    %c0_i32_0 = arith.constant 0 : i32
    %c0_i32_1 = arith.constant 0 : i32
    return %c0_i32, %c0_i32_0 : i32, i32
  }
}

module attributes {stable_mosaic.version = 11 : i64} {
  func.func @_lnlstm_kernel(%arg0: i32, %arg1: memref<1x4x2x64xf32, #tpu.memory_space<vmem>>, %arg2: memref<1x2x64xf32, #tpu.memory_space<vmem>>, %arg3: memref<2x64xf32, #tpu.memory_space<vmem>>, %arg4: memref<2x64xf32, #tpu.memory_space<vmem>>, %arg5: memref<4x64x64xf32, #tpu.memory_space<vmem>>, %arg6: memref<4x1x64xf32, #tpu.memory_space<vmem>>, %arg7: memref<4x1x64xf32, #tpu.memory_space<vmem>>, %arg8: memref<1x64xf32, #tpu.memory_space<vmem>>, %arg9: memref<1x64xf32, #tpu.memory_space<vmem>>, %arg10: memref<1x2x64xf32, #tpu.memory_space<vmem>>, %arg11: memref<2x64xf32, #tpu.memory_space<vmem>>, %arg12: memref<2x64xf32, #tpu.memory_space<vmem>>, %arg13: memref<2x64xf32, #tpu.memory_space<vmem>>, %arg14: memref<2x64xf32, #tpu.memory_space<vmem>>) attributes {dimension_semantics = [#tpu.dimension_semantics<arbitrary>], iteration_bounds = array<i64: 2>, scalar_prefetch = 0 : i64, scratch_operands = 2 : i64, tpu.core_type = #tpu.core_type<tc>, window_params = [{transform_indices = @transform_0, window_bounds = array<i64: 1, 4, 2, 64>}, {transform_indices = @transform_1, window_bounds = array<i64: 1, 2, 64>}, {pipeline_mode = #tpu.pipeline_mode<synchronous>, transform_indices = @transform_2, window_bounds = array<i64: 2, 64>}, {pipeline_mode = #tpu.pipeline_mode<synchronous>, transform_indices = @transform_3, window_bounds = array<i64: 2, 64>}, {pipeline_mode = #tpu.pipeline_mode<synchronous>, transform_indices = @transform_4, window_bounds = array<i64: 4, 64, 64>}, {pipeline_mode = #tpu.pipeline_mode<synchronous>, transform_indices = @transform_5, window_bounds = array<i64: 4, 1, 64>}, {pipeline_mode = #tpu.pipeline_mode<synchronous>, transform_indices = @transform_6, window_bounds = array<i64: 4, 1, 64>}, {pipeline_mode = #tpu.pipeline_mode<synchronous>, transform_indices = @transform_7, window_bounds = array<i64: 1, 64>}, {pipeline_mode = #tpu.pipeline_mode<synchronous>, transform_indices = @transform_8, window_bounds = array<i64: 1, 64>}, {transform_indices = @transform_9, window_bounds = array<i64: 1, 2, 64>}, {pipeline_mode = #tpu.pipeline_mode<synchronous>, transform_indices = @transform_10, window_bounds = array<i64: 2, 64>}, {pipeline_mode = #tpu.pipeline_mode<synchronous>, transform_indices = @transform_11, window_bounds = array<i64: 2, 64>}]} {
    %c0_i32 = arith.constant 0 : i32
    %0 = arith.cmpi eq, %arg0, %c0_i32 : i32
    %1 = arith.extui %0 : i1 to i32
    %c0_i32_0 = arith.constant 0 : i32
    %2 = arith.cmpi ne, %1, %c0_i32_0 : i32
    scf.if %2 {
      %c0_93 = arith.constant 0 : index
      %c0_94 = arith.constant 0 : index
      %174 = vector.load %arg3[%c0_93, %c0_94] : memref<2x64xf32, #tpu.memory_space<vmem>>, vector<2x64xf32>
      %c0_95 = arith.constant 0 : index
      %c0_96 = arith.constant 0 : index
      %175 = vector.load %arg13[%c0_95, %c0_96] : memref<2x64xf32, #tpu.memory_space<vmem>>, vector<2x64xf32>
      tpu.vector_store %arg13[%c0_95, %c0_96], %174 {strides = array<i32>} : memref<2x64xf32, #tpu.memory_space<vmem>>, vector<2x64xf32>,
      %c0_97 = arith.constant 0 : index
      %c0_98 = arith.constant 0 : index
      %176 = vector.load %arg4[%c0_97, %c0_98] : memref<2x64xf32, #tpu.memory_space<vmem>>, vector<2x64xf32>
      %c0_99 = arith.constant 0 : index
      %c0_100 = arith.constant 0 : index
      %177 = vector.load %arg14[%c0_99, %c0_100] : memref<2x64xf32, #tpu.memory_space<vmem>>, vector<2x64xf32>
      tpu.vector_store %arg14[%c0_99, %c0_100], %176 {strides = array<i32>} : memref<2x64xf32, #tpu.memory_space<vmem>>, vector<2x64xf32>,
    } else {
    }
    %c0 = arith.constant 0 : index
    %c0_1 = arith.constant 0 : index
    %c0_2 = arith.constant 0 : index
    %3 = vector.load %arg2[%c0, %c0_1, %c0_2] : memref<1x2x64xf32, #tpu.memory_space<vmem>>, vector<1x2x64xf32>
    %4 = vector.shape_cast %3 : vector<1x2x64xf32> to vector<2x64xf32>
    %c0_3 = arith.constant 0 : index
    %c0_4 = arith.constant 0 : index
    %5 = vector.load %arg13[%c0_3, %c0_4] : memref<2x64xf32, #tpu.memory_space<vmem>>, vector<2x64xf32>
    %6 = arith.mulf %5, %4 : vector<2x64xf32>
    %c0_5 = arith.constant 0 : index
    %c0_6 = arith.constant 0 : index
    %7 = vector.load %arg14[%c0_5, %c0_6] : memref<2x64xf32, #tpu.memory_space<vmem>>, vector<2x64xf32>
    %8 = arith.mulf %7, %4 : vector<2x64xf32>
    %c0_7 = arith.constant 0 : index
    %c0_8 = arith.constant 0 : index
    %c0_9 = arith.constant 0 : index
    %9 = vector.load %arg5[%c0_7, %c0_8, %c0_9] : memref<4x64x64xf32, #tpu.memory_space<vmem>>, vector<1x64x64xf32>
    %10 = vector.shape_cast %9 : vector<1x64x64xf32> to vector<64x64xf32>
    %cst = arith.constant dense<0.000000e+00> : vector<2x64xf32>
    %11 = tpu.matmul %6, %10, %cst {dimension_numbers = #tpu.dot_dimension_numbers<[1], [0], [0], [1], [0, 0, 1, 1], [], []>} : vector<2x64xf32>, vector<64x64xf32>, vector<2x64xf32> -> vector<2x64xf32>
    %c1 = arith.constant 1 : index
    %c0_10 = arith.constant 0 : index
    %c0_11 = arith.constant 0 : index
    %12 = vector.load %arg5[%c1, %c0_10, %c0_11] : memref<4x64x64xf32, #tpu.memory_space<vmem>>, vector<1x64x64xf32>
    %13 = vector.shape_cast %12 : vector<1x64x64xf32> to vector<64x64xf32>
    %cst_12 = arith.constant dense<0.000000e+00> : vector<2x64xf32>
    %14 = tpu.matmul %6, %13, %cst_12 {dimension_numbers = #tpu.dot_dimension_numbers<[1], [0], [0], [1], [0, 0, 1, 1], [], []>} : vector<2x64xf32>, vector<64x64xf32>, vector<2x64xf32> -> vector<2x64xf32>
    %c2 = arith.constant 2 : index
    %c0_13 = arith.constant 0 : index
    %c0_14 = arith.constant 0 : index
    %15 = vector.load %arg5[%c2, %c0_13, %c0_14] : memref<4x64x64xf32, #tpu.memory_space<vmem>>, vector<1x64x64xf32>
    %16 = vector.shape_cast %15 : vector<1x64x64xf32> to vector<64x64xf32>
    %cst_15 = arith.constant dense<0.000000e+00> : vector<2x64xf32>
    %17 = tpu.matmul %6, %16, %cst_15 {dimension_numbers = #tpu.dot_dimension_numbers<[1], [0], [0], [1], [0, 0, 1, 1], [], []>} : vector<2x64xf32>, vector<64x64xf32>, vector<2x64xf32> -> vector<2x64xf32>
    %c3 = arith.constant 3 : index
    %c0_16 = arith.constant 0 : index
    %c0_17 = arith.constant 0 : index
    %18 = vector.load %arg5[%c3, %c0_16, %c0_17] : memref<4x64x64xf32, #tpu.memory_space<vmem>>, vector<1x64x64xf32>
    %19 = vector.shape_cast %18 : vector<1x64x64xf32> to vector<64x64xf32>
    %cst_18 = arith.constant dense<0.000000e+00> : vector<2x64xf32>
    %20 = tpu.matmul %6, %19, %cst_18 {dimension_numbers = #tpu.dot_dimension_numbers<[1], [0], [0], [1], [0, 0, 1, 1], [], []>} : vector<2x64xf32>, vector<64x64xf32>, vector<2x64xf32> -> vector<2x64xf32>
    %cst_19 = arith.constant dense<0.000000e+00> : vector<2xf32>
    %21 = vector.multi_reduction <add>, %11, %cst_19 [1] : vector<2x64xf32> to vector<2xf32>
    %22 = vector.shape_cast %21 : vector<2xf32> to vector<2x1xf32>
    %cst_20 = arith.constant dense<0.000000e+00> : vector<2xf32>
    %23 = vector.multi_reduction <add>, %14, %cst_20 [1] : vector<2x64xf32> to vector<2xf32>
    %24 = vector.shape_cast %23 : vector<2xf32> to vector<2x1xf32>
    %25 = arith.addf %22, %24 : vector<2x1xf32>
    %cst_21 = arith.constant dense<0.000000e+00> : vector<2xf32>
    %26 = vector.multi_reduction <add>, %17, %cst_21 [1] : vector<2x64xf32> to vector<2xf32>
    %27 = vector.shape_cast %26 : vector<2xf32> to vector<2x1xf32>
    %28 = arith.addf %25, %27 : vector<2x1xf32>
    %cst_22 = arith.constant dense<0.000000e+00> : vector<2xf32>
    %29 = vector.multi_reduction <add>, %20, %cst_22 [1] : vector<2x64xf32> to vector<2xf32>
    %30 = vector.shape_cast %29 : vector<2xf32> to vector<2x1xf32>
    %31 = arith.addf %28, %30 : vector<2x1xf32>
    %cst_23 = arith.constant 3.906250e-03 : f32
    %32 = vector.broadcast %cst_23 : f32 to vector<2x1xf32>
    %33 = arith.mulf %31, %32 : vector<2x1xf32>
    %34 = vector.broadcast %33 : vector<2x1xf32> to vector<2x64xf32>
    %35 = arith.subf %11, %34 : vector<2x64xf32>
    %36 = arith.mulf %35, %35 : vector<2x64xf32>
    %cst_24 = arith.constant dense<0.000000e+00> : vector<2xf32>
    %37 = vector.multi_reduction <add>, %36, %cst_24 [1] : vector<2x64xf32> to vector<2xf32>
    %38 = vector.shape_cast %37 : vector<2xf32> to vector<2x1xf32>
    %39 = vector.broadcast %33 : vector<2x1xf32> to vector<2x64xf32>
    %40 = arith.subf %14, %39 : vector<2x64xf32>
    %41 = arith.mulf %40, %40 : vector<2x64xf32>
    %cst_25 = arith.constant dense<0.000000e+00> : vector<2xf32>
    %42 = vector.multi_reduction <add>, %41, %cst_25 [1] : vector<2x64xf32> to vector<2xf32>
    %43 = vector.shape_cast %42 : vector<2xf32> to vector<2x1xf32>
    %44 = arith.addf %38, %43 : vector<2x1xf32>
    %45 = vector.broadcast %33 : vector<2x1xf32> to vector<2x64xf32>
    %46 = arith.subf %17, %45 : vector<2x64xf32>
    %47 = arith.mulf %46, %46 : vector<2x64xf32>
    %cst_26 = arith.constant dense<0.000000e+00> : vector<2xf32>
    %48 = vector.multi_reduction <add>, %47, %cst_26 [1] : vector<2x64xf32> to vector<2xf32>
    %49 = vector.shape_cast %48 : vector<2xf32> to vector<2x1xf32>
    %50 = arith.addf %44, %49 : vector<2x1xf32>
    %51 = vector.broadcast %33 : vector<2x1xf32> to vector<2x64xf32>
    %52 = arith.subf %20, %51 : vector<2x64xf32>
    %53 = arith.mulf %52, %52 : vector<2x64xf32>
    %cst_27 = arith.constant dense<0.000000e+00> : vector<2xf32>
    %54 = vector.multi_reduction <add>, %53, %cst_27 [1] : vector<2x64xf32> to vector<2xf32>
    %55 = vector.shape_cast %54 : vector<2xf32> to vector<2x1xf32>
    %56 = arith.addf %50, %55 : vector<2x1xf32>
    %cst_28 = arith.constant 3.906250e-03 : f32
    %57 = vector.broadcast %cst_28 : f32 to vector<2x1xf32>
    %58 = arith.mulf %56, %57 : vector<2x1xf32>
    %cst_29 = arith.constant 9.99999974E-6 : f32
    %59 = vector.broadcast %cst_29 : f32 to vector<2x1xf32>
    %60 = arith.addf %58, %59 : vector<2x1xf32>
    %61 = math.rsqrt %60 : vector<2x1xf32>
    %62 = vector.broadcast %33 : vector<2x1xf32> to vector<2x64xf32>
    %63 = arith.subf %11, %62 : vector<2x64xf32>
    %64 = vector.broadcast %61 : vector<2x1xf32> to vector<2x64xf32>
    %65 = arith.mulf %63, %64 : vector<2x64xf32>
    %c0_30 = arith.constant 0 : index
    %c0_31 = arith.constant 0 : index
    %c0_32 = arith.constant 0 : index
    %66 = vector.load %arg6[%c0_30, %c0_31, %c0_32] : memref<4x1x64xf32, #tpu.memory_space<vmem>>, vector<1x1x64xf32>
    %67 = vector.shape_cast %66 : vector<1x1x64xf32> to vector<1x64xf32>
    %68 = vector.broadcast %67 : vector<1x64xf32> to vector<2x64xf32>
    %69 = arith.mulf %65, %68 : vector<2x64xf32>
    %c0_33 = arith.constant 0 : index
    %c0_34 = arith.constant 0 : index
    %c0_35 = arith.constant 0 : index
    %70 = vector.load %arg7[%c0_33, %c0_34, %c0_35] : memref<4x1x64xf32, #tpu.memory_space<vmem>>, vector<1x1x64xf32>
    %71 = vector.shape_cast %70 : vector<1x1x64xf32> to vector<1x64xf32>
    %72 = vector.broadcast %71 : vector<1x64xf32> to vector<2x64xf32>
    %73 = arith.addf %69, %72 : vector<2x64xf32>
    %c0_36 = arith.constant 0 : index
    %c0_37 = arith.constant 0 : index
    %c0_38 = arith.constant 0 : index
    %c0_39 = arith.constant 0 : index
    %74 = vector.load %arg1[%c0_36, %c0_37, %c0_38, %c0_39] : memref<1x4x2x64xf32, #tpu.memory_space<vmem>>, vector<1x1x2x64xf32>
    %75 = vector.shape_cast %74 : vector<1x1x2x64xf32> to vector<2x64xf32>
    %76 = arith.addf %73, %75 : vector<2x64xf32>
    %77 = vector.broadcast %33 : vector<2x1xf32> to vector<2x64xf32>
    %78 = arith.subf %14, %77 : vector<2x64xf32>
    %79 = vector.broadcast %61 : vector<2x1xf32> to vector<2x64xf32>
    %80 = arith.mulf %78, %79 : vector<2x64xf32>
    %c1_40 = arith.constant 1 : index
    %c0_41 = arith.constant 0 : index
    %c0_42 = arith.constant 0 : index
    %81 = vector.load %arg6[%c1_40, %c0_41, %c0_42] : memref<4x1x64xf32, #tpu.memory_space<vmem>>, vector<1x1x64xf32>
    %82 = vector.shape_cast %81 : vector<1x1x64xf32> to vector<1x64xf32>
    %83 = vector.broadcast %82 : vector<1x64xf32> to vector<2x64xf32>
    %84 = arith.mulf %80, %83 : vector<2x64xf32>
    %c1_43 = arith.constant 1 : index
    %c0_44 = arith.constant 0 : index
    %c0_45 = arith.constant 0 : index
    %85 = vector.load %arg7[%c1_43, %c0_44, %c0_45] : memref<4x1x64xf32, #tpu.memory_space<vmem>>, vector<1x1x64xf32>
    %86 = vector.shape_cast %85 : vector<1x1x64xf32> to vector<1x64xf32>
    %87 = vector.broadcast %86 : vector<1x64xf32> to vector<2x64xf32>
    %88 = arith.addf %84, %87 : vector<2x64xf32>
    %c0_46 = arith.constant 0 : index
    %c1_47 = arith.constant 1 : index
    %c0_48 = arith.constant 0 : index
    %c0_49 = arith.constant 0 : index
    %89 = vector.load %arg1[%c0_46, %c1_47, %c0_48, %c0_49] : memref<1x4x2x64xf32, #tpu.memory_space<vmem>>, vector<1x1x2x64xf32>
    %90 = vector.shape_cast %89 : vector<1x1x2x64xf32> to vector<2x64xf32>
    %91 = arith.addf %88, %90 : vector<2x64xf32>
    %92 = vector.broadcast %33 : vector<2x1xf32> to vector<2x64xf32>
    %93 = arith.subf %17, %92 : vector<2x64xf32>
    %94 = vector.broadcast %61 : vector<2x1xf32> to vector<2x64xf32>
    %95 = arith.mulf %93, %94 : vector<2x64xf32>
    %c2_50 = arith.constant 2 : index
    %c0_51 = arith.constant 0 : index
    %c0_52 = arith.constant 0 : index
    %96 = vector.load %arg6[%c2_50, %c0_51, %c0_52] : memref<4x1x64xf32, #tpu.memory_space<vmem>>, vector<1x1x64xf32>
    %97 = vector.shape_cast %96 : vector<1x1x64xf32> to vector<1x64xf32>
    %98 = vector.broadcast %97 : vector<1x64xf32> to vector<2x64xf32>
    %99 = arith.mulf %95, %98 : vector<2x64xf32>
    %c2_53 = arith.constant 2 : index
    %c0_54 = arith.constant 0 : index
    %c0_55 = arith.constant 0 : index
    %100 = vector.load %arg7[%c2_53, %c0_54, %c0_55] : memref<4x1x64xf32, #tpu.memory_space<vmem>>, vector<1x1x64xf32>
    %101 = vector.shape_cast %100 : vector<1x1x64xf32> to vector<1x64xf32>
    %102 = vector.broadcast %101 : vector<1x64xf32> to vector<2x64xf32>
    %103 = arith.addf %99, %102 : vector<2x64xf32>
    %c0_56 = arith.constant 0 : index
    %c2_57 = arith.constant 2 : index
    %c0_58 = arith.constant 0 : index
    %c0_59 = arith.constant 0 : index
    %104 = vector.load %arg1[%c0_56, %c2_57, %c0_58, %c0_59] : memref<1x4x2x64xf32, #tpu.memory_space<vmem>>, vector<1x1x2x64xf32>
    %105 = vector.shape_cast %104 : vector<1x1x2x64xf32> to vector<2x64xf32>
    %106 = arith.addf %103, %105 : vector<2x64xf32>
    %107 = vector.broadcast %33 : vector<2x1xf32> to vector<2x64xf32>
    %108 = arith.subf %20, %107 : vector<2x64xf32>
    %109 = vector.broadcast %61 : vector<2x1xf32> to vector<2x64xf32>
    %110 = arith.mulf %108, %109 : vector<2x64xf32>
    %c3_60 = arith.constant 3 : index
    %c0_61 = arith.constant 0 : index
    %c0_62 = arith.constant 0 : index
    %111 = vector.load %arg6[%c3_60, %c0_61, %c0_62] : memref<4x1x64xf32, #tpu.memory_space<vmem>>, vector<1x1x64xf32>
    %112 = vector.shape_cast %111 : vector<1x1x64xf32> to vector<1x64xf32>
    %113 = vector.broadcast %112 : vector<1x64xf32> to vector<2x64xf32>
    %114 = arith.mulf %110, %113 : vector<2x64xf32>
    %c3_63 = arith.constant 3 : index
    %c0_64 = arith.constant 0 : index
    %c0_65 = arith.constant 0 : index
    %115 = vector.load %arg7[%c3_63, %c0_64, %c0_65] : memref<4x1x64xf32, #tpu.memory_space<vmem>>, vector<1x1x64xf32>
    %116 = vector.shape_cast %115 : vector<1x1x64xf32> to vector<1x64xf32>
    %117 = vector.broadcast %116 : vector<1x64xf32> to vector<2x64xf32>
    %118 = arith.addf %114, %117 : vector<2x64xf32>
    %c0_66 = arith.constant 0 : index
    %c3_67 = arith.constant 3 : index
    %c0_68 = arith.constant 0 : index
    %c0_69 = arith.constant 0 : index
    %119 = vector.load %arg1[%c0_66, %c3_67, %c0_68, %c0_69] : memref<1x4x2x64xf32, #tpu.memory_space<vmem>>, vector<1x1x2x64xf32>
    %120 = vector.shape_cast %119 : vector<1x1x2x64xf32> to vector<2x64xf32>
    %121 = arith.addf %118, %120 : vector<2x64xf32>
    %122 = arith.negf %76 : vector<2x64xf32>
    %123 = math.exp %122 : vector<2x64xf32>
    %cst_70 = arith.constant 1.000000e+00 : f32
    %124 = vector.broadcast %cst_70 : f32 to vector<2x64xf32>
    %125 = arith.addf %124, %123 : vector<2x64xf32>
    %126 = arith.divf %124, %125 : vector<2x64xf32>
    %127 = arith.negf %91 : vector<2x64xf32>
    %128 = math.exp %127 : vector<2x64xf32>
    %cst_71 = arith.constant 1.000000e+00 : f32
    %129 = vector.broadcast %cst_71 : f32 to vector<2x64xf32>
    %130 = arith.addf %129, %128 : vector<2x64xf32>
    %131 = arith.divf %129, %130 : vector<2x64xf32>
    %132 = arith.negf %106 : vector<2x64xf32>
    %133 = math.exp %132 : vector<2x64xf32>
    %cst_72 = arith.constant 1.000000e+00 : f32
    %134 = vector.broadcast %cst_72 : f32 to vector<2x64xf32>
    %135 = arith.addf %134, %133 : vector<2x64xf32>
    %136 = arith.divf %134, %135 : vector<2x64xf32>
    %137 = math.tanh %121 : vector<2x64xf32>
    %138 = arith.mulf %131, %8 : vector<2x64xf32>
    %139 = arith.mulf %126, %137 : vector<2x64xf32>
    %140 = arith.addf %138, %139 : vector<2x64xf32>
    %cst_73 = arith.constant dense<0.000000e+00> : vector<2xf32>
    %141 = vector.multi_reduction <add>, %140, %cst_73 [1] : vector<2x64xf32> to vector<2xf32>
    %142 = vector.shape_cast %141 : vector<2xf32> to vector<2x1xf32>
    %cst_74 = arith.constant 6.400000e+01 : f32
    %143 = vector.broadcast %cst_74 : f32 to vector<2x1xf32>
    %144 = arith.divf %142, %143 : vector<2x1xf32>
    %145 = vector.broadcast %144 : vector<2x1xf32> to vector<2x64xf32>
    %146 = arith.subf %140, %145 : vector<2x64xf32>
    %147 = arith.mulf %146, %146 : vector<2x64xf32>
    %cst_75 = arith.constant dense<0.000000e+00> : vector<2xf32>
    %148 = vector.multi_reduction <add>, %147, %cst_75 [1] : vector<2x64xf32> to vector<2xf32>
    %149 = vector.shape_cast %148 : vector<2xf32> to vector<2x1xf32>
    %cst_76 = arith.constant 6.400000e+01 : f32
    %150 = vector.broadcast %cst_76 : f32 to vector<2x1xf32>
    %151 = arith.divf %149, %150 : vector<2x1xf32>
    %152 = vector.broadcast %144 : vector<2x1xf32> to vector<2x64xf32>
    %153 = arith.subf %140, %152 : vector<2x64xf32>
    %cst_77 = arith.constant 9.99999974E-6 : f32
    %154 = vector.broadcast %cst_77 : f32 to vector<2x1xf32>
    %155 = arith.addf %151, %154 : vector<2x1xf32>
    %156 = math.rsqrt %155 : vector<2x1xf32>
    %157 = vector.broadcast %156 : vector<2x1xf32> to vector<2x64xf32>
    %158 = arith.mulf %153, %157 : vector<2x64xf32>
    %c0_78 = arith.constant 0 : index
    %c0_79 = arith.constant 0 : index
    %159 = vector.load %arg8[%c0_78, %c0_79] : memref<1x64xf32, #tpu.memory_space<vmem>>, vector<1x64xf32>
    %160 = vector.broadcast %159 : vector<1x64xf32> to vector<2x64xf32>
    %161 = arith.mulf %158, %160 : vector<2x64xf32>
    %c0_80 = arith.constant 0 : index
    %c0_81 = arith.constant 0 : index
    %162 = vector.load %arg9[%c0_80, %c0_81] : memref<1x64xf32, #tpu.memory_space<vmem>>, vector<1x64xf32>
    %163 = vector.broadcast %162 : vector<1x64xf32> to vector<2x64xf32>
    %164 = arith.addf %161, %163 : vector<2x64xf32>
    %165 = math.tanh %164 : vector<2x64xf32>
    %166 = arith.mulf %136, %165 : vector<2x64xf32>
    %c0_82 = arith.constant 0 : index
    %c0_83 = arith.constant 0 : index
    %167 = vector.load %arg13[%c0_82, %c0_83] : memref<2x64xf32, #tpu.memory_space<vmem>>, vector<2x64xf32>
    tpu.vector_store %arg13[%c0_82, %c0_83], %166 {strides = array<i32>} : memref<2x64xf32, #tpu.memory_space<vmem>>, vector<2x64xf32>,
    %c0_84 = arith.constant 0 : index
    %c0_85 = arith.constant 0 : index
    %168 = vector.load %arg14[%c0_84, %c0_85] : memref<2x64xf32, #tpu.memory_space<vmem>>, vector<2x64xf32>
    tpu.vector_store %arg14[%c0_84, %c0_85], %140 {strides = array<i32>} : memref<2x64xf32, #tpu.memory_space<vmem>>, vector<2x64xf32>,
    %c0_86 = arith.constant 0 : index
    %c0_87 = arith.constant 0 : index
    %c0_88 = arith.constant 0 : index
    %169 = vector.load %arg10[%c0_86, %c0_87, %c0_88] : memref<1x2x64xf32, #tpu.memory_space<vmem>>, vector<1x2x64xf32>
    %170 = vector.shape_cast %169 : vector<1x2x64xf32> to vector<2x64xf32>
    %171 = vector.shape_cast %166 : vector<2x64xf32> to vector<1x2x64xf32>
    tpu.vector_store %arg10[%c0_86, %c0_87, %c0_88], %171 {strides = array<i32>} : memref<1x2x64xf32, #tpu.memory_space<vmem>>, vector<1x2x64xf32>,
    %c0_89 = arith.constant 0 : index
    %c0_90 = arith.constant 0 : index
    %172 = vector.load %arg11[%c0_89, %c0_90] : memref<2x64xf32, #tpu.memory_space<vmem>>, vector<2x64xf32>
    tpu.vector_store %arg11[%c0_89, %c0_90], %166 {strides = array<i32>} : memref<2x64xf32, #tpu.memory_space<vmem>>, vector<2x64xf32>,
    %c0_91 = arith.constant 0 : index
    %c0_92 = arith.constant 0 : index
    %173 = vector.load %arg12[%c0_91, %c0_92] : memref<2x64xf32, #tpu.memory_space<vmem>>, vector<2x64xf32>
    tpu.vector_store %arg12[%c0_91, %c0_92], %140 {strides = array<i32>} : memref<2x64xf32, #tpu.memory_space<vmem>>, vector<2x64xf32>,
    return
  }
  func.func @transform_0(%arg0: i32) -> (i32, i32, i32, i32) {
    %c0_i32 = arith.constant 0 : i32
    %c0_i32_0 = arith.constant 0 : i32
    %c0_i32_1 = arith.constant 0 : i32
    %c0_i32_2 = arith.constant 0 : i32
    return %arg0, %c0_i32, %c0_i32_0, %c0_i32_1 : i32, i32, i32, i32
  }
  func.func @transform_1(%arg0: i32) -> (i32, i32, i32) {
    %c0_i32 = arith.constant 0 : i32
    %c0_i32_0 = arith.constant 0 : i32
    %c0_i32_1 = arith.constant 0 : i32
    return %arg0, %c0_i32, %c0_i32_0 : i32, i32, i32
  }
  func.func @transform_2(%arg0: i32) -> (i32, i32) {
    %c0_i32 = arith.constant 0 : i32
    %c0_i32_0 = arith.constant 0 : i32
    %c0_i32_1 = arith.constant 0 : i32
    return %c0_i32, %c0_i32_0 : i32, i32
  }
  func.func @transform_3(%arg0: i32) -> (i32, i32) {
    %c0_i32 = arith.constant 0 : i32
    %c0_i32_0 = arith.constant 0 : i32
    %c0_i32_1 = arith.constant 0 : i32
    return %c0_i32, %c0_i32_0 : i32, i32
  }
  func.func @transform_4(%arg0: i32) -> (i32, i32, i32) {
    %c0_i32 = arith.constant 0 : i32
    %c0_i32_0 = arith.constant 0 : i32
    %c0_i32_1 = arith.constant 0 : i32
    %c0_i32_2 = arith.constant 0 : i32
    return %c0_i32, %c0_i32_0, %c0_i32_1 : i32, i32, i32
  }
  func.func @transform_5(%arg0: i32) -> (i32, i32, i32) {
    %c0_i32 = arith.constant 0 : i32
    %c0_i32_0 = arith.constant 0 : i32
    %c0_i32_1 = arith.constant 0 : i32
    %c0_i32_2 = arith.constant 0 : i32
    return %c0_i32, %c0_i32_0, %c0_i32_1 : i32, i32, i32
  }
  func.func @transform_6(%arg0: i32) -> (i32, i32, i32) {
    %c0_i32 = arith.constant 0 : i32
    %c0_i32_0 = arith.constant 0 : i32
    %c0_i32_1 = arith.constant 0 : i32
    %c0_i32_2 = arith.constant 0 : i32
    return %c0_i32, %c0_i32_0, %c0_i32_1 : i32, i32, i32
  }
  func.func @transform_7(%arg0: i32) -> (i32, i32) {
    %c0_i32 = arith.constant 0 : i32
    %c0_i32_0 = arith.constant 0 : i32
    %c0_i32_1 = arith.constant 0 : i32
    return %c0_i32, %c0_i32_0 : i32, i32
  }
  func.func @transform_8(%arg0: i32) -> (i32, i32) {
    %c0_i32 = arith.constant 0 : i32
    %c0_i32_0 = arith.constant 0 : i32
    %c0_i32_1 = arith.constant 0 : i32
    return %c0_i32, %c0_i32_0 : i32, i32
  }
  func.func @transform_9(%arg0: i32) -> (i32, i32, i32) {
    %c0_i32 = arith.constant 0 : i32
    %c0_i32_0 = arith.constant 0 : i32
    %c0_i32_1 = arith.constant 0 : i32
    return %arg0, %c0_i32, %c0_i32_0 : i32, i32, i32
  }
  func.func @transform_10(%arg0: i32) -> (i32, i32) {
    %c0_i32 = arith.constant 0 : i32
    %c0_i32_0 = arith.constant 0 : i32
    %c0_i32_1 = arith.constant 0 : i32
    return %c0_i32, %c0_i32_0 : i32, i32
  }
  func.func @transform_11(%arg0: i32) -> (i32, i32) {
    %c0_i32 = arith.constant 0 : i32
    %c0_i32_0 = arith.constant 0 : i32
    %c0_i32_1 = arith.constant 0 : i32
    return %c0_i32, %c0_i32_0 : i32, i32
  }
}

</mosaic_0001>

<bundles_post_ra>
// kernel: forward.5
= control target key start
LH: loop header
LB: loop body
LE: loop exit
PB: predicated region body
PF: predicated region fallthrough
CT: control target
= control target key end

     0   :  { %s2823_s12 = smov 0   ;;  %s3441_s0 = inlined_call_operand.vmem [shape: bf16[2,900,64], index: 0, kind: input, shape index: {}]   ;;  %s3442_s1 = inlined_call_operand.vmem [shape: bf16[2,64,32], index: 1, kind: input, shape index: {}]   ;;  %s3443_s2 = inlined_call_operand.vmem [shape: f32[2,1,32], index: 2, kind: input, shape index: {}]   ;;  %s3444_s3 = inlined_call_operand.vmem [shape: bf16[2,900,32], index: 3, kind: output, shape index: {}]  }
   0x1 LB: > { %s2058_s13 = sadd.s32 4294967295, %s2799_s12   ;;  %p2062_p0 = scmp.ge.s32.totalorder %s2799_s12, 1  ;;  %s2799_s12 = sphi %s2823_s12, %s13_s12  }
   0x2   : > { %p155_p1 = scmp.lt.s32.totalorder %s2799_s12, 3 }
   0x4   : > { %p156_p2 = pnand %p2062_p0, %p155_p1 }
   0x5   : > { %p187_p3 = scmp.lt.s32.totalorder (!%p156_p2), %s2058_s13, 1  ;;  %v2801_v0 = vmov (!%p156_p2), 0.0   ;;  %vm2802_vm0 = vmmov (!%p156_p2), 0   ;;  %vm641_vm1 = vcmask (!%p156_p2), 523264   ;;  %vm1867_vm2 = vcmask (!%p156_p2), 257024  }
   0x6   : > { %159 = sbr.rel (%p156_p2) target bundleno = 477 (0x1dd), region = 32  ;;  %2476 = vmatprep.subr.bf16.mxu0 (!%p156_p2), %v2801_v0  ;;  %2712 = vmatprep.subr.bf16.mxu1 (!%p156_p2), %v2801_v0  ;;  %vm1980_vm3 = vcmask (!%p156_p2), 254976  }
   0x7   : > { %2484 = vmatprep.mubr.msk.bf16.mxu0 (!%p156_p2), %vm2802_vm0, %v2801_v0  ;;  %2600 = vmatprep.mubr.msk.bf16.mxu1 (!%p156_p2), %vm2802_vm0, %v2801_v0 }
   0xd   : > { %s3446_s13 = smov (!%p187_p3, %s2058_s13), 1 }
   0xe   : > { %s2301_s14 = sshll.u32 %s3446_s13, 5  ;;  %s2720_s18 = smul.u32 452, %s3446_s13 }
   0xf   : > { %s196_s17 = scalar_lea.vmem %s3442_s1, %s2301_s14  ;;  %s3071_s24 = scalar_lea.vmem %s3443_s2, %s3446_s13 }
  0x10   : > { %v2731_v1 = vld [vmem:[%s196_s17] sm:$0xff]   ;;  %v2732_v2 = vld [vmem:[%s196_s17 + $0x8] sm:$0xff]   ;;  %s2851_s21 = scalar_lea.vmem %s3441_s0, %s2720_s18  ;;  %v2733_v3 = vld [vmem:[%s196_s17 + $0x10] sm:$0xff]   ;;  %s3093_s27 = scalar_lea.vmem %s3444_s3, %s2720_s18 }
  0x11   : > { %2477 = vmatpush3.bf16.msra.mxu0 %v2731_v1  ;;  %2716 = vmatpush3.bf16.msra.mxu1 %v2731_v1  ;;  %v2734_v4 = vld [vmem:[%s196_s17 + $0x18] sm:$0xff]   ;;  %v2735_v5 = vld [vmem:[%s2851_s21] sm:$0xff]   ;;  %v2736_v6 = vld [vmem:[%s2851_s21 + $0xe8] sm:$0xff]  }
  0x12   : > { %2478 = vmatprep.subr.bf16.mxu0 %v2801_v0  ;;  %2713 = vmatprep.subr.bf16.mxu1 %v2801_v0  ;;  %v2737_v7 = vld [vmem:[%s2851_s21 + $0x8] sm:$0xff]   ;;  %v2738_v8 = vld [vmem:[%s2851_s21 + $0xf0] sm:$0xff]   ;;  %v2740_v10 = vld [vmem:[%s2851_s21 + $0xf8] sm:$0xff]  }
  0x13   : > { %v2739_v9 = vld [vmem:[%s2851_s21 + $0x10] sm:$0xff]   ;;  %v2741_v11 = vld [vmem:[%s2851_s21 + $0x18] sm:$0xff]   ;;  %v2742_v12 = vld [vmem:[%s2851_s21 + $0x100] sm:$0xff]  }
  0x14   : > { %v2743_v13 = vld [vmem:[%s2851_s21 + $0x20] sm:$0xff]   ;;  %v2744_v14 = vld [vmem:[%s2851_s21 + $0x108] sm:$0xff]   ;;  %v2746_v16 = vld [vmem:[%s2851_s21 + $0x110] sm:$0xff]  }
  0x15   : > { %2479 = vmatpush3.bf16.msra.mxu0 %v2732_v2  ;;  %2717 = vmatpush3.bf16.msra.mxu1 %v2732_v2  ;;  %v2745_v15 = vld [vmem:[%s2851_s21 + $0x28] sm:$0xff]   ;;  %v2747_v17 = vld [vmem:[%s2851_s21 + $0x30] sm:$0xff]   ;;  %v2748_v18 = vld [vmem:[%s2851_s21 + $0x118] sm:$0xff]  }
  0x16   : > { %2480 = vmatprep.subr.bf16.mxu0 %v2801_v0  ;;  %2714 = vmatprep.subr.bf16.mxu1 %v2801_v0  ;;  %v2749_v19 = vld [vmem:[%s2851_s21 + $0x38] sm:$0xff]   ;;  %v2750_v20 = vld [vmem:[%s2851_s21 + $0x120] sm:$0xff]   ;;  %v2752_v22 = vld [vmem:[%s2851_s21 + $0x128] sm:$0xff]  }
  0x17   : > { %v2751_v21 = vld [vmem:[%s2851_s21 + $0x40] sm:$0xff]   ;;  %v2753_v23 = vld [vmem:[%s2851_s21 + $0x48] sm:$0xff]   ;;  %v2754_v24 = vld [vmem:[%s2851_s21 + $0x130] sm:$0xff]  }
  0x18   : > { %v2755_v25 = vld [vmem:[%s2851_s21 + $0x50] sm:$0xff]   ;;  %v2756_v26 = vld [vmem:[%s2851_s21 + $0x138] sm:$0xff]   ;;  %v2758_v28 = vld [vmem:[%s2851_s21 + $0x140] sm:$0xff]  }
  0x19   : > { %2481 = vmatpush3.bf16.msra.mxu0 %v2733_v3  ;;  %2718 = vmatpush3.bf16.msra.mxu1 %v2733_v3  ;;  %v2757_v27 = vld [vmem:[%s2851_s21 + $0x58] sm:$0xff]   ;;  %v2759_v29 = vld [vmem:[%s2851_s21 + $0x60] sm:$0xff]   ;;  %v2760_v30 = vld [vmem:[%s2851_s21 + $0x148] sm:$0xff]  }
  0x1a   : > { %2482 = vmatprep.subr.bf16.mxu0 %v2801_v0  ;;  %2715 = vmatprep.subr.bf16.mxu1 %v2801_v0  ;;  %v2761_v31 = vld [vmem:[%s2851_s21 + $0x68] sm:$0xff]   ;;  %v2762_v32 = vld [vmem:[%s2851_s21 + $0x150] sm:$0xff]   ;;  %v2764_v34 = vld [vmem:[%s2851_s21 + $0x158] sm:$0xff]  }
  0x1b   : > { %v2763_v33 = vld [vmem:[%s2851_s21 + $0x70] sm:$0xff]   ;;  %v2765_v35 = vld [vmem:[%s2851_s21 + $0x78] sm:$0xff]   ;;  %v2766_v36 = vld [vmem:[%s2851_s21 + $0x160] sm:$0xff]  }
  0x1c   : > { %v2767_v37 = vld [vmem:[%s2851_s21 + $0x80] sm:$0xff]   ;;  %v2768_v38 = vld [vmem:[%s2851_s21 + $0x168] sm:$0xff]   ;;  %v2770_v40 = vld [vmem:[%s2851_s21 + $0x170] sm:$0xff]  }
  0x1d   : > { %2483 = vmatpush3.bf16.msra.mxu0 %v2734_v4  ;;  %2719 = vmatpush3.bf16.msra.mxu1 %v2734_v4  ;;  %v2769_v39 = vld [vmem:[%s2851_s21 + $0x88] sm:$0xff]   ;;  %v2771_v41 = vld [vmem:[%s2851_s21 + $0x90] sm:$0xff]   ;;  %v2772_v42 = vld [vmem:[%s2851_s21 + $0x178] sm:$0xff]  }
  0x1e   : > { %v2773_v43 = vld [vmem:[%s2851_s21 + $0x98] sm:$0xff]   ;;  %v2774_v44 = vld [vmem:[%s2851_s21 + $0x180] sm:$0xff]   ;;  %v2776_v46 = vld [vmem:[%s2851_s21 + $0x188] sm:$0xff]  }
  0x1f   : > { %v2775_v45 = vld [vmem:[%s2851_s21 + $0xa0] sm:$0xff]   ;;  %v2777_v47 = vld [vmem:[%s2851_s21 + $0xa8] sm:$0xff]   ;;  %v2778_v48 = vld [vmem:[%s2851_s21 + $0x190] sm:$0xff]  }
  0x20   : > { %2485 = vmatmul.mubr.msk.bf16.vlgmr.msra.gmra.mrb[0].mxu0 %vm641_vm1, %v2735_v5  ;;  %2601 = vmatmul.mubr.msk.bf16.vlgmr.msra.gmra.mrb[0].mxu1 %vm641_vm1, %v2736_v6  ;;  %v2779_v49 = vld [vmem:[%s2851_s21 + $0xb0] sm:$0xff]   ;;  %v2780_v50 = vld [vmem:[%s2851_s21 + $0x198] sm:$0xff]   ;;  %v2782_v52 = vld [vmem:[%s2851_s21 + $0x1a0] sm:$0xff]  }
  0x21   : > { %2488 = vmatprep.mubr.msk.bf16.mxu0 %vm2802_vm0, %v2801_v0  ;;  %2604 = vmatprep.mubr.msk.bf16.mxu1 %vm2802_vm0, %v2801_v0  ;;  %v2781_v51 = vld [vmem:[%s2851_s21 + $0xb8] sm:$0xff]   ;;  %v2783_v53 = vld [vmem:[%s2851_s21 + $0xc0] sm:$0xff]   ;;  %v2784_v54 = vld [vmem:[%s2851_s21 + $0x1a8] sm:$0xff]  }
  0x22   : > { %v2785_v55 = vld [vmem:[%s2851_s21 + $0xc8] sm:$0xff]   ;;  %v2786_v56 = vld [vmem:[%s2851_s21 + $0x1b0] sm:$0xff]   ;;  %v2788_v58 = vld [vmem:[%s2851_s21 + $0x1b8] sm:$0xff]  }
  0x23   : > { %v2787_v57 = vld [vmem:[%s2851_s21 + $0xd0] sm:$0xff]   ;;  %v3076_v59 = vld [vmem:[%s3071_s24] ss:$0 sm:$0xff]  ;;  %v2789_v1 = vld [vmem:[%s2851_s21 + $0xd8] sm:$0xff]  }
  0x24   : > { %v2790_v4 = vld [vmem:[%s2851_s21 + $0x1c0] ss:$0 sps:$4 sm:$0x33]  }
  0x28   : > { %2489 = vmatmul.mubr.msk.bf16.gmra.mrb[4].mxu0 %vm641_vm1, %v2737_v7  ;;  %2605 = vmatmul.mubr.msk.bf16.gmra.mrb[4].mxu1 %vm641_vm1, %v2738_v8 }
  0x29   : > { %2492 = vmatprep.mubr.msk.bf16.mxu0 %vm2802_vm0, %v2801_v0  ;;  %2608 = vmatprep.mubr.msk.bf16.mxu1 %vm2802_vm0, %v2801_v0 }
  0x30   : > { %2493 = vmatmul.mubr.msk.bf16.gmra.mrb[8].mxu0 %vm641_vm1, %v2739_v9  ;;  %2609 = vmatmul.mubr.msk.bf16.gmra.mrb[8].mxu1 %vm641_vm1, %v2740_v10 }
  0x31   : > { %2496 = vmatprep.mubr.msk.bf16.mxu0 %vm2802_vm0, %v2801_v0  ;;  %2612 = vmatprep.mubr.msk.bf16.mxu1 %vm2802_vm0, %v2801_v0 }
  0x38   : > { %2497 = vmatmul.mubr.msk.bf16.gmra.mrb[12].mxu0 %vm641_vm1, %v2741_v11  ;;  %2613 = vmatmul.mubr.msk.bf16.gmra.mrb[12].mxu1 %vm641_vm1, %v2742_v12 }
  0x39   : > { %2500 = vmatprep.mubr.msk.bf16.mxu0 %vm2802_vm0, %v2801_v0  ;;  %2616 = vmatprep.mubr.msk.bf16.mxu1 %vm2802_vm0, %v2801_v0 }
  0x40   : > { %2501 = vmatmul.mubr.msk.bf16.gmra.mrb[16].mxu0 %vm641_vm1, %v2743_v13  ;;  %2617 = vmatmul.mubr.msk.bf16.gmra.mrb[16].mxu1 %vm641_vm1, %v2744_v14 }
  0x41   : > { %2504 = vmatprep.mubr.msk.bf16.mxu0 %vm2802_vm0, %v2801_v0  ;;  %2620 = vmatprep.mubr.msk.bf16.mxu1 %vm2802_vm0, %v2801_v0 }
  0x48   : > { %2505 = vmatmul.mubr.msk.bf16.gmra.mrb[20].mxu0 %vm641_vm1, %v2745_v15  ;;  %2621 = vmatmul.mubr.msk.bf16.gmra.mrb[20].mxu1 %vm641_vm1, %v2746_v16 }
  0x49   : > { %2508 = vmatprep.mubr.msk.bf16.mxu0 %vm2802_vm0, %v2801_v0  ;;  %2624 = vmatprep.mubr.msk.bf16.mxu1 %vm2802_vm0, %v2801_v0 }
  0x50   : > { %2509 = vmatmul.mubr.msk.bf16.gmra.mrb[24].mxu0 %vm641_vm1, %v2747_v17  ;;  %2625 = vmatmul.mubr.msk.bf16.gmra.mrb[24].mxu1 %vm641_vm1, %v2748_v18 }
  0x51   : > { %2512 = vmatprep.mubr.msk.bf16.mxu0 %vm2802_vm0, %v2801_v0  ;;  %2628 = vmatprep.mubr.msk.bf16.mxu1 %vm2802_vm0, %v2801_v0 }
  0x58   : > { %2513 = vmatmul.mubr.msk.bf16.gmra.mrb[28].mxu0 %vm641_vm1, %v2749_v19  ;;  %2629 = vmatmul.mubr.msk.bf16.gmra.mrb[28].mxu1 %vm641_vm1, %v2750_v20 }
  0x59   : > { %2516 = vmatprep.mubr.msk.bf16.mxu0 %vm2802_vm0, %v2801_v0  ;;  %2632 = vmatprep.mubr.msk.bf16.mxu1 %vm2802_vm0, %v2801_v0 }
  0x60   : > { %2517 = vmatmul.mubr.msk.bf16.gmra.mrb[32].mxu0 %vm641_vm1, %v2751_v21  ;;  %2633 = vmatmul.mubr.msk.bf16.gmra.mrb[32].mxu1 %vm641_vm1, %v2752_v22 }
  0x61   : > { %2520 = vmatprep.mubr.msk.bf16.mxu0 %vm2802_vm0, %v2801_v0  ;;  %2636 = vmatprep.mubr.msk.bf16.mxu1 %vm2802_vm0, %v2801_v0 }
  0x68   : > { %2521 = vmatmul.mubr.msk.bf16.gmra.mrb[36].mxu0 %vm641_vm1, %v2753_v23  ;;  %2637 = vmatmul.mubr.msk.bf16.gmra.mrb[36].mxu1 %vm641_vm1, %v2754_v24  ;;  %v2791_v23 = vld [vmem:[%s2851_s21 + $0xe0] sm:$0xff]  }
  0x69   : > { %2524 = vmatprep.mubr.msk.bf16.mxu0 %vm2802_vm0, %v2801_v0  ;;  %2640 = vmatprep.mubr.msk.bf16.mxu1 %vm2802_vm0, %v2801_v0 }
  0x70   : > { %2525 = vmatmul.mubr.msk.bf16.gmra.mrb[40].mxu0 %vm641_vm1, %v2755_v25  ;;  %2641 = vmatmul.mubr.msk.bf16.gmra.mrb[40].mxu1 %vm641_vm1, %v2756_v26 }
  0x71   : > { %2528 = vmatprep.mubr.msk.bf16.mxu0 %vm2802_vm0, %v2801_v0  ;;  %2644 = vmatprep.mubr.msk.bf16.mxu1 %vm2802_vm0, %v2801_v0 }
  0x78   : > { %2529 = vmatmul.mubr.msk.bf16.gmra.mrb[44].mxu0 %vm641_vm1, %v2757_v27  ;;  %2645 = vmatmul.mubr.msk.bf16.gmra.mrb[44].mxu1 %vm641_vm1, %v2758_v28 }
  0x79   : > { %2532 = vmatprep.mubr.msk.bf16.mxu0 %vm2802_vm0, %v2801_v0  ;;  %2648 = vmatprep.mubr.msk.bf16.mxu1 %vm2802_vm0, %v2801_v0 }
  0x80   : > { %2533 = vmatmul.mubr.msk.bf16.gmra.mrb[48].mxu0 %vm641_vm1, %v2759_v29  ;;  %2649 = vmatmul.mubr.msk.bf16.gmra.mrb[48].mxu1 %vm641_vm1, %v2760_v30 }
  0x81   : > { %2536 = vmatprep.mubr.msk.bf16.mxu0 %vm2802_vm0, %v2801_v0  ;;  %2652 = vmatprep.mubr.msk.bf16.mxu1 %vm2802_vm0, %v2801_v0 }
  0x88   : > { %2537 = vmatmul.mubr.msk.bf16.gmra.mrb[52].mxu0 %vm641_vm1, %v2761_v31  ;;  %2653 = vmatmul.mubr.msk.bf16.gmra.mrb[52].mxu1 %vm641_vm1, %v2762_v32 }
  0x89   : > { %2540 = vmatprep.mubr.msk.bf16.mxu0 %vm2802_vm0, %v2801_v0  ;;  %2656 = vmatprep.mubr.msk.bf16.mxu1 %vm2802_vm0, %v2801_v0 }
  0x90   : > { %2541 = vmatmul.mubr.msk.bf16.gmra.mrb[56].mxu0 %vm641_vm1, %v2763_v33  ;;  %2657 = vmatmul.mubr.msk.bf16.gmra.mrb[56].mxu1 %vm641_vm1, %v2764_v34 }
  0x91   : > { %2544 = vmatprep.mubr.msk.bf16.mxu0 %vm2802_vm0, %v2801_v0  ;;  %2660 = vmatprep.mubr.msk.bf16.mxu1 %vm2802_vm0, %v2801_v0 }
  0x98   : > { %2545 = vmatmul.mubr.msk.bf16.gmra.mrb[60].mxu0 %vm641_vm1, %v2765_v35  ;;  %2661 = vmatmul.mubr.msk.bf16.gmra.mrb[60].mxu1 %vm641_vm1, %v2766_v36 }
  0x99   : > { %2548 = vmatprep.mubr.msk.bf16.mxu0 %vm2802_vm0, %v2801_v0  ;;  %2664 = vmatprep.mubr.msk.bf16.mxu1 %vm2802_vm0, %v2801_v0 }
  0xa0   : > { %2549 = vmatmul.mubr.msk.bf16.gmra.mrb[64].mxu0 %vm641_vm1, %v2767_v37  ;;  %2665 = vmatmul.mubr.msk.bf16.gmra.mrb[64].mxu1 %vm641_vm1, %v2768_v38 }
  0xa1   : > { %2552 = vmatprep.mubr.msk.bf16.mxu0 %vm2802_vm0, %v2801_v0  ;;  %2668 = vmatprep.mubr.msk.bf16.mxu1 %vm2802_vm0, %v2801_v0 }
  0xa8   : > { %2553 = vmatmul.mubr.msk.bf16.gmra.mrb[68].mxu0 %vm641_vm1, %v2769_v39  ;;  %2669 = vmatmul.mubr.msk.bf16.gmra.mrb[68].mxu1 %vm641_vm1, %v2770_v40 }
  0xa9   : > { %2556 = vmatprep.mubr.msk.bf16.mxu0 %vm2802_vm0, %v2801_v0  ;;  %2672 = vmatprep.mubr.msk.bf16.mxu1 %vm2802_vm0, %v2801_v0 }
  0xb0   : > { %2557 = vmatmul.mubr.msk.bf16.gmra.mrb[72].mxu0 %vm641_vm1, %v2771_v41  ;;  %2673 = vmatmul.mubr.msk.bf16.gmra.mrb[72].mxu1 %vm641_vm1, %v2772_v42 }
  0xb1   : > { %2560 = vmatprep.mubr.msk.bf16.mxu0 %vm2802_vm0, %v2801_v0  ;;  %2676 = vmatprep.mubr.msk.bf16.mxu1 %vm2802_vm0, %v2801_v0 }
  0xb8   : > { %2561 = vmatmul.mubr.msk.bf16.gmra.mrb[76].mxu0 %vm641_vm1, %v2773_v43  ;;  %2677 = vmatmul.mubr.msk.bf16.gmra.mrb[76].mxu1 %vm641_vm1, %v2774_v44 }
  0xb9   : > { %2564 = vmatprep.mubr.msk.bf16.mxu0 %vm2802_vm0, %v2801_v0  ;;  %2680 = vmatprep.mubr.msk.bf16.mxu1 %vm2802_vm0, %v2801_v0 }
  0xc0   : > { %2565 = vmatmul.mubr.msk.bf16.gmra.mrb[80].mxu0 %vm641_vm1, %v2775_v45  ;;  %2681 = vmatmul.mubr.msk.bf16.gmra.mrb[80].mxu1 %vm641_vm1, %v2776_v46 }
  0xc1   : > { %2568 = vmatprep.mubr.msk.bf16.mxu0 %vm2802_vm0, %v2801_v0  ;;  %2684 = vmatprep.mubr.msk.bf16.mxu1 %vm2802_vm0, %v2801_v0 }
  0xc8   : > { %2569 = vmatmul.mubr.msk.bf16.gmra.mrb[84].mxu0 %vm641_vm1, %v2777_v47  ;;  %2685 = vmatmul.mubr.msk.bf16.gmra.mrb[84].mxu1 %vm641_vm1, %v2778_v48 }
  0xc9   : > { %2572 = vmatprep.mubr.msk.bf16.mxu0 %vm2802_vm0, %v2801_v0  ;;  %2688 = vmatprep.mubr.msk.bf16.mxu1 %vm2802_vm0, %v2801_v0 }
  0xd0   : > { %2573 = vmatmul.mubr.msk.bf16.gmra.mrb[88].mxu0 %vm641_vm1, %v2779_v49  ;;  %2689 = vmatmul.mubr.msk.bf16.gmra.mrb[88].mxu1 %vm641_vm1, %v2780_v50 }
  0xd1   : > { %2576 = vmatprep.mubr.msk.bf16.mxu0 %vm2802_vm0, %v2801_v0  ;;  %2692 = vmatprep.mubr.msk.bf16.mxu1 %vm2802_vm0, %v2801_v0 }
  0xd8   : > { %2577 = vmatmul.mubr.msk.bf16.gmra.mrb[92].mxu0 %vm641_vm1, %v2781_v51  ;;  %2693 = vmatmul.mubr.msk.bf16.gmra.mrb[92].mxu1 %vm641_vm1, %v2782_v52 }
  0xd9   : > { %2580 = vmatprep.mubr.msk.bf16.mxu0 %vm2802_vm0, %v2801_v0  ;;  %2696 = vmatprep.mubr.msk.bf16.mxu1 %vm2802_vm0, %v2801_v0 }
  0xe0   : > { %2581 = vmatmul.mubr.msk.bf16.gmra.mrb[96].mxu0 %vm641_vm1, %v2783_v53  ;;  %2697 = vmatmul.mubr.msk.bf16.gmra.mrb[96].mxu1 %vm641_vm1, %v2784_v54 }
  0xe1   : > { %2584 = vmatprep.mubr.msk.bf16.mxu0 %vm2802_vm0, %v2801_v0  ;;  %2700 = vmatprep.mubr.msk.bf16.mxu1 %vm2802_vm0, %v2801_v0 }
  0xe8   : > { %2585 = vmatmul.mubr.msk.bf16.gmra.mrb[100].mxu0 %vm641_vm1, %v2785_v55  ;;  %2701 = vmatmul.mubr.msk.bf16.gmra.mrb[100].mxu1 %vm641_vm1, %v2786_v56 }
  0xe9   : > { %2588 = vmatprep.mubr.msk.bf16.mxu0 %vm2802_vm0, %v2801_v0  ;;  %2704 = vmatprep.mubr.msk.bf16.mxu1 %vm2802_vm0, %v2801_v0 }
  0xf0   : > { %2589 = vmatmul.mubr.msk.bf16.gmra.mrb[104].mxu0 %vm641_vm1, %v2787_v57  ;;  %2705 = vmatmul.mubr.msk.bf16.gmra.mrb[104].mxu1 %vm641_vm1, %v2788_v58 }
  0xf1   : > { %2592 = vmatprep.mubr.msk.bf16.mxu0 %vm2802_vm0, %v2801_v0  ;;  %2708 = vmatprep.mubr.msk.bf16.mxu1 %vm2802_vm0, %v2801_v0 }
  0xf3   : > { %v847_v60 = vpop.f32.mrb[0].mxu0  ;;  %v1079_v61 = vpop.f32.mrb[0].mxu1 }
  0xf4   : > { %v848_v62 = vadd.f32 %v3076_v59, %v847_v60  ;;  %v2486_v63 = vpop.f32.mrb[1].mxu0  ;;  %v1080_v2 = vadd.f32 %v3076_v59, %v1079_v61  ;;  %v2602_v3 = vpop.f32.mrb[1].mxu1 }
  0xf5   : > { %v850_v5 = vpop.f32.mrb[2].mxu0  ;;  %v1082_v6 = vpop.f32.mrb[2].mxu1 }
  0xf6   : > { %v1301_v7 = vmax.f32 %v848_v62, 0.0  ;;  %v851_v8 = vadd.f32 %v3076_v59, %v850_v5  ;;  %v2487_v9 = vpop.f32.mrb[3].mxu0  ;;  %v1359_v10 = vmax.f32 %v1080_v2, 0.0  ;;  %v1083_v11 = vadd.f32 %v3076_v59, %v1082_v6  ;;  %v2603_v12 = vpop.f32.mrb[3].mxu1 }
  0xf8   : > { %v2302_v13 = vpack.c.bf16 %v1301_v7, %v1301_v7  ;;  %v1302_v14 = vmax.f32 %v851_v8, 0.0  ;;  %2593 = vmatmul.mubr.msk.bf16.gmra.mrb[108].mxu0 %vm641_vm1, %v2789_v1  ;;  %v2360_v15 = vpack.c.bf16 %v1359_v10, %v1359_v10  ;;  %v1360_v16 = vmax.f32 %v1083_v11, 0.0  ;;  %2709 = vmatmul.mubr.msk.bf16.gmra.mrb[108].mxu1 %vm641_vm1, %v2790_v4 }
  0xf9   : > { %2596 = vmatprep.mubr.msk.bf16.mxu0 %vm2802_vm0, %v2801_v0 }
  0xfa   : > { %1868 = vst.msk [vmem:[%s3093_s27] sm:$0xf] %vm1867_vm2, %v2302_v13  ;;  %v2303_v17 = vpack.c.bf16 %v1302_v14, %v1302_v14  ;;  %1926 = vst.msk [vmem:[%s3093_s27 + $0xe8] sm:$0xf] %vm1867_vm2, %v2360_v15  ;;  %v2361_v18 = vpack.c.bf16 %v1360_v16, %v1360_v16 }
  0xfb   : > { %v855_v19 = vpop.f32.mrb[4].mxu0  ;;  %v1087_v20 = vpop.f32.mrb[4].mxu1 }
  0xfc   : > { %1869 = vst.msk [vmem:[%s3093_s27 + $0x4] sm:$0xf] %vm1867_vm2, %v2303_v17  ;;  %v856_v21 = vadd.f32 %v3076_v59, %v855_v19  ;;  %v2490_v22 = vpop.f32.mrb[5].mxu0  ;;  %1927 = vst.msk [vmem:[%s3093_s27 + $0xec] sm:$0xf] %vm1867_vm2, %v2361_v18  ;;  %v1088_v24 = vadd.f32 %v3076_v59, %v1087_v20  ;;  %v2606_v0 = vpop.f32.mrb[5].mxu1 }
  0xfd   : > { %v858_v25 = vpop.f32.mrb[6].mxu0  ;;  %v1090_v26 = vpop.f32.mrb[6].mxu1 }
  0xfe   : > { %v1303_v27 = vmax.f32 %v856_v21, 0.0  ;;  %v859_v28 = vadd.f32 %v3076_v59, %v858_v25  ;;  %v2491_v29 = vpop.f32.mrb[7].mxu0  ;;  %v1361_v30 = vmax.f32 %v1088_v24, 0.0  ;;  %v1091_v31 = vadd.f32 %v3076_v59, %v1090_v26  ;;  %v2607_v32 = vpop.f32.mrb[7].mxu1 }
 0x100   : > { %v2304_v33 = vpack.c.bf16 %v1303_v27, %v1303_v27  ;;  %v1304_v34 = vmax.f32 %v859_v28, 0.0  ;;  %2597 = vmatmul.mubr.msk.bf16.gmra.mrb[112].mxu0 %vm641_vm1, %v2791_v23  ;;  %v2362_v35 = vpack.c.bf16 %v1361_v30, %v1361_v30  ;;  %v1362_v36 = vmax.f32 %v1091_v31, 0.0 }
 0x102   : > { %1870 = vst.msk [vmem:[%s3093_s27 + $0x8] sm:$0xf] %vm1867_vm2, %v2304_v33  ;;  %v2305_v37 = vpack.c.bf16 %v1304_v34, %v1304_v34  ;;  %1928 = vst.msk [vmem:[%s3093_s27 + $0xf0] sm:$0xf] %vm1867_vm2, %v2362_v35  ;;  %v2363_v38 = vpack.c.bf16 %v1362_v36, %v1362_v36 }
 0x103   : > { %v863_v39 = vpop.f32.mrb[8].mxu0  ;;  %v1095_v40 = vpop.f32.mrb[8].mxu1 }
 0x104   : > { %1871 = vst.msk [vmem:[%s3093_s27 + $0xc] sm:$0xf] %vm1867_vm2, %v2305_v37  ;;  %v864_v41 = vadd.f32 %v3076_v59, %v863_v39  ;;  %v2494_v42 = vpop.f32.mrb[9].mxu0  ;;  %1929 = vst.msk [vmem:[%s3093_s27 + $0xf4] sm:$0xf] %vm1867_vm2, %v2363_v38  ;;  %v1096_v43 = vadd.f32 %v3076_v59, %v1095_v40  ;;  %v2610_v44 = vpop.f32.mrb[9].mxu1 }
 0x105   : > { %v866_v45 = vpop.f32.mrb[10].mxu0  ;;  %v1098_v46 = vpop.f32.mrb[10].mxu1 }
 0x106   : > { %v1305_v47 = vmax.f32 %v864_v41, 0.0  ;;  %v867_v48 = vadd.f32 %v3076_v59, %v866_v45  ;;  %v2495_v49 = vpop.f32.mrb[11].mxu0  ;;  %v1363_v50 = vmax.f32 %v1096_v43, 0.0  ;;  %v1099_v51 = vadd.f32 %v3076_v59, %v1098_v46  ;;  %v2611_v52 = vpop.f32.mrb[11].mxu1 }
 0x108   : > { %v2306_v53 = vpack.c.bf16 %v1305_v47, %v1305_v47  ;;  %v1306_v54 = vmax.f32 %v867_v48, 0.0  ;;  %v2364_v55 = vpack.c.bf16 %v1363_v50, %v1363_v50  ;;  %v1364_v56 = vmax.f32 %v1099_v51, 0.0 }
 0x10a   : > { %1872 = vst.msk [vmem:[%s3093_s27 + $0x10] sm:$0xf] %vm1867_vm2, %v2306_v53  ;;  %v2307_v57 = vpack.c.bf16 %v1306_v54, %v1306_v54  ;;  %1930 = vst.msk [vmem:[%s3093_s27 + $0xf8] sm:$0xf] %vm1867_vm2, %v2364_v55  ;;  %v2365_v58 = vpack.c.bf16 %v1364_v56, %v1364_v56 }
 0x10b   : > { %v871_v60 = vpop.f32.mrb[12].mxu0  ;;  %v1103_v61 = vpop.f32.mrb[12].mxu1 }
 0x10c   : > { %1873 = vst.msk [vmem:[%s3093_s27 + $0x14] sm:$0xf] %vm1867_vm2, %v2307_v57  ;;  %v872_v62 = vadd.f32 %v3076_v59, %v871_v60  ;;  %v2498_v63 = vpop.f32.mrb[13].mxu0  ;;  %1931 = vst.msk [vmem:[%s3093_s27 + $0xfc] sm:$0xf] %vm1867_vm2, %v2365_v58  ;;  %v1104_v1 = vadd.f32 %v3076_v59, %v1103_v61  ;;  %v2614_v2 = vpop.f32.mrb[13].mxu1 }
 0x10d   : > { %v874_v3 = vpop.f32.mrb[14].mxu0  ;;  %v1106_v4 = vpop.f32.mrb[14].mxu1 }
 0x10e   : > { %v1307_v5 = vmax.f32 %v872_v62, 0.0  ;;  %v875_v6 = vadd.f32 %v3076_v59, %v874_v3  ;;  %v2499_v7 = vpop.f32.mrb[15].mxu0  ;;  %v1365_v8 = vmax.f32 %v1104_v1, 0.0  ;;  %v1107_v9 = vadd.f32 %v3076_v59, %v1106_v4  ;;  %v2615_v10 = vpop.f32.mrb[15].mxu1 }
 0x110   : > { %v2308_v11 = vpack.c.bf16 %v1307_v5, %v1307_v5  ;;  %v1308_v12 = vmax.f32 %v875_v6, 0.0  ;;  %v2366_v13 = vpack.c.bf16 %v1365_v8, %v1365_v8  ;;  %v1366_v14 = vmax.f32 %v1107_v9, 0.0 }
 0x112   : > { %1874 = vst.msk [vmem:[%s3093_s27 + $0x18] sm:$0xf] %vm1867_vm2, %v2308_v11  ;;  %v2309_v15 = vpack.c.bf16 %v1308_v12, %v1308_v12  ;;  %1932 = vst.msk [vmem:[%s3093_s27 + $0x100] sm:$0xf] %vm1867_vm2, %v2366_v13  ;;  %v2367_v16 = vpack.c.bf16 %v1366_v14, %v1366_v14 }
 0x113   : > { %v879_v17 = vpop.f32.mrb[16].mxu0  ;;  %v1111_v18 = vpop.f32.mrb[16].mxu1 }
 0x114   : > { %1875 = vst.msk [vmem:[%s3093_s27 + $0x1c] sm:$0xf] %vm1867_vm2, %v2309_v15  ;;  %v880_v19 = vadd.f32 %v3076_v59, %v879_v17  ;;  %v2502_v20 = vpop.f32.mrb[17].mxu0  ;;  %1933 = vst.msk [vmem:[%s3093_s27 + $0x104] sm:$0xf] %vm1867_vm2, %v2367_v16  ;;  %v1112_v21 = vadd.f32 %v3076_v59, %v1111_v18  ;;  %v2618_v22 = vpop.f32.mrb[17].mxu1 }
 0x115   : > { %v882_v23 = vpop.f32.mrb[18].mxu0  ;;  %v1114_v24 = vpop.f32.mrb[18].mxu1 }
 0x116   : > { %v1309_v0 = vmax.f32 %v880_v19, 0.0  ;;  %v883_v25 = vadd.f32 %v3076_v59, %v882_v23  ;;  %v2503_v26 = vpop.f32.mrb[19].mxu0  ;;  %v1367_v27 = vmax.f32 %v1112_v21, 0.0  ;;  %v1115_v28 = vadd.f32 %v3076_v59, %v1114_v24  ;;  %v2619_v29 = vpop.f32.mrb[19].mxu1 }
 0x118   : > { %v2310_v30 = vpack.c.bf16 %v1309_v0, %v1309_v0  ;;  %v1310_v31 = vmax.f32 %v883_v25, 0.0  ;;  %v2368_v32 = vpack.c.bf16 %v1367_v27, %v1367_v27  ;;  %v1368_v33 = vmax.f32 %v1115_v28, 0.0 }
 0x11a   : > { %1876 = vst.msk [vmem:[%s3093_s27 + $0x20] sm:$0xf] %vm1867_vm2, %v2310_v30  ;;  %v2311_v34 = vpack.c.bf16 %v1310_v31, %v1310_v31  ;;  %1934 = vst.msk [vmem:[%s3093_s27 + $0x108] sm:$0xf] %vm1867_vm2, %v2368_v32  ;;  %v2369_v35 = vpack.c.bf16 %v1368_v33, %v1368_v33 }
 0x11b   : > { %v887_v36 = vpop.f32.mrb[20].mxu0  ;;  %v1119_v37 = vpop.f32.mrb[20].mxu1 }
 0x11c   : > { %1877 = vst.msk [vmem:[%s3093_s27 + $0x24] sm:$0xf] %vm1867_vm2, %v2311_v34  ;;  %v888_v38 = vadd.f32 %v3076_v59, %v887_v36  ;;  %v2506_v39 = vpop.f32.mrb[21].mxu0  ;;  %1935 = vst.msk [vmem:[%s3093_s27 + $0x10c] sm:$0xf] %vm1867_vm2, %v2369_v35  ;;  %v1120_v40 = vadd.f32 %v3076_v59, %v1119_v37  ;;  %v2622_v41 = vpop.f32.mrb[21].mxu1 }
 0x11d   : > { %v890_v42 = vpop.f32.mrb[22].mxu0  ;;  %v1122_v43 = vpop.f32.mrb[22].mxu1 }
 0x11e   : > { %v1311_v44 = vmax.f32 %v888_v38, 0.0  ;;  %v891_v45 = vadd.f32 %v3076_v59, %v890_v42  ;;  %v2507_v46 = vpop.f32.mrb[23].mxu0  ;;  %v1369_v47 = vmax.f32 %v1120_v40, 0.0  ;;  %v1123_v48 = vadd.f32 %v3076_v59, %v1122_v43  ;;  %v2623_v49 = vpop.f32.mrb[23].mxu1 }
 0x120   : > { %v2312_v50 = vpack.c.bf16 %v1311_v44, %v1311_v44  ;;  %v1312_v51 = vmax.f32 %v891_v45, 0.0  ;;  %v2370_v52 = vpack.c.bf16 %v1369_v47, %v1369_v47  ;;  %v1370_v53 = vmax.f32 %v1123_v48, 0.0 }
 0x122   : > { %1878 = vst.msk [vmem:[%s3093_s27 + $0x28] sm:$0xf] %vm1867_vm2, %v2312_v50  ;;  %v2313_v54 = vpack.c.bf16 %v1312_v51, %v1312_v51  ;;  %1936 = vst.msk [vmem:[%s3093_s27 + $0x110] sm:$0xf] %vm1867_vm2, %v2370_v52  ;;  %v2371_v55 = vpack.c.bf16 %v1370_v53, %v1370_v53 }
 0x123   : > { %v895_v56 = vpop.f32.mrb[24].mxu0  ;;  %v1127_v57 = vpop.f32.mrb[24].mxu1 }
 0x124   : > { %1879 = vst.msk [vmem:[%s3093_s27 + $0x2c] sm:$0xf] %vm1867_vm2, %v2313_v54  ;;  %v896_v58 = vadd.f32 %v3076_v59, %v895_v56  ;;  %v2510_v60 = vpop.f32.mrb[25].mxu0  ;;  %1937 = vst.msk [vmem:[%s3093_s27 + $0x114] sm:$0xf] %vm1867_vm2, %v2371_v55  ;;  %v1128_v61 = vadd.f32 %v3076_v59, %v1127_v57  ;;  %v2626_v62 = vpop.f32.mrb[25].mxu1 }
 0x125   : > { %v898_v63 = vpop.f32.mrb[26].mxu0  ;;  %v1130_v1 = vpop.f32.mrb[26].mxu1 }
 0x126   : > { %v1313_v2 = vmax.f32 %v896_v58, 0.0  ;;  %v899_v3 = vadd.f32 %v3076_v59, %v898_v63  ;;  %v2511_v4 = vpop.f32.mrb[27].mxu0  ;;  %v1371_v5 = vmax.f32 %v1128_v61, 0.0  ;;  %v1131_v6 = vadd.f32 %v3076_v59, %v1130_v1  ;;  %v2627_v7 = vpop.f32.mrb[27].mxu1 }
 0x128   : > { %v2314_v8 = vpack.c.bf16 %v1313_v2, %v1313_v2  ;;  %v1314_v9 = vmax.f32 %v899_v3, 0.0  ;;  %v2372_v10 = vpack.c.bf16 %v1371_v5, %v1371_v5  ;;  %v1372_v11 = vmax.f32 %v1131_v6, 0.0 }
 0x12a   : > { %1880 = vst.msk [vmem:[%s3093_s27 + $0x30] sm:$0xf] %vm1867_vm2, %v2314_v8  ;;  %v2315_v12 = vpack.c.bf16 %v1314_v9, %v1314_v9  ;;  %1938 = vst.msk [vmem:[%s3093_s27 + $0x118] sm:$0xf] %vm1867_vm2, %v2372_v10  ;;  %v2373_v13 = vpack.c.bf16 %v1372_v11, %v1372_v11 }
 0x12b   : > { %v903_v14 = vpop.f32.mrb[28].mxu0  ;;  %v1135_v15 = vpop.f32.mrb[28].mxu1 }
 0x12c   : > { %1881 = vst.msk [vmem:[%s3093_s27 + $0x34] sm:$0xf] %vm1867_vm2, %v2315_v12  ;;  %v904_v16 = vadd.f32 %v3076_v59, %v903_v14  ;;  %v2514_v17 = vpop.f32.mrb[29].mxu0  ;;  %1939 = vst.msk [vmem:[%s3093_s27 + $0x11c] sm:$0xf] %vm1867_vm2, %v2373_v13  ;;  %v1136_v18 = vadd.f32 %v3076_v59, %v1135_v15  ;;  %v2630_v19 = vpop.f32.mrb[29].mxu1 }
 0x12d   : > { %v906_v20 = vpop.f32.mrb[30].mxu0  ;;  %v1138_v21 = vpop.f32.mrb[30].mxu1 }
 0x12e   : > { %v1315_v22 = vmax.f32 %v904_v16, 0.0  ;;  %v907_v23 = vadd.f32 %v3076_v59, %v906_v20  ;;  %v2515_v24 = vpop.f32.mrb[31].mxu0  ;;  %v1373_v0 = vmax.f32 %v1136_v18, 0.0  ;;  %v1139_v25 = vadd.f32 %v3076_v59, %v1138_v21  ;;  %v2631_v26 = vpop.f32.mrb[31].mxu1 }
 0x130   : > { %v2316_v27 = vpack.c.bf16 %v1315_v22, %v1315_v22  ;;  %v1316_v28 = vmax.f32 %v907_v23, 0.0  ;;  %v2374_v29 = vpack.c.bf16 %v1373_v0, %v1373_v0  ;;  %v1374_v30 = vmax.f32 %v1139_v25, 0.0 }
 0x132   : > { %1882 = vst.msk [vmem:[%s3093_s27 + $0x38] sm:$0xf] %vm1867_vm2, %v2316_v27  ;;  %v2317_v31 = vpack.c.bf16 %v1316_v28, %v1316_v28  ;;  %1940 = vst.msk [vmem:[%s3093_s27 + $0x120] sm:$0xf] %vm1867_vm2, %v2374_v29  ;;  %v2375_v32 = vpack.c.bf16 %v1374_v30, %v1374_v30 }
 0x133   : > { %v911_v33 = vpop.f32.mrb[32].mxu0  ;;  %v1143_v34 = vpop.f32.mrb[32].mxu1 }
 0x134   : > { %1883 = vst.msk [vmem:[%s3093_s27 + $0x3c] sm:$0xf] %vm1867_vm2, %v2317_v31  ;;  %v912_v35 = vadd.f32 %v3076_v59, %v911_v33  ;;  %v2518_v36 = vpop.f32.mrb[33].mxu0  ;;  %1941 = vst.msk [vmem:[%s3093_s27 + $0x124] sm:$0xf] %vm1867_vm2, %v2375_v32  ;;  %v1144_v37 = vadd.f32 %v3076_v59, %v1143_v34  ;;  %v2634_v38 = vpop.f32.mrb[33].mxu1 }
 0x135   : > { %v914_v39 = vpop.f32.mrb[34].mxu0  ;;  %v1146_v40 = vpop.f32.mrb[34].mxu1 }
 0x136   : > { %v1317_v41 = vmax.f32 %v912_v35, 0.0  ;;  %v915_v42 = vadd.f32 %v3076_v59, %v914_v39  ;;  %v2519_v43 = vpop.f32.mrb[35].mxu0  ;;  %v1375_v44 = vmax.f32 %v1144_v37, 0.0  ;;  %v1147_v45 = vadd.f32 %v3076_v59, %v1146_v40  ;;  %v2635_v46 = vpop.f32.mrb[35].mxu1 }
 0x138   : > { %v2318_v47 = vpack.c.bf16 %v1317_v41, %v1317_v41  ;;  %v1318_v48 = vmax.f32 %v915_v42, 0.0  ;;  %v2376_v49 = vpack.c.bf16 %v1375_v44, %v1375_v44  ;;  %v1376_v50 = vmax.f32 %v1147_v45, 0.0 }
 0x13a   : > { %1884 = vst.msk [vmem:[%s3093_s27 + $0x40] sm:$0xf] %vm1867_vm2, %v2318_v47  ;;  %v2319_v51 = vpack.c.bf16 %v1318_v48, %v1318_v48  ;;  %1942 = vst.msk [vmem:[%s3093_s27 + $0x128] sm:$0xf] %vm1867_vm2, %v2376_v49  ;;  %v2377_v52 = vpack.c.bf16 %v1376_v50, %v1376_v50 }
 0x13b   : > { %v919_v53 = vpop.f32.mrb[36].mxu0  ;;  %v1151_v54 = vpop.f32.mrb[36].mxu1 }
 0x13c   : > { %1885 = vst.msk [vmem:[%s3093_s27 + $0x44] sm:$0xf] %vm1867_vm2, %v2319_v51  ;;  %v920_v55 = vadd.f32 %v3076_v59, %v919_v53  ;;  %v2522_v56 = vpop.f32.mrb[37].mxu0  ;;  %1943 = vst.msk [vmem:[%s3093_s27 + $0x12c] sm:$0xf] %vm1867_vm2, %v2377_v52  ;;  %v1152_v57 = vadd.f32 %v3076_v59, %v1151_v54  ;;  %v2638_v58 = vpop.f32.mrb[37].mxu1 }
 0x13d   : > { %v922_v60 = vpop.f32.mrb[38].mxu0  ;;  %v1154_v61 = vpop.f32.mrb[38].mxu1 }
 0x13e   : > { %v1319_v62 = vmax.f32 %v920_v55, 0.0  ;;  %v923_v63 = vadd.f32 %v3076_v59, %v922_v60  ;;  %v2523_v1 = vpop.f32.mrb[39].mxu0  ;;  %v1377_v2 = vmax.f32 %v1152_v57, 0.0  ;;  %v1155_v3 = vadd.f32 %v3076_v59, %v1154_v61  ;;  %v2639_v4 = vpop.f32.mrb[39].mxu1 }
 0x140   : > { %v2320_v5 = vpack.c.bf16 %v1319_v62, %v1319_v62  ;;  %v1320_v6 = vmax.f32 %v923_v63, 0.0  ;;  %v2378_v7 = vpack.c.bf16 %v1377_v2, %v1377_v2  ;;  %v1378_v8 = vmax.f32 %v1155_v3, 0.0 }
 0x142   : > { %1886 = vst.msk [vmem:[%s3093_s27 + $0x48] sm:$0xf] %vm1867_vm2, %v2320_v5  ;;  %v2321_v9 = vpack.c.bf16 %v1320_v6, %v1320_v6  ;;  %1944 = vst.msk [vmem:[%s3093_s27 + $0x130] sm:$0xf] %vm1867_vm2, %v2378_v7  ;;  %v2379_v10 = vpack.c.bf16 %v1378_v8, %v1378_v8 }
 0x143   : > { %v927_v11 = vpop.f32.mrb[40].mxu0  ;;  %v1159_v12 = vpop.f32.mrb[40].mxu1 }
 0x144   : > { %1887 = vst.msk [vmem:[%s3093_s27 + $0x4c] sm:$0xf] %vm1867_vm2, %v2321_v9  ;;  %v928_v13 = vadd.f32 %v3076_v59, %v927_v11  ;;  %v2526_v14 = vpop.f32.mrb[41].mxu0  ;;  %1945 = vst.msk [vmem:[%s3093_s27 + $0x134] sm:$0xf] %vm1867_vm2, %v2379_v10  ;;  %v1160_v15 = vadd.f32 %v3076_v59, %v1159_v12  ;;  %v2642_v16 = vpop.f32.mrb[41].mxu1 }
 0x145   : > { %v930_v17 = vpop.f32.mrb[42].mxu0  ;;  %v1162_v18 = vpop.f32.mrb[42].mxu1 }
 0x146   : > { %v1321_v19 = vmax.f32 %v928_v13, 0.0  ;;  %v931_v20 = vadd.f32 %v3076_v59, %v930_v17  ;;  %v2527_v21 = vpop.f32.mrb[43].mxu0  ;;  %v1379_v22 = vmax.f32 %v1160_v15, 0.0  ;;  %v1163_v23 = vadd.f32 %v3076_v59, %v1162_v18  ;;  %v2643_v24 = vpop.f32.mrb[43].mxu1 }
 0x148   : > { %v2322_v0 = vpack.c.bf16 %v1321_v19, %v1321_v19  ;;  %v1322_v25 = vmax.f32 %v931_v20, 0.0  ;;  %v2380_v26 = vpack.c.bf16 %v1379_v22, %v1379_v22  ;;  %v1380_v27 = vmax.f32 %v1163_v23, 0.0 }
 0x14a   : > { %1888 = vst.msk [vmem:[%s3093_s27 + $0x50] sm:$0xf] %vm1867_vm2, %v2322_v0  ;;  %v2323_v28 = vpack.c.bf16 %v1322_v25, %v1322_v25  ;;  %1946 = vst.msk [vmem:[%s3093_s27 + $0x138] sm:$0xf] %vm1867_vm2, %v2380_v26  ;;  %v2381_v29 = vpack.c.bf16 %v1380_v27, %v1380_v27 }
 0x14b   : > { %v935_v30 = vpop.f32.mrb[44].mxu0  ;;  %v1167_v31 = vpop.f32.mrb[44].mxu1 }
 0x14c   : > { %1889 = vst.msk [vmem:[%s3093_s27 + $0x54] sm:$0xf] %vm1867_vm2, %v2323_v28  ;;  %v936_v32 = vadd.f32 %v3076_v59, %v935_v30  ;;  %v2530_v33 = vpop.f32.mrb[45].mxu0  ;;  %1947 = vst.msk [vmem:[%s3093_s27 + $0x13c] sm:$0xf] %vm1867_vm2, %v2381_v29  ;;  %v1168_v34 = vadd.f32 %v3076_v59, %v1167_v31  ;;  %v2646_v35 = vpop.f32.mrb[45].mxu1 }
 0x14d   : > { %v938_v36 = vpop.f32.mrb[46].mxu0  ;;  %v1170_v37 = vpop.f32.mrb[46].mxu1 }
 0x14e   : > { %v1323_v38 = vmax.f32 %v936_v32, 0.0  ;;  %v939_v39 = vadd.f32 %v3076_v59, %v938_v36  ;;  %v2531_v40 = vpop.f32.mrb[47].mxu0  ;;  %v1381_v41 = vmax.f32 %v1168_v34, 0.0  ;;  %v1171_v42 = vadd.f32 %v3076_v59, %v1170_v37  ;;  %v2647_v43 = vpop.f32.mrb[47].mxu1 }
 0x150   : > { %v2324_v44 = vpack.c.bf16 %v1323_v38, %v1323_v38  ;;  %v1324_v45 = vmax.f32 %v939_v39, 0.0  ;;  %v2382_v46 = vpack.c.bf16 %v1381_v41, %v1381_v41  ;;  %v1382_v47 = vmax.f32 %v1171_v42, 0.0 }
 0x152   : > { %1890 = vst.msk [vmem:[%s3093_s27 + $0x58] sm:$0xf] %vm1867_vm2, %v2324_v44  ;;  %v2325_v48 = vpack.c.bf16 %v1324_v45, %v1324_v45  ;;  %1948 = vst.msk [vmem:[%s3093_s27 + $0x140] sm:$0xf] %vm1867_vm2, %v2382_v46  ;;  %v2383_v49 = vpack.c.bf16 %v1382_v47, %v1382_v47 }
 0x153   : > { %v943_v50 = vpop.f32.mrb[48].mxu0  ;;  %v1175_v51 = vpop.f32.mrb[48].mxu1 }
 0x154   : > { %1891 = vst.msk [vmem:[%s3093_s27 + $0x5c] sm:$0xf] %vm1867_vm2, %v2325_v48  ;;  %v944_v52 = vadd.f32 %v3076_v59, %v943_v50  ;;  %v2534_v53 = vpop.f32.mrb[49].mxu0  ;;  %1949 = vst.msk [vmem:[%s3093_s27 + $0x144] sm:$0xf] %vm1867_vm2, %v2383_v49  ;;  %v1176_v54 = vadd.f32 %v3076_v59, %v1175_v51  ;;  %v2650_v55 = vpop.f32.mrb[49].mxu1 }
 0x155   : > { %v946_v56 = vpop.f32.mrb[50].mxu0  ;;  %v1178_v57 = vpop.f32.mrb[50].mxu1 }
 0x156   : > { %v1325_v58 = vmax.f32 %v944_v52, 0.0  ;;  %v947_v60 = vadd.f32 %v3076_v59, %v946_v56  ;;  %v2535_v61 = vpop.f32.mrb[51].mxu0  ;;  %v1383_v62 = vmax.f32 %v1176_v54, 0.0  ;;  %v1179_v63 = vadd.f32 %v3076_v59, %v1178_v57  ;;  %v2651_v1 = vpop.f32.mrb[51].mxu1 }
 0x158   : > { %v2326_v2 = vpack.c.bf16 %v1325_v58, %v1325_v58  ;;  %v1326_v3 = vmax.f32 %v947_v60, 0.0  ;;  %v2384_v4 = vpack.c.bf16 %v1383_v62, %v1383_v62  ;;  %v1384_v5 = vmax.f32 %v1179_v63, 0.0 }
 0x15a   : > { %1892 = vst.msk [vmem:[%s3093_s27 + $0x60] sm:$0xf] %vm1867_vm2, %v2326_v2  ;;  %v2327_v6 = vpack.c.bf16 %v1326_v3, %v1326_v3  ;;  %1950 = vst.msk [vmem:[%s3093_s27 + $0x148] sm:$0xf] %vm1867_vm2, %v2384_v4  ;;  %v2385_v7 = vpack.c.bf16 %v1384_v5, %v1384_v5 }
 0x15b   : > { %v951_v8 = vpop.f32.mrb[52].mxu0  ;;  %v1183_v9 = vpop.f32.mrb[52].mxu1 }
 0x15c   : > { %1893 = vst.msk [vmem:[%s3093_s27 + $0x64] sm:$0xf] %vm1867_vm2, %v2327_v6  ;;  %v952_v10 = vadd.f32 %v3076_v59, %v951_v8  ;;  %v2538_v11 = vpop.f32.mrb[53].mxu0  ;;  %1951 = vst.msk [vmem:[%s3093_s27 + $0x14c] sm:$0xf] %vm1867_vm2, %v2385_v7  ;;  %v1184_v12 = vadd.f32 %v3076_v59, %v1183_v9  ;;  %v2654_v13 = vpop.f32.mrb[53].mxu1 }
 0x15d   : > { %v954_v14 = vpop.f32.mrb[54].mxu0  ;;  %v1186_v15 = vpop.f32.mrb[54].mxu1 }
 0x15e   : > { %v1327_v16 = vmax.f32 %v952_v10, 0.0  ;;  %v955_v17 = vadd.f32 %v3076_v59, %v954_v14  ;;  %v2539_v18 = vpop.f32.mrb[55].mxu0  ;;  %v1385_v19 = vmax.f32 %v1184_v12, 0.0  ;;  %v1187_v20 = vadd.f32 %v3076_v59, %v1186_v15  ;;  %v2655_v21 = vpop.f32.mrb[55].mxu1 }
 0x160   : > { %v2328_v22 = vpack.c.bf16 %v1327_v16, %v1327_v16  ;;  %v1328_v23 = vmax.f32 %v955_v17, 0.0  ;;  %v2386_v24 = vpack.c.bf16 %v1385_v19, %v1385_v19  ;;  %v1386_v0 = vmax.f32 %v1187_v20, 0.0 }
 0x162   : > { %1894 = vst.msk [vmem:[%s3093_s27 + $0x68] sm:$0xf] %vm1867_vm2, %v2328_v22  ;;  %v2329_v25 = vpack.c.bf16 %v1328_v23, %v1328_v23  ;;  %1952 = vst.msk [vmem:[%s3093_s27 + $0x150] sm:$0xf] %vm1867_vm2, %v2386_v24  ;;  %v2387_v26 = vpack.c.bf16 %v1386_v0, %v1386_v0 }
 0x163   : > { %v959_v27 = vpop.f32.mrb[56].mxu0  ;;  %v1191_v28 = vpop.f32.mrb[56].mxu1 }
 0x164   : > { %1895 = vst.msk [vmem:[%s3093_s27 + $0x6c] sm:$0xf] %vm1867_vm2, %v2329_v25  ;;  %v960_v29 = vadd.f32 %v3076_v59, %v959_v27  ;;  %v2542_v30 = vpop.f32.mrb[57].mxu0  ;;  %1953 = vst.msk [vmem:[%s3093_s27 + $0x154] sm:$0xf] %vm1867_vm2, %v2387_v26  ;;  %v1192_v31 = vadd.f32 %v3076_v59, %v1191_v28  ;;  %v2658_v32 = vpop.f32.mrb[57].mxu1 }
 0x165   : > { %v962_v33 = vpop.f32.mrb[58].mxu0  ;;  %v1194_v34 = vpop.f32.mrb[58].mxu1 }
 0x166   : > { %v1329_v35 = vmax.f32 %v960_v29, 0.0  ;;  %v963_v36 = vadd.f32 %v3076_v59, %v962_v33  ;;  %v2543_v37 = vpop.f32.mrb[59].mxu0  ;;  %v1387_v38 = vmax.f32 %v1192_v31, 0.0  ;;  %v1195_v39 = vadd.f32 %v3076_v59, %v1194_v34  ;;  %v2659_v40 = vpop.f32.mrb[59].mxu1 }
 0x168   : > { %v2330_v41 = vpack.c.bf16 %v1329_v35, %v1329_v35  ;;  %v1330_v42 = vmax.f32 %v963_v36, 0.0  ;;  %v2388_v43 = vpack.c.bf16 %v1387_v38, %v1387_v38  ;;  %v1388_v44 = vmax.f32 %v1195_v39, 0.0 }
 0x16a   : > { %1896 = vst.msk [vmem:[%s3093_s27 + $0x70] sm:$0xf] %vm1867_vm2, %v2330_v41  ;;  %v2331_v45 = vpack.c.bf16 %v1330_v42, %v1330_v42  ;;  %1954 = vst.msk [vmem:[%s3093_s27 + $0x158] sm:$0xf] %vm1867_vm2, %v2388_v43  ;;  %v2389_v46 = vpack.c.bf16 %v1388_v44, %v1388_v44 }
 0x16b   : > { %v967_v47 = vpop.f32.mrb[60].mxu0  ;;  %v1199_v48 = vpop.f32.mrb[60].mxu1 }
 0x16c   : > { %1897 = vst.msk [vmem:[%s3093_s27 + $0x74] sm:$0xf] %vm1867_vm2, %v2331_v45  ;;  %v968_v49 = vadd.f32 %v3076_v59, %v967_v47  ;;  %v2546_v50 = vpop.f32.mrb[61].mxu0  ;;  %1955 = vst.msk [vmem:[%s3093_s27 + $0x15c] sm:$0xf] %vm1867_vm2, %v2389_v46  ;;  %v1200_v51 = vadd.f32 %v3076_v59, %v1199_v48  ;;  %v2662_v52 = vpop.f32.mrb[61].mxu1 }
 0x16d   : > { %v970_v53 = vpop.f32.mrb[62].mxu0  ;;  %v1202_v54 = vpop.f32.mrb[62].mxu1 }
 0x16e   : > { %v1331_v55 = vmax.f32 %v968_v49, 0.0  ;;  %v971_v56 = vadd.f32 %v3076_v59, %v970_v53  ;;  %v2547_v57 = vpop.f32.mrb[63].mxu0  ;;  %v1389_v58 = vmax.f32 %v1200_v51, 0.0  ;;  %v1203_v60 = vadd.f32 %v3076_v59, %v1202_v54  ;;  %v2663_v61 = vpop.f32.mrb[63].mxu1 }
 0x170   : > { %v2332_v62 = vpack.c.bf16 %v1331_v55, %v1331_v55  ;;  %v1332_v63 = vmax.f32 %v971_v56, 0.0  ;;  %v2390_v1 = vpack.c.bf16 %v1389_v58, %v1389_v58  ;;  %v1390_v2 = vmax.f32 %v1203_v60, 0.0 }
 0x172   : > { %1898 = vst.msk [vmem:[%s3093_s27 + $0x78] sm:$0xf] %vm1867_vm2, %v2332_v62  ;;  %v2333_v3 = vpack.c.bf16 %v1332_v63, %v1332_v63  ;;  %1956 = vst.msk [vmem:[%s3093_s27 + $0x160] sm:$0xf] %vm1867_vm2, %v2390_v1  ;;  %v2391_v4 = vpack.c.bf16 %v1390_v2, %v1390_v2 }
 0x173   : > { %v975_v5 = vpop.f32.mrb[64].mxu0  ;;  %v1207_v6 = vpop.f32.mrb[64].mxu1 }
 0x174   : > { %1899 = vst.msk [vmem:[%s3093_s27 + $0x7c] sm:$0xf] %vm1867_vm2, %v2333_v3  ;;  %v976_v7 = vadd.f32 %v3076_v59, %v975_v5  ;;  %v2550_v8 = vpop.f32.mrb[65].mxu0  ;;  %1957 = vst.msk [vmem:[%s3093_s27 + $0x164] sm:$0xf] %vm1867_vm2, %v2391_v4  ;;  %v1208_v9 = vadd.f32 %v3076_v59, %v1207_v6  ;;  %v2666_v10 = vpop.f32.mrb[65].mxu1 }
 0x175   : > { %v978_v11 = vpop.f32.mrb[66].mxu0  ;;  %v1210_v12 = vpop.f32.mrb[66].mxu1 }
 0x176   : > { %v1333_v13 = vmax.f32 %v976_v7, 0.0  ;;  %v979_v14 = vadd.f32 %v3076_v59, %v978_v11  ;;  %v2551_v15 = vpop.f32.mrb[67].mxu0  ;;  %v1391_v16 = vmax.f32 %v1208_v9, 0.0  ;;  %v1211_v17 = vadd.f32 %v3076_v59, %v1210_v12  ;;  %v2667_v18 = vpop.f32.mrb[67].mxu1 }
 0x178   : > { %v2334_v19 = vpack.c.bf16 %v1333_v13, %v1333_v13  ;;  %v1334_v20 = vmax.f32 %v979_v14, 0.0  ;;  %v2392_v21 = vpack.c.bf16 %v1391_v16, %v1391_v16  ;;  %v1392_v22 = vmax.f32 %v1211_v17, 0.0 }
 0x17a   : > { %1900 = vst.msk [vmem:[%s3093_s27 + $0x80] sm:$0xf] %vm1867_vm2, %v2334_v19  ;;  %v2335_v23 = vpack.c.bf16 %v1334_v20, %v1334_v20  ;;  %1958 = vst.msk [vmem:[%s3093_s27 + $0x168] sm:$0xf] %vm1867_vm2, %v2392_v21  ;;  %v2393_v24 = vpack.c.bf16 %v1392_v22, %v1392_v22 }
 0x17b   : > { %v983_v0 = vpop.f32.mrb[68].mxu0  ;;  %v1215_v25 = vpop.f32.mrb[68].mxu1 }
 0x17c   : > { %1901 = vst.msk [vmem:[%s3093_s27 + $0x84] sm:$0xf] %vm1867_vm2, %v2335_v23  ;;  %v984_v26 = vadd.f32 %v3076_v59, %v983_v0  ;;  %v2554_v27 = vpop.f32.mrb[69].mxu0  ;;  %1959 = vst.msk [vmem:[%s3093_s27 + $0x16c] sm:$0xf] %vm1867_vm2, %v2393_v24  ;;  %v1216_v28 = vadd.f32 %v3076_v59, %v1215_v25  ;;  %v2670_v29 = vpop.f32.mrb[69].mxu1 }
 0x17d   : > { %v986_v30 = vpop.f32.mrb[70].mxu0  ;;  %v1218_v31 = vpop.f32.mrb[70].mxu1 }
 0x17e   : > { %v1335_v32 = vmax.f32 %v984_v26, 0.0  ;;  %v987_v33 = vadd.f32 %v3076_v59, %v986_v30  ;;  %v2555_v34 = vpop.f32.mrb[71].mxu0  ;;  %v1393_v35 = vmax.f32 %v1216_v28, 0.0  ;;  %v1219_v36 = vadd.f32 %v3076_v59, %v1218_v31  ;;  %v2671_v37 = vpop.f32.mrb[71].mxu1 }
 0x180   : > { %v2336_v38 = vpack.c.bf16 %v1335_v32, %v1335_v32  ;;  %v1336_v39 = vmax.f32 %v987_v33, 0.0  ;;  %v2394_v40 = vpack.c.bf16 %v1393_v35, %v1393_v35  ;;  %v1394_v41 = vmax.f32 %v1219_v36, 0.0 }
 0x182   : > { %1902 = vst.msk [vmem:[%s3093_s27 + $0x88] sm:$0xf] %vm1867_vm2, %v2336_v38  ;;  %v2337_v42 = vpack.c.bf16 %v1336_v39, %v1336_v39  ;;  %1960 = vst.msk [vmem:[%s3093_s27 + $0x170] sm:$0xf] %vm1867_vm2, %v2394_v40  ;;  %v2395_v43 = vpack.c.bf16 %v1394_v41, %v1394_v41 }
 0x183   : > { %v991_v44 = vpop.f32.mrb[72].mxu0  ;;  %v1223_v45 = vpop.f32.mrb[72].mxu1 }
 0x184   : > { %1903 = vst.msk [vmem:[%s3093_s27 + $0x8c] sm:$0xf] %vm1867_vm2, %v2337_v42  ;;  %v992_v46 = vadd.f32 %v3076_v59, %v991_v44  ;;  %v2558_v47 = vpop.f32.mrb[73].mxu0  ;;  %1961 = vst.msk [vmem:[%s3093_s27 + $0x174] sm:$0xf] %vm1867_vm2, %v2395_v43  ;;  %v1224_v48 = vadd.f32 %v3076_v59, %v1223_v45  ;;  %v2674_v49 = vpop.f32.mrb[73].mxu1 }
 0x185   : > { %v994_v50 = vpop.f32.mrb[74].mxu0  ;;  %v1226_v51 = vpop.f32.mrb[74].mxu1  ;;  %v3348_v43 = vld [vmem:[%s3071_s24] ss:$0 sm:$0xff] }
 0x186   : > { %v1337_v52 = vmax.f32 %v992_v46, 0.0  ;;  %v995_v53 = vadd.f32 %v3076_v59, %v994_v50  ;;  %v2559_v54 = vpop.f32.mrb[75].mxu0  ;;  %v1395_v55 = vmax.f32 %v1224_v48, 0.0  ;;  %v1227_v56 = vadd.f32 %v3076_v59, %v1226_v51  ;;  %v2675_v57 = vpop.f32.mrb[75].mxu1 }
 0x188   : > { %v2338_v58 = vpack.c.bf16 %v1337_v52, %v1337_v52  ;;  %v1338_v60 = vmax.f32 %v995_v53, 0.0  ;;  %v2396_v61 = vpack.c.bf16 %v1395_v55, %v1395_v55  ;;  %v1396_v62 = vmax.f32 %v1227_v56, 0.0 }
 0x18a   : > { %1904 = vst.msk [vmem:[%s3093_s27 + $0x90] sm:$0xf] %vm1867_vm2, %v2338_v58  ;;  %v2339_v63 = vpack.c.bf16 %v1338_v60, %v1338_v60  ;;  %1962 = vst.msk [vmem:[%s3093_s27 + $0x178] sm:$0xf] %vm1867_vm2, %v2396_v61  ;;  %v2397_v1 = vpack.c.bf16 %v1396_v62, %v1396_v62 }
 0x18b   : > { %v999_v2 = vpop.f32.mrb[76].mxu0  ;;  %v1231_v3 = vpop.f32.mrb[76].mxu1 }
 0x18c   : > { %1905 = vst.msk [vmem:[%s3093_s27 + $0x94] sm:$0xf] %vm1867_vm2, %v2339_v63  ;;  %v1000_v4 = vadd.f32 %v3076_v59, %v999_v2  ;;  %v2562_v5 = vpop.f32.mrb[77].mxu0  ;;  %1963 = vst.msk [vmem:[%s3093_s27 + $0x17c] sm:$0xf] %vm1867_vm2, %v2397_v1  ;;  %v1232_v6 = vadd.f32 %v3076_v59, %v1231_v3  ;;  %v2678_v7 = vpop.f32.mrb[77].mxu1 }
 0x18d   : > { %v1002_v8 = vpop.f32.mrb[78].mxu0  ;;  %v1234_v9 = vpop.f32.mrb[78].mxu1 }
 0x18e   : > { %v1339_v10 = vmax.f32 %v1000_v4, 0.0  ;;  %v1003_v11 = vadd.f32 %v3076_v59, %v1002_v8  ;;  %v2563_v12 = vpop.f32.mrb[79].mxu0  ;;  %v1397_v13 = vmax.f32 %v1232_v6, 0.0  ;;  %v1235_v14 = vadd.f32 %v3076_v59, %v1234_v9  ;;  %v2679_v15 = vpop.f32.mrb[79].mxu1 }
 0x190   : > { %v2340_v16 = vpack.c.bf16 %v1339_v10, %v1339_v10  ;;  %v1340_v17 = vmax.f32 %v1003_v11, 0.0  ;;  %v2398_v18 = vpack.c.bf16 %v1397_v13, %v1397_v13  ;;  %v1398_v19 = vmax.f32 %v1235_v14, 0.0 }
 0x192   : > { %1906 = vst.msk [vmem:[%s3093_s27 + $0x98] sm:$0xf] %vm1867_vm2, %v2340_v16  ;;  %v2341_v20 = vpack.c.bf16 %v1340_v17, %v1340_v17  ;;  %1964 = vst.msk [vmem:[%s3093_s27 + $0x180] sm:$0xf] %vm1867_vm2, %v2398_v18  ;;  %v2399_v21 = vpack.c.bf16 %v1398_v19, %v1398_v19 }
 0x193   : > { %v1007_v22 = vpop.f32.mrb[80].mxu0  ;;  %v1239_v23 = vpop.f32.mrb[80].mxu1 }
 0x194   : > { %1907 = vst.msk [vmem:[%s3093_s27 + $0x9c] sm:$0xf] %vm1867_vm2, %v2341_v20  ;;  %v1008_v24 = vadd.f32 %v3076_v59, %v1007_v22  ;;  %v2566_v0 = vpop.f32.mrb[81].mxu0  ;;  %1965 = vst.msk [vmem:[%s3093_s27 + $0x184] sm:$0xf] %vm1867_vm2, %v2399_v21  ;;  %v1240_v25 = vadd.f32 %v3076_v59, %v1239_v23  ;;  %v2682_v26 = vpop.f32.mrb[81].mxu1 }
 0x195   : > { %v1010_v27 = vpop.f32.mrb[82].mxu0  ;;  %v1242_v28 = vpop.f32.mrb[82].mxu1 }
 0x196   : > { %v1341_v29 = vmax.f32 %v1008_v24, 0.0  ;;  %v1011_v30 = vadd.f32 %v3076_v59, %v1010_v27  ;;  %v2567_v31 = vpop.f32.mrb[83].mxu0  ;;  %v1399_v32 = vmax.f32 %v1240_v25, 0.0  ;;  %v1243_v33 = vadd.f32 %v3076_v59, %v1242_v28  ;;  %v2683_v34 = vpop.f32.mrb[83].mxu1 }
 0x198   : > { %v2342_v35 = vpack.c.bf16 %v1341_v29, %v1341_v29  ;;  %v1342_v36 = vmax.f32 %v1011_v30, 0.0  ;;  %v2400_v37 = vpack.c.bf16 %v1399_v32, %v1399_v32  ;;  %v1400_v38 = vmax.f32 %v1243_v33, 0.0 }
 0x19a   : > { %1908 = vst.msk [vmem:[%s3093_s27 + $0xa0] sm:$0xf] %vm1867_vm2, %v2342_v35  ;;  %v2343_v39 = vpack.c.bf16 %v1342_v36, %v1342_v36  ;;  %1966 = vst.msk [vmem:[%s3093_s27 + $0x188] sm:$0xf] %vm1867_vm2, %v2400_v37  ;;  %v2401_v40 = vpack.c.bf16 %v1400_v38, %v1400_v38 }
 0x19b   : > { %v1015_v41 = vpop.f32.mrb[84].mxu0  ;;  %v1247_v42 = vpop.f32.mrb[84].mxu1 }
 0x19c   : > { %1909 = vst.msk [vmem:[%s3093_s27 + $0xa4] sm:$0xf] %vm1867_vm2, %v2343_v39  ;;  %v1016_v59 = vadd.f32 %v3348_v43, %v1015_v41  ;;  %v2570_v44 = vpop.f32.mrb[85].mxu0  ;;  %1967 = vst.msk [vmem:[%s3093_s27 + $0x18c] sm:$0xf] %vm1867_vm2, %v2401_v40  ;;  %v1248_v45 = vadd.f32 %v3348_v43, %v1247_v42  ;;  %v2686_v46 = vpop.f32.mrb[85].mxu1 }
 0x19d   : > { %v1018_v47 = vpop.f32.mrb[86].mxu0  ;;  %v1250_v48 = vpop.f32.mrb[86].mxu1 }
 0x19e   : > { %v1343_v49 = vmax.f32 %v1016_v59, 0.0  ;;  %v1019_v50 = vadd.f32 %v3348_v43, %v1018_v47  ;;  %v2571_v51 = vpop.f32.mrb[87].mxu0  ;;  %v1401_v52 = vmax.f32 %v1248_v45, 0.0  ;;  %v1251_v53 = vadd.f32 %v3348_v43, %v1250_v48  ;;  %v2687_v54 = vpop.f32.mrb[87].mxu1 }
 0x1a0   : > { %v2344_v55 = vpack.c.bf16 %v1343_v49, %v1343_v49  ;;  %v1344_v56 = vmax.f32 %v1019_v50, 0.0  ;;  %v2402_v57 = vpack.c.bf16 %v1401_v52, %v1401_v52  ;;  %v1402_v58 = vmax.f32 %v1251_v53, 0.0 }
 0x1a2   : > { %1910 = vst.msk [vmem:[%s3093_s27 + $0xa8] sm:$0xf] %vm1867_vm2, %v2344_v55  ;;  %v2345_v60 = vpack.c.bf16 %v1344_v56, %v1344_v56  ;;  %1968 = vst.msk [vmem:[%s3093_s27 + $0x190] sm:$0xf] %vm1867_vm2, %v2402_v57  ;;  %v2403_v61 = vpack.c.bf16 %v1402_v58, %v1402_v58 }
 0x1a3   : > { %v1023_v62 = vpop.f32.mrb[88].mxu0  ;;  %v1255_v63 = vpop.f32.mrb[88].mxu1 }
 0x1a4   : > { %1911 = vst.msk [vmem:[%s3093_s27 + $0xac] sm:$0xf] %vm1867_vm2, %v2345_v60  ;;  %v1024_v1 = vadd.f32 %v3348_v43, %v1023_v62  ;;  %v2574_v2 = vpop.f32.mrb[89].mxu0  ;;  %1969 = vst.msk [vmem:[%s3093_s27 + $0x194] sm:$0xf] %vm1867_vm2, %v2403_v61  ;;  %v1256_v3 = vadd.f32 %v3348_v43, %v1255_v63  ;;  %v2690_v4 = vpop.f32.mrb[89].mxu1 }
 0x1a5   : > { %v1026_v5 = vpop.f32.mrb[90].mxu0  ;;  %v1258_v6 = vpop.f32.mrb[90].mxu1 }
 0x1a6   : > { %v1345_v7 = vmax.f32 %v1024_v1, 0.0  ;;  %v1027_v8 = vadd.f32 %v3348_v43, %v1026_v5  ;;  %v2575_v9 = vpop.f32.mrb[91].mxu0  ;;  %v1403_v10 = vmax.f32 %v1256_v3, 0.0  ;;  %v1259_v11 = vadd.f32 %v3348_v43, %v1258_v6  ;;  %v2691_v12 = vpop.f32.mrb[91].mxu1 }
 0x1a8   : > { %v2346_v13 = vpack.c.bf16 %v1345_v7, %v1345_v7  ;;  %v1346_v14 = vmax.f32 %v1027_v8, 0.0  ;;  %v2404_v15 = vpack.c.bf16 %v1403_v10, %v1403_v10  ;;  %v1404_v16 = vmax.f32 %v1259_v11, 0.0 }
 0x1aa   : > { %1912 = vst.msk [vmem:[%s3093_s27 + $0xb0] sm:$0xf] %vm1867_vm2, %v2346_v13  ;;  %v2347_v17 = vpack.c.bf16 %v1346_v14, %v1346_v14  ;;  %1970 = vst.msk [vmem:[%s3093_s27 + $0x198] sm:$0xf] %vm1867_vm2, %v2404_v15  ;;  %v2405_v18 = vpack.c.bf16 %v1404_v16, %v1404_v16 }
 0x1ab   : > { %v1031_v19 = vpop.f32.mrb[92].mxu0  ;;  %v1263_v20 = vpop.f32.mrb[92].mxu1 }
 0x1ac   : > { %1913 = vst.msk [vmem:[%s3093_s27 + $0xb4] sm:$0xf] %vm1867_vm2, %v2347_v17  ;;  %v1032_v21 = vadd.f32 %v3348_v43, %v1031_v19  ;;  %v2578_v22 = vpop.f32.mrb[93].mxu0  ;;  %1971 = vst.msk [vmem:[%s3093_s27 + $0x19c] sm:$0xf] %vm1867_vm2, %v2405_v18  ;;  %v1264_v23 = vadd.f32 %v3348_v43, %v1263_v20  ;;  %v2694_v24 = vpop.f32.mrb[93].mxu1 }
 0x1ad   : > { %v1034_v0 = vpop.f32.mrb[94].mxu0  ;;  %v1266_v25 = vpop.f32.mrb[94].mxu1 }
 0x1ae   : > { %v1347_v26 = vmax.f32 %v1032_v21, 0.0  ;;  %v1035_v27 = vadd.f32 %v3348_v43, %v1034_v0  ;;  %v2579_v28 = vpop.f32.mrb[95].mxu0  ;;  %v1405_v29 = vmax.f32 %v1264_v23, 0.0  ;;  %v1267_v30 = vadd.f32 %v3348_v43, %v1266_v25  ;;  %v2695_v31 = vpop.f32.mrb[95].mxu1 }
 0x1b0   : > { %v2348_v32 = vpack.c.bf16 %v1347_v26, %v1347_v26  ;;  %v1348_v33 = vmax.f32 %v1035_v27, 0.0  ;;  %v2406_v34 = vpack.c.bf16 %v1405_v29, %v1405_v29  ;;  %v1406_v35 = vmax.f32 %v1267_v30, 0.0 }
 0x1b2   : > { %1914 = vst.msk [vmem:[%s3093_s27 + $0xb8] sm:$0xf] %vm1867_vm2, %v2348_v32  ;;  %v2349_v36 = vpack.c.bf16 %v1348_v33, %v1348_v33  ;;  %1972 = vst.msk [vmem:[%s3093_s27 + $0x1a0] sm:$0xf] %vm1867_vm2, %v2406_v34  ;;  %v2407_v37 = vpack.c.bf16 %v1406_v35, %v1406_v35 }
 0x1b3   : > { %v1039_v38 = vpop.f32.mrb[96].mxu0  ;;  %v1271_v39 = vpop.f32.mrb[96].mxu1 }
 0x1b4   : > { %1915 = vst.msk [vmem:[%s3093_s27 + $0xbc] sm:$0xf] %vm1867_vm2, %v2349_v36  ;;  %v1040_v40 = vadd.f32 %v3348_v43, %v1039_v38  ;;  %v2582_v41 = vpop.f32.mrb[97].mxu0  ;;  %1973 = vst.msk [vmem:[%s3093_s27 + $0x1a4] sm:$0xf] %vm1867_vm2, %v2407_v37  ;;  %v1272_v42 = vadd.f32 %v3348_v43, %v1271_v39  ;;  %v2698_v59 = vpop.f32.mrb[97].mxu1 }
 0x1b5   : > { %v1042_v44 = vpop.f32.mrb[98].mxu0  ;;  %v1274_v45 = vpop.f32.mrb[98].mxu1 }
 0x1b6   : > { %v1349_v46 = vmax.f32 %v1040_v40, 0.0  ;;  %v1043_v47 = vadd.f32 %v3348_v43, %v1042_v44  ;;  %v2583_v48 = vpop.f32.mrb[99].mxu0  ;;  %v1407_v49 = vmax.f32 %v1272_v42, 0.0  ;;  %v1275_v50 = vadd.f32 %v3348_v43, %v1274_v45  ;;  %v2699_v51 = vpop.f32.mrb[99].mxu1 }
 0x1b8   : > { %v2350_v52 = vpack.c.bf16 %v1349_v46, %v1349_v46  ;;  %v1350_v53 = vmax.f32 %v1043_v47, 0.0  ;;  %v2408_v54 = vpack.c.bf16 %v1407_v49, %v1407_v49  ;;  %v1408_v55 = vmax.f32 %v1275_v50, 0.0 }
 0x1ba   : > { %1916 = vst.msk [vmem:[%s3093_s27 + $0xc0] sm:$0xf] %vm1867_vm2, %v2350_v52  ;;  %v2351_v56 = vpack.c.bf16 %v1350_v53, %v1350_v53  ;;  %1974 = vst.msk [vmem:[%s3093_s27 + $0x1a8] sm:$0xf] %vm1867_vm2, %v2408_v54  ;;  %v2409_v57 = vpack.c.bf16 %v1408_v55, %v1408_v55 }
 0x1bb   : > { %v1047_v58 = vpop.f32.mrb[100].mxu0  ;;  %v1279_v60 = vpop.f32.mrb[100].mxu1 }
 0x1bc   : > { %1917 = vst.msk [vmem:[%s3093_s27 + $0xc4] sm:$0xf] %vm1867_vm2, %v2351_v56  ;;  %v1048_v61 = vadd.f32 %v3348_v43, %v1047_v58  ;;  %v2586_v62 = vpop.f32.mrb[101].mxu0  ;;  %1975 = vst.msk [vmem:[%s3093_s27 + $0x1ac] sm:$0xf] %vm1867_vm2, %v2409_v57  ;;  %v1280_v63 = vadd.f32 %v3348_v43, %v1279_v60  ;;  %v2702_v1 = vpop.f32.mrb[101].mxu1 }
 0x1bd   : > { %v1050_v2 = vpop.f32.mrb[102].mxu0  ;;  %v1282_v3 = vpop.f32.mrb[102].mxu1 }
 0x1be   : > { %v1351_v4 = vmax.f32 %v1048_v61, 0.0  ;;  %v1051_v5 = vadd.f32 %v3348_v43, %v1050_v2  ;;  %v2587_v6 = vpop.f32.mrb[103].mxu0  ;;  %v1409_v7 = vmax.f32 %v1280_v63, 0.0  ;;  %v1283_v8 = vadd.f32 %v3348_v43, %v1282_v3  ;;  %v2703_v9 = vpop.f32.mrb[103].mxu1 }
 0x1c0   : > { %v2352_v10 = vpack.c.bf16 %v1351_v4, %v1351_v4  ;;  %v1352_v11 = vmax.f32 %v1051_v5, 0.0  ;;  %v2410_v12 = vpack.c.bf16 %v1409_v7, %v1409_v7  ;;  %v1410_v13 = vmax.f32 %v1283_v8, 0.0 }
 0x1c2   : > { %1918 = vst.msk [vmem:[%s3093_s27 + $0xc8] sm:$0xf] %vm1867_vm2, %v2352_v10  ;;  %v2353_v14 = vpack.c.bf16 %v1352_v11, %v1352_v11  ;;  %1976 = vst.msk [vmem:[%s3093_s27 + $0x1b0] sm:$0xf] %vm1867_vm2, %v2410_v12  ;;  %v2411_v15 = vpack.c.bf16 %v1410_v13, %v1410_v13 }
 0x1c3   : > { %v1055_v16 = vpop.f32.mrb[104].mxu0  ;;  %v1287_v17 = vpop.f32.mrb[104].mxu1 }
 0x1c4   : > { %1919 = vst.msk [vmem:[%s3093_s27 + $0xcc] sm:$0xf] %vm1867_vm2, %v2353_v14  ;;  %v1056_v18 = vadd.f32 %v3348_v43, %v1055_v16  ;;  %v2590_v19 = vpop.f32.mrb[105].mxu0  ;;  %1977 = vst.msk [vmem:[%s3093_s27 + $0x1b4] sm:$0xf] %vm1867_vm2, %v2411_v15  ;;  %v1288_v20 = vadd.f32 %v3348_v43, %v1287_v17  ;;  %v2706_v21 = vpop.f32.mrb[105].mxu1 }
 0x1c5   : > { %v1058_v22 = vpop.f32.mrb[106].mxu0  ;;  %v1290_v23 = vpop.f32.mrb[106].mxu1 }
 0x1c6   : > { %v1353_v24 = vmax.f32 %v1056_v18, 0.0  ;;  %v1059_v0 = vadd.f32 %v3348_v43, %v1058_v22  ;;  %v2591_v25 = vpop.f32.mrb[107].mxu0  ;;  %v1411_v26 = vmax.f32 %v1288_v20, 0.0  ;;  %v1291_v27 = vadd.f32 %v3348_v43, %v1290_v23  ;;  %v2707_v28 = vpop.f32.mrb[107].mxu1 }
 0x1c8   : > { %v2354_v29 = vpack.c.bf16 %v1353_v24, %v1353_v24  ;;  %v1354_v30 = vmax.f32 %v1059_v0, 0.0  ;;  %v2412_v31 = vpack.c.bf16 %v1411_v26, %v1411_v26  ;;  %v1412_v32 = vmax.f32 %v1291_v27, 0.0 }
 0x1ca   : > { %1920 = vst.msk [vmem:[%s3093_s27 + $0xd0] sm:$0xf] %vm1867_vm2, %v2354_v29  ;;  %v2355_v33 = vpack.c.bf16 %v1354_v30, %v1354_v30  ;;  %1978 = vst.msk [vmem:[%s3093_s27 + $0x1b8] sm:$0xf] %vm1867_vm2, %v2412_v31  ;;  %v2413_v34 = vpack.c.bf16 %v1412_v32, %v1412_v32 }
 0x1cb   : > { %v1063_v35 = vpop.f32.mrb[108].mxu0  ;;  %v1295_v36 = vpop.f32.mrb[108].mxu1 }
 0x1cc   : > { %1921 = vst.msk [vmem:[%s3093_s27 + $0xd4] sm:$0xf] %vm1867_vm2, %v2355_v33  ;;  %v1064_v37 = vadd.f32 %v3348_v43, %v1063_v35  ;;  %v2594_v38 = vpop.f32.mrb[109].mxu0  ;;  %1979 = vst.msk [vmem:[%s3093_s27 + $0x1bc] sm:$0xf] %vm1867_vm2, %v2413_v34  ;;  %v1296_v39 = vadd.f32 %v3348_v43, %v1295_v36  ;;  %v2710_v40 = vpop.f32.mrb[109].mxu1 }
 0x1cd   : > { %v1066_v41 = vpop.f32.mrb[110].mxu0  ;;  %v1298_v42 = vpop.f32.mrb[110].mxu1 }
 0x1ce   : > { %v1355_v59 = vmax.f32 %v1064_v37, 0.0  ;;  %v1067_v44 = vadd.f32 %v3348_v43, %v1066_v41  ;;  %v2595_v45 = vpop.f32.mrb[111].mxu0  ;;  %v1413_v46 = vmax.f32 %v1296_v39, 0.0  ;;  %v2711_v47 = vpop.f32.mrb[111].mxu1 }
 0x1d0   : > { %v2356_v48 = vpack.c.bf16 %v1355_v59, %v1355_v59  ;;  %v1356_v49 = vmax.f32 %v1067_v44, 0.0  ;;  %v2414_v50 = vpack.c.bf16 %v1413_v46, %v1413_v46 }
 0x1d2   : > { %1922 = vst.msk [vmem:[%s3093_s27 + $0xd8] sm:$0xf] %vm1867_vm2, %v2356_v48  ;;  %v2357_v51 = vpack.c.bf16 %v1356_v49, %v1356_v49 }
 0x1d3   : > { %1981 = vst.msk [vmem:[%s3093_s27 + $0x1c0] sm:$0x3] %vm1980_vm3, %v2414_v50  ;;  %v1071_v52 = vpop.f32.mrb[112].mxu0 }
 0x1d4   : > { %1923 = vst.msk [vmem:[%s3093_s27 + $0xdc] sm:$0xf] %vm1867_vm2, %v2357_v51  ;;  %v1072_v53 = vadd.f32 %v3348_v43, %v1071_v52  ;;  %v2598_v54 = vpop.f32.mrb[113].mxu0 }
 0x1d5   : > { %v1074_v55 = vpop.f32.mrb[114].mxu0 }
 0x1d6   : > { %v1357_v56 = vmax.f32 %v1072_v53, 0.0  ;;  %v1075_v57 = vadd.f32 %v3348_v43, %v1074_v55  ;;  %v2599_v58 = vpop.f32.mrb[115].mxu0 }
 0x1d8   : > { %v2358_v60 = vpack.c.bf16 %v1357_v56, %v1357_v56  ;;  %v1358_v61 = vmax.f32 %v1075_v57, 0.0 }
 0x1da   : > { %1924 = vst.msk [vmem:[%s3093_s27 + $0xe0] sm:$0xf] %vm1867_vm2, %v2358_v60  ;;  %v2359_v62 = vpack.c.bf16 %v1358_v61, %v1358_v61 }
 0x1dc   : > { %1925 = vst.msk [vmem:[%s3093_s27 + $0xe4] sm:$0xf] %vm1867_vm2, %v2359_v62 }
 0x1dd PF: > { %s13_s12 = sadd.s32 1, %s2799_s12  }
 0x1de   : > { %p10_p4 = scmp.ge.s32.totalorder %s13_s12, 4  }
 0x1e0   :  { %12 = sbr.rel (!%p10_p4) target bundleno = 1 (0x1), region = 68 }

// kernel: forward.6
= control target key start
LH: loop header
LB: loop body
LE: loop exit
PB: predicated region body
PF: predicated region fallthrough
CT: control target
= control target key end

     0   :  { %s1461_s12 = smov 0   ;;  %s1620_s0 = inlined_call_operand.vmem [shape: bf16[2,144,512], index: 0, kind: input, shape index: {}]   ;;  %s1621_s1 = inlined_call_operand.vmem [shape: bf16[2,512,64], index: 1, kind: input, shape index: {}]   ;;  %s1622_s2 = inlined_call_operand.vmem [shape: f32[2,1,64], index: 2, kind: input, shape index: {}]   ;;  %s1623_s3 = inlined_call_operand.vmem [shape: bf16[2,144,64], index: 3, kind: output, shape index: {}]  }
   0x1 LB: > { %s1080_s13 = sadd.s32 4294967295, %s1439_s12   ;;  %p1084_p0 = scmp.ge.s32.totalorder %s1439_s12, 1  ;;  %s1439_s12 = sphi %s1461_s12, %s13_s12  }
   0x2   : > { %p155_p1 = scmp.lt.s32.totalorder %s1439_s12, 3 }
   0x4   : > { %p156_p2 = pnand %p1084_p0, %p155_p1 }
   0x5   : > { %p187_p3 = scmp.lt.s32.totalorder (!%p156_p2), %s1080_s13, 1  ;;  %vm985_vm0 = vcmask (!%p156_p2), 519168  }
   0x6   : > { %159 = sbr.rel (%p156_p2) target bundleno = 340 (0x154), region = 32 }
   0xd   : > { %s1625_s13 = smov (!%p187_p3, %s1080_s13), 1 }
   0xe   : > { %s1178_s14 = sshll.u32 %s1625_s13, 8  ;;  %s1337_s18 = smul.u32 288, %s1625_s13 }
   0xf   : > { %s1475_s17 = scalar_lea.vmem %s1621_s1, %s1178_s14  ;;  %s199_s24 = scalar_lea.vmem %s1622_s2, %s1625_s13 }
  0x10   : > { %v1347_v0 = vld [vmem:[%s1475_s17 + $0x40] sm:$0xff]   ;;  %v1351_v4 = vld [vmem:[%s1475_s17 + $0x48] sm:$0xff]   ;;  %v1355_v8 = vld [vmem:[%s1475_s17 + $0x50] sm:$0xff]   ;;  %s1511_s21 = scalar_lea.vmem %s1620_s0, %s1337_s18  ;;  %s1338_s25 = smul.u32 72, %s1625_s13 }
  0x11   : > { %v1348_v1 = vld [vmem:[%s1475_s17 + $0xc0] sm:$0xff]   ;;  %1197 = vmatprep.subr.bf16.mxu0 %v1347_v0  ;;  %v1352_v5 = vld [vmem:[%s1475_s17 + $0xc8] sm:$0xff]   ;;  %v1356_v9 = vld [vmem:[%s1475_s17 + $0xd0] sm:$0xff]  }
  0x12   : > { %v1349_v2 = vld [vmem:[%s1475_s17] sm:$0xff]   ;;  %1267 = vmatprep.subr.bf16.mxu1 %v1348_v1  ;;  %v1353_v6 = vld [vmem:[%s1475_s17 + $0x8] sm:$0xff]   ;;  %v1357_v10 = vld [vmem:[%s1475_s17 + $0x10] sm:$0xff]   ;;  %s1563_s28 = scalar_lea.vmem %s1623_s3, %s1338_s25 }
  0x13   : > { %v1350_v3 = vld [vmem:[%s1475_s17 + $0x80] sm:$0xff]   ;;  %1198 = vmatpush3.bf16.msra.mxu0 %v1349_v2  ;;  %v1354_v7 = vld [vmem:[%s1475_s17 + $0x88] sm:$0xff]   ;;  %v1358_v11 = vld [vmem:[%s1475_s17 + $0x90] sm:$0xff]  }
  0x14   : > { %1268 = vmatpush3.bf16.msra.mxu1 %v1350_v3  ;;  %1199 = vmatprep.subr.bf16.mxu0 %v1351_v4  ;;  %v1359_v12 = vld [vmem:[%s1475_s17 + $0x58] sm:$0xff]   ;;  %v1363_v16 = vld [vmem:[%s1475_s17 + $0x60] sm:$0xff]   ;;  %v1367_v20 = vld [vmem:[%s1475_s17 + $0x68] sm:$0xff]  }
  0x15   : > { %1269 = vmatprep.subr.bf16.mxu1 %v1352_v5  ;;  %v1360_v13 = vld [vmem:[%s1475_s17 + $0xd8] sm:$0xff]   ;;  %v1364_v17 = vld [vmem:[%s1475_s17 + $0xe0] sm:$0xff]   ;;  %v1368_v21 = vld [vmem:[%s1475_s17 + $0xe8] sm:$0xff]  }
  0x16   : > { %v1361_v14 = vld [vmem:[%s1475_s17 + $0x18] sm:$0xff]   ;;  %v1365_v18 = vld [vmem:[%s1475_s17 + $0x20] sm:$0xff]   ;;  %v1369_v22 = vld [vmem:[%s1475_s17 + $0x28] sm:$0xff]  }
  0x17   : > { %1200 = vmatpush3.bf16.msra.mxu0 %v1353_v6  ;;  %v1362_v15 = vld [vmem:[%s1475_s17 + $0x98] sm:$0xff]   ;;  %v1366_v19 = vld [vmem:[%s1475_s17 + $0xa0] sm:$0xff]   ;;  %v1370_v23 = vld [vmem:[%s1475_s17 + $0xa8] sm:$0xff]  }
  0x18   : > { %1270 = vmatpush3.bf16.msra.mxu1 %v1354_v7  ;;  %1201 = vmatprep.subr.bf16.mxu0 %v1355_v8  ;;  %v1371_v24 = vld [vmem:[%s1475_s17 + $0x70] sm:$0xff]   ;;  %v1375_v28 = vld [vmem:[%s1475_s17 + $0x78] sm:$0xff]   ;;  %v1555_v6 = vld [vmem:[%s199_s24] ss:$0 sm:$0xff] }
  0x19   : > { %1271 = vmatprep.subr.bf16.mxu1 %v1356_v9  ;;  %v1372_v25 = vld [vmem:[%s1475_s17 + $0xf0] sm:$0xff]   ;;  %v1376_v29 = vld [vmem:[%s1475_s17 + $0xf8] sm:$0xff]  }
  0x1a   : > { %v1373_v26 = vld [vmem:[%s1475_s17 + $0x30] sm:$0xff]   ;;  %v1377_v30 = vld [vmem:[%s1475_s17 + $0x38] sm:$0xff]  }
  0x1b   : > { %1202 = vmatpush3.bf16.msra.mxu0 %v1357_v10  ;;  %v1374_v27 = vld [vmem:[%s1475_s17 + $0xb0] sm:$0xff]   ;;  %v1378_v31 = vld [vmem:[%s1475_s17 + $0xb8] sm:$0xff]  }
  0x1c   : > { %1272 = vmatpush3.bf16.msra.mxu1 %v1358_v11  ;;  %1203 = vmatprep.subr.bf16.mxu0 %v1359_v12  ;;  %v1379_v32 = vld [vmem:[%s1511_s21] ss:$16 sps:$4 sm:$0xff]   ;;  %v1381_v33 = vld [vmem:[%s1511_s21 + $0x4] ss:$16 sps:$4 sm:$0xff]   ;;  %v1382_v34 = vld [vmem:[%s1511_s21 + $0x8] ss:$16 sps:$4 sm:$0xff]  }
  0x1d   : > { %1273 = vmatprep.subr.bf16.mxu1 %v1360_v13  ;;  %v1384_v35 = vld [vmem:[%s1511_s21 + $0xc] ss:$16 sps:$4 sm:$0xff]   ;;  %717 = vmatprep.mubr.bf16.mxu0 %v1381_v33  ;;  %v1385_v36 = vld [vmem:[%s1511_s21 + $0x24] ss:$16 sps:$4 sm:$0xff]   ;;  %v1389_v38 = vld [vmem:[%s1511_s21 + $0x20] ss:$16 sps:$4 sm:$0xff]  }
  0x1e   : > { %822 = vmatprep.mubr.bf16.mxu1 %v1384_v35  ;;  %v1387_v37 = vld [vmem:[%s1511_s21 + $0x2c] ss:$16 sps:$4 sm:$0xff]   ;;  %v1390_v39 = vld [vmem:[%s1511_s21 + $0x28] ss:$16 sps:$4 sm:$0xff]   ;;  %v1391_v40 = vld [vmem:[%s1511_s21 + $0x44] ss:$16 sps:$4 sm:$0xff]  }
  0x1f   : > { %1204 = vmatpush3.bf16.msra.mxu0 %v1361_v14  ;;  %v1393_v41 = vld [vmem:[%s1511_s21 + $0x4c] ss:$16 sps:$4 sm:$0xff]   ;;  %v1395_v42 = vld [vmem:[%s1511_s21 + $0x40] ss:$16 sps:$4 sm:$0xff]   ;;  %v1396_v43 = vld [vmem:[%s1511_s21 + $0x48] ss:$16 sps:$4 sm:$0xff]  }
  0x20   : > { %1274 = vmatpush3.bf16.msra.mxu1 %v1362_v15  ;;  %1205 = vmatprep.subr.bf16.mxu0 %v1363_v16  ;;  %v1397_v44 = vld [vmem:[%s1511_s21 + $0x64] ss:$16 sps:$4 sm:$0xff]   ;;  %v1399_v45 = vld [vmem:[%s1511_s21 + $0x6c] ss:$16 sps:$4 sm:$0xff]   ;;  %v1401_v46 = vld [vmem:[%s1511_s21 + $0x60] ss:$16 sps:$4 sm:$0xff]  }
  0x21   : > { %1275 = vmatprep.subr.bf16.mxu1 %v1364_v17  ;;  %v1402_v47 = vld [vmem:[%s1511_s21 + $0x68] ss:$16 sps:$4 sm:$0xff]   ;;  %v1403_v48 = vld [vmem:[%s1511_s21 + $0x84] ss:$16 sps:$4 sm:$0xff]   ;;  %v1405_v49 = vld [vmem:[%s1511_s21 + $0x8c] ss:$16 sps:$4 sm:$0xff]  }
  0x22   : > { %v1407_v50 = vld [vmem:[%s1511_s21 + $0x80] ss:$16 sps:$4 sm:$0xff]   ;;  %v1408_v51 = vld [vmem:[%s1511_s21 + $0x88] ss:$16 sps:$4 sm:$0xff]   ;;  %v1409_v52 = vld [vmem:[%s1511_s21 + $0xa4] ss:$16 sps:$4 sm:$0xff]  }
  0x23   : > { %1206 = vmatpush3.bf16.msra.mxu0 %v1365_v18  ;;  %v1411_v53 = vld [vmem:[%s1511_s21 + $0xac] ss:$16 sps:$4 sm:$0xff]   ;;  %v1413_v54 = vld [vmem:[%s1511_s21 + $0xa0] ss:$16 sps:$4 sm:$0xff]   ;;  %v1414_v55 = vld [vmem:[%s1511_s21 + $0xa8] ss:$16 sps:$4 sm:$0xff]  }
  0x24   : > { %1276 = vmatpush3.bf16.msra.mxu1 %v1366_v19  ;;  %1207 = vmatprep.subr.bf16.mxu0 %v1367_v20  ;;  %v1415_v56 = vld [vmem:[%s1511_s21 + $0xc4] ss:$16 sps:$4 sm:$0xff]   ;;  %v1417_v57 = vld [vmem:[%s1511_s21 + $0xcc] ss:$16 sps:$4 sm:$0xff]   ;;  %v1419_v58 = vld [vmem:[%s1511_s21 + $0xc0] ss:$16 sps:$4 sm:$0xff]  }
  0x25   : > { %1277 = vmatprep.subr.bf16.mxu1 %v1368_v21  ;;  %v1420_v59 = vld [vmem:[%s1511_s21 + $0xc8] ss:$16 sps:$4 sm:$0xff]   ;;  %v1421_v60 = vld [vmem:[%s1511_s21 + $0xe4] ss:$16 sps:$4 sm:$0xff]   ;;  %v1423_v61 = vld [vmem:[%s1511_s21 + $0xec] ss:$16 sps:$4 sm:$0xff]  }
  0x26   : > { %v1425_v62 = vld [vmem:[%s1511_s21 + $0xe0] ss:$16 sps:$4 sm:$0xff]   ;;  %v1426_v63 = vld [vmem:[%s1511_s21 + $0xe8] ss:$16 sps:$4 sm:$0xff]   ;;  %v1427_v0 = vld [vmem:[%s1511_s21 + $0x104] ss:$16 sps:$4 sm:$0xff]  }
  0x27   : > { %1208 = vmatpush3.bf16.msra.mxu0 %v1369_v22  ;;  %v1429_v1 = vld [vmem:[%s1511_s21 + $0x10c] ss:$16 sps:$4 sm:$0xff]   ;;  %v1431_v2 = vld [vmem:[%s1511_s21 + $0x100] ss:$16 sps:$4 sm:$0xff]   ;;  %v1432_v3 = vld [vmem:[%s1511_s21 + $0x108] ss:$16 sps:$4 sm:$0xff]  }
  0x28   : > { %1278 = vmatpush3.bf16.msra.mxu1 %v1370_v23  ;;  %1209 = vmatprep.subr.bf16.mxu0 %v1371_v24 }
  0x29   : > { %1279 = vmatprep.subr.bf16.mxu1 %v1372_v25 }
  0x2b   : > { %1210 = vmatpush3.bf16.msra.mxu0 %v1373_v26 }
  0x2c   : > { %1280 = vmatpush3.bf16.msra.mxu1 %v1374_v27  ;;  %1211 = vmatprep.subr.bf16.mxu0 %v1375_v28 }
  0x2d   : > { %1281 = vmatprep.subr.bf16.mxu1 %v1376_v29 }
  0x2f   : > { %1212 = vmatpush3.bf16.msra.mxu0 %v1377_v30 }
  0x30   : > { %1282 = vmatpush3.bf16.msra.mxu1 %v1378_v31 }
  0x32   : > { %718 = vmatmul.mubr.bf16.vlgmr.msra.gmra.mrb[0].mxu0 %v1379_v32 }
  0x33   : > { %823 = vmatmul.mubr.bf16.vlgmr.msra.gmra.mrb[0].mxu1 %v1382_v34  ;;  %725 = vmatprep.mubr.bf16.mxu0 %v1385_v36 }
  0x34   : > { %830 = vmatprep.mubr.bf16.mxu1 %v1387_v37 }
  0x3a   : > { %726 = vmatmul.mubr.bf16.gmra.mrb[4].mxu0 %v1389_v38 }
  0x3b   : > { %831 = vmatmul.mubr.bf16.gmra.mrb[4].mxu1 %v1390_v39  ;;  %733 = vmatprep.mubr.bf16.mxu0 %v1391_v40 }
  0x3c   : > { %838 = vmatprep.mubr.bf16.mxu1 %v1393_v41 }
  0x42   : > { %734 = vmatmul.mubr.bf16.gmra.mrb[8].mxu0 %v1395_v42 }
  0x43   : > { %839 = vmatmul.mubr.bf16.gmra.mrb[8].mxu1 %v1396_v43  ;;  %741 = vmatprep.mubr.bf16.mxu0 %v1397_v44 }
  0x44   : > { %846 = vmatprep.mubr.bf16.mxu1 %v1399_v45 }
  0x4a   : > { %742 = vmatmul.mubr.bf16.gmra.mrb[12].mxu0 %v1401_v46 }
  0x4b   : > { %847 = vmatmul.mubr.bf16.gmra.mrb[12].mxu1 %v1402_v47  ;;  %749 = vmatprep.mubr.bf16.mxu0 %v1403_v48 }
  0x4c   : > { %854 = vmatprep.mubr.bf16.mxu1 %v1405_v49 }
  0x52   : > { %750 = vmatmul.mubr.bf16.gmra.mrb[16].mxu0 %v1407_v50 }
  0x53   : > { %855 = vmatmul.mubr.bf16.gmra.mrb[16].mxu1 %v1408_v51  ;;  %757 = vmatprep.mubr.bf16.mxu0 %v1409_v52 }
  0x54   : > { %862 = vmatprep.mubr.bf16.mxu1 %v1411_v53 }
  0x5a   : > { %758 = vmatmul.mubr.bf16.gmra.mrb[20].mxu0 %v1413_v54 }
  0x5b   : > { %863 = vmatmul.mubr.bf16.gmra.mrb[20].mxu1 %v1414_v55  ;;  %765 = vmatprep.mubr.bf16.mxu0 %v1415_v56 }
  0x5c   : > { %870 = vmatprep.mubr.bf16.mxu1 %v1417_v57 }
  0x62   : > { %766 = vmatmul.mubr.bf16.gmra.mrb[24].mxu0 %v1419_v58 }
  0x63   : > { %871 = vmatmul.mubr.bf16.gmra.mrb[24].mxu1 %v1420_v59  ;;  %773 = vmatprep.mubr.bf16.mxu0 %v1421_v60 }
  0x64   : > { %878 = vmatprep.mubr.bf16.mxu1 %v1423_v61 }
  0x6a   : > { %774 = vmatmul.mubr.bf16.gmra.mrb[28].mxu0 %v1425_v62 }
  0x6b   : > { %879 = vmatmul.mubr.bf16.gmra.mrb[28].mxu1 %v1426_v63  ;;  %781 = vmatprep.mubr.bf16.mxu0 %v1427_v0 }
  0x6c   : > { %886 = vmatprep.mubr.bf16.mxu1 %v1429_v1 }
  0x72   : > { %782 = vmatmul.mubr.bf16.gmra.mrb[32].mxu0 %v1431_v2 }
  0x73   : > { %887 = vmatmul.mubr.bf16.gmra.mrb[32].mxu1 %v1432_v3 }
 0x105   : > { %v1213_v4 = vpop.f32.mrb[0].mxu0 }
 0x106   : > { %v1283_v5 = vpop.f32.mrb[0].mxu1  ;;  %v1214_v7 = vpop.f32.mrb[1].mxu0 }
 0x107   : > { %v1215_v8 = vadd.f32 %v1214_v7, %v1213_v4  ;;  %v1284_v9 = vpop.f32.mrb[1].mxu1  ;;  %v1216_v10 = vpop.f32.mrb[2].mxu0 }
 0x108   : > { %v1285_v11 = vadd.f32 %v1284_v9, %v1283_v5  ;;  %v1286_v12 = vpop.f32.mrb[2].mxu1  ;;  %v1217_v13 = vpop.f32.mrb[3].mxu0 }
 0x109   : > { %v720_v14 = vadd.f32 %v1215_v8, %v1555_v6  ;;  %v1218_v15 = vadd.f32 %v1217_v13, %v1216_v10  ;;  %v1287_v16 = vpop.f32.mrb[3].mxu1 }
 0x10a   : > { %v1288_v17 = vadd.f32 %v1287_v16, %v1286_v12 }
 0x10b   : > { %v825_v18 = vadd.f32 %v1285_v11, %v720_v14  ;;  %v723_v19 = vadd.f32 %v1218_v15, %v1555_v6 }
 0x10d   : > { %v895_v20 = vmax.f32 %v825_v18, 0.0  ;;  %v828_v21 = vadd.f32 %v1288_v17, %v723_v19  ;;  %v1219_v22 = vpop.f32.mrb[4].mxu0 }
 0x10e   : > { %v1289_v23 = vpop.f32.mrb[4].mxu1  ;;  %v1220_v24 = vpop.f32.mrb[5].mxu0 }
 0x10f   : > { %v1179_v25 = vpack.c.bf16 %v895_v20, %v895_v20  ;;  %v896_v26 = vmax.f32 %v828_v21, 0.0  ;;  %v1221_v27 = vadd.f32 %v1220_v24, %v1219_v22  ;;  %v1290_v28 = vpop.f32.mrb[5].mxu1  ;;  %v1222_v29 = vpop.f32.mrb[6].mxu0 }
 0x110   : > { %v1291_v30 = vadd.f32 %v1290_v28, %v1289_v23  ;;  %v1292_v31 = vpop.f32.mrb[6].mxu1  ;;  %v1223_v32 = vpop.f32.mrb[7].mxu0 }
 0x111   : > { %986 = vst.msk [vmem:[%s1563_s28] sm:$0xf] %vm985_vm0, %v1179_v25  ;;  %v1180_v33 = vpack.c.bf16 %v896_v26, %v896_v26  ;;  %v728_v34 = vadd.f32 %v1221_v27, %v1555_v6  ;;  %v1224_v35 = vadd.f32 %v1223_v32, %v1222_v29  ;;  %v1293_v36 = vpop.f32.mrb[7].mxu1 }
 0x112   : > { %v1294_v37 = vadd.f32 %v1293_v36, %v1292_v31 }
 0x113   : > { %987 = vst.msk [vmem:[%s1563_s28 + $0x4] sm:$0xf] %vm985_vm0, %v1180_v33  ;;  %v833_v38 = vadd.f32 %v1291_v30, %v728_v34  ;;  %v731_v39 = vadd.f32 %v1224_v35, %v1555_v6 }
 0x115   : > { %v897_v40 = vmax.f32 %v833_v38, 0.0  ;;  %v836_v41 = vadd.f32 %v1294_v37, %v731_v39  ;;  %v1225_v42 = vpop.f32.mrb[8].mxu0 }
 0x116   : > { %v1295_v43 = vpop.f32.mrb[8].mxu1  ;;  %v1226_v44 = vpop.f32.mrb[9].mxu0 }
 0x117   : > { %v1181_v45 = vpack.c.bf16 %v897_v40, %v897_v40  ;;  %v898_v46 = vmax.f32 %v836_v41, 0.0  ;;  %v1227_v47 = vadd.f32 %v1226_v44, %v1225_v42  ;;  %v1296_v48 = vpop.f32.mrb[9].mxu1  ;;  %v1228_v49 = vpop.f32.mrb[10].mxu0 }
 0x118   : > { %v1297_v50 = vadd.f32 %v1296_v48, %v1295_v43  ;;  %v1298_v51 = vpop.f32.mrb[10].mxu1  ;;  %v1229_v52 = vpop.f32.mrb[11].mxu0 }
 0x119   : > { %988 = vst.msk [vmem:[%s1563_s28 + $0x8] sm:$0xf] %vm985_vm0, %v1181_v45  ;;  %v1182_v53 = vpack.c.bf16 %v898_v46, %v898_v46  ;;  %v736_v54 = vadd.f32 %v1227_v47, %v1555_v6  ;;  %v1230_v55 = vadd.f32 %v1229_v52, %v1228_v49  ;;  %v1299_v56 = vpop.f32.mrb[11].mxu1 }
 0x11a   : > { %v1300_v57 = vadd.f32 %v1299_v56, %v1298_v51 }
 0x11b   : > { %989 = vst.msk [vmem:[%s1563_s28 + $0xc] sm:$0xf] %vm985_vm0, %v1182_v53  ;;  %v841_v58 = vadd.f32 %v1297_v50, %v736_v54  ;;  %v739_v59 = vadd.f32 %v1230_v55, %v1555_v6 }
 0x11d   : > { %v899_v60 = vmax.f32 %v841_v58, 0.0  ;;  %v844_v61 = vadd.f32 %v1300_v57, %v739_v59  ;;  %v1231_v62 = vpop.f32.mrb[12].mxu0 }
 0x11e   : > { %v1301_v63 = vpop.f32.mrb[12].mxu1  ;;  %v1232_v0 = vpop.f32.mrb[13].mxu0 }
 0x11f   : > { %v1183_v1 = vpack.c.bf16 %v899_v60, %v899_v60  ;;  %v900_v2 = vmax.f32 %v844_v61, 0.0  ;;  %v1233_v3 = vadd.f32 %v1232_v0, %v1231_v62  ;;  %v1302_v4 = vpop.f32.mrb[13].mxu1  ;;  %v1234_v5 = vpop.f32.mrb[14].mxu0 }
 0x120   : > { %v1303_v7 = vadd.f32 %v1302_v4, %v1301_v63  ;;  %v1304_v8 = vpop.f32.mrb[14].mxu1  ;;  %v1235_v9 = vpop.f32.mrb[15].mxu0 }
 0x121   : > { %990 = vst.msk [vmem:[%s1563_s28 + $0x10] sm:$0xf] %vm985_vm0, %v1183_v1  ;;  %v1184_v10 = vpack.c.bf16 %v900_v2, %v900_v2  ;;  %v744_v11 = vadd.f32 %v1233_v3, %v1555_v6  ;;  %v1236_v12 = vadd.f32 %v1235_v9, %v1234_v5  ;;  %v1305_v13 = vpop.f32.mrb[15].mxu1 }
 0x122   : > { %v1306_v14 = vadd.f32 %v1305_v13, %v1304_v8 }
 0x123   : > { %991 = vst.msk [vmem:[%s1563_s28 + $0x14] sm:$0xf] %vm985_vm0, %v1184_v10  ;;  %v849_v15 = vadd.f32 %v1303_v7, %v744_v11  ;;  %v747_v16 = vadd.f32 %v1236_v12, %v1555_v6 }
 0x125   : > { %v901_v17 = vmax.f32 %v849_v15, 0.0  ;;  %v852_v18 = vadd.f32 %v1306_v14, %v747_v16  ;;  %v1237_v19 = vpop.f32.mrb[16].mxu0 }
 0x126   : > { %v1307_v20 = vpop.f32.mrb[16].mxu1  ;;  %v1238_v21 = vpop.f32.mrb[17].mxu0 }
 0x127   : > { %v1185_v22 = vpack.c.bf16 %v901_v17, %v901_v17  ;;  %v902_v23 = vmax.f32 %v852_v18, 0.0  ;;  %v1239_v24 = vadd.f32 %v1238_v21, %v1237_v19  ;;  %v1308_v25 = vpop.f32.mrb[17].mxu1  ;;  %v1240_v26 = vpop.f32.mrb[18].mxu0 }
 0x128   : > { %v1309_v27 = vadd.f32 %v1308_v25, %v1307_v20  ;;  %v1310_v28 = vpop.f32.mrb[18].mxu1  ;;  %v1241_v29 = vpop.f32.mrb[19].mxu0 }
 0x129   : > { %992 = vst.msk [vmem:[%s1563_s28 + $0x18] sm:$0xf] %vm985_vm0, %v1185_v22  ;;  %v1186_v30 = vpack.c.bf16 %v902_v23, %v902_v23  ;;  %v752_v31 = vadd.f32 %v1239_v24, %v1555_v6  ;;  %v1242_v32 = vadd.f32 %v1241_v29, %v1240_v26  ;;  %v1311_v33 = vpop.f32.mrb[19].mxu1 }
 0x12a   : > { %v1312_v34 = vadd.f32 %v1311_v33, %v1310_v28 }
 0x12b   : > { %993 = vst.msk [vmem:[%s1563_s28 + $0x1c] sm:$0xf] %vm985_vm0, %v1186_v30  ;;  %v857_v35 = vadd.f32 %v1309_v27, %v752_v31  ;;  %v755_v36 = vadd.f32 %v1242_v32, %v1555_v6 }
 0x12d   : > { %v903_v37 = vmax.f32 %v857_v35, 0.0  ;;  %v860_v38 = vadd.f32 %v1312_v34, %v755_v36  ;;  %v1243_v39 = vpop.f32.mrb[20].mxu0 }
 0x12e   : > { %v1313_v40 = vpop.f32.mrb[20].mxu1  ;;  %v1244_v41 = vpop.f32.mrb[21].mxu0 }
 0x12f   : > { %v1187_v42 = vpack.c.bf16 %v903_v37, %v903_v37  ;;  %v904_v43 = vmax.f32 %v860_v38, 0.0  ;;  %v1245_v44 = vadd.f32 %v1244_v41, %v1243_v39  ;;  %v1314_v45 = vpop.f32.mrb[21].mxu1  ;;  %v1246_v46 = vpop.f32.mrb[22].mxu0 }
 0x130   : > { %v1315_v47 = vadd.f32 %v1314_v45, %v1313_v40  ;;  %v1316_v48 = vpop.f32.mrb[22].mxu1  ;;  %v1247_v49 = vpop.f32.mrb[23].mxu0 }
 0x131   : > { %994 = vst.msk [vmem:[%s1563_s28 + $0x20] sm:$0xf] %vm985_vm0, %v1187_v42  ;;  %v1188_v50 = vpack.c.bf16 %v904_v43, %v904_v43  ;;  %v760_v51 = vadd.f32 %v1245_v44, %v1555_v6  ;;  %v1248_v52 = vadd.f32 %v1247_v49, %v1246_v46  ;;  %v1317_v53 = vpop.f32.mrb[23].mxu1 }
 0x132   : > { %v1318_v54 = vadd.f32 %v1317_v53, %v1316_v48 }
 0x133   : > { %995 = vst.msk [vmem:[%s1563_s28 + $0x24] sm:$0xf] %vm985_vm0, %v1188_v50  ;;  %v865_v55 = vadd.f32 %v1315_v47, %v760_v51  ;;  %v763_v56 = vadd.f32 %v1248_v52, %v1555_v6 }
 0x135   : > { %v905_v57 = vmax.f32 %v865_v55, 0.0  ;;  %v868_v58 = vadd.f32 %v1318_v54, %v763_v56  ;;  %v1249_v59 = vpop.f32.mrb[24].mxu0 }
 0x136   : > { %v1319_v60 = vpop.f32.mrb[24].mxu1  ;;  %v1250_v61 = vpop.f32.mrb[25].mxu0 }
 0x137   : > { %v1189_v62 = vpack.c.bf16 %v905_v57, %v905_v57  ;;  %v906_v63 = vmax.f32 %v868_v58, 0.0  ;;  %v1251_v0 = vadd.f32 %v1250_v61, %v1249_v59  ;;  %v1320_v1 = vpop.f32.mrb[25].mxu1  ;;  %v1252_v2 = vpop.f32.mrb[26].mxu0 }
 0x138   : > { %v1321_v3 = vadd.f32 %v1320_v1, %v1319_v60  ;;  %v1322_v4 = vpop.f32.mrb[26].mxu1  ;;  %v1253_v5 = vpop.f32.mrb[27].mxu0 }
 0x139   : > { %996 = vst.msk [vmem:[%s1563_s28 + $0x28] sm:$0xf] %vm985_vm0, %v1189_v62  ;;  %v1190_v7 = vpack.c.bf16 %v906_v63, %v906_v63  ;;  %v768_v8 = vadd.f32 %v1251_v0, %v1555_v6  ;;  %v1254_v9 = vadd.f32 %v1253_v5, %v1252_v2  ;;  %v1323_v10 = vpop.f32.mrb[27].mxu1 }
 0x13a   : > { %v1324_v11 = vadd.f32 %v1323_v10, %v1322_v4 }
 0x13b   : > { %997 = vst.msk [vmem:[%s1563_s28 + $0x2c] sm:$0xf] %vm985_vm0, %v1190_v7  ;;  %v873_v12 = vadd.f32 %v1321_v3, %v768_v8  ;;  %v771_v13 = vadd.f32 %v1254_v9, %v1555_v6 }
 0x13d   : > { %v907_v14 = vmax.f32 %v873_v12, 0.0  ;;  %v876_v15 = vadd.f32 %v1324_v11, %v771_v13  ;;  %v1255_v16 = vpop.f32.mrb[28].mxu0 }
 0x13e   : > { %v1325_v17 = vpop.f32.mrb[28].mxu1  ;;  %v1256_v18 = vpop.f32.mrb[29].mxu0 }
 0x13f   : > { %v1191_v19 = vpack.c.bf16 %v907_v14, %v907_v14  ;;  %v908_v20 = vmax.f32 %v876_v15, 0.0  ;;  %v1257_v21 = vadd.f32 %v1256_v18, %v1255_v16  ;;  %v1326_v22 = vpop.f32.mrb[29].mxu1  ;;  %v1258_v23 = vpop.f32.mrb[30].mxu0 }
 0x140   : > { %v1327_v24 = vadd.f32 %v1326_v22, %v1325_v17  ;;  %v1328_v25 = vpop.f32.mrb[30].mxu1  ;;  %v1259_v26 = vpop.f32.mrb[31].mxu0 }
 0x141   : > { %998 = vst.msk [vmem:[%s1563_s28 + $0x30] sm:$0xf] %vm985_vm0, %v1191_v19  ;;  %v1192_v27 = vpack.c.bf16 %v908_v20, %v908_v20  ;;  %v776_v28 = vadd.f32 %v1257_v21, %v1555_v6  ;;  %v1260_v29 = vadd.f32 %v1259_v26, %v1258_v23  ;;  %v1329_v30 = vpop.f32.mrb[31].mxu1 }
 0x142   : > { %v1330_v31 = vadd.f32 %v1329_v30, %v1328_v25 }
 0x143   : > { %999 = vst.msk [vmem:[%s1563_s28 + $0x34] sm:$0xf] %vm985_vm0, %v1192_v27  ;;  %v881_v32 = vadd.f32 %v1327_v24, %v776_v28  ;;  %v779_v33 = vadd.f32 %v1260_v29, %v1555_v6 }
 0x145   : > { %v909_v34 = vmax.f32 %v881_v32, 0.0  ;;  %v884_v35 = vadd.f32 %v1330_v31, %v779_v33  ;;  %v1261_v36 = vpop.f32.mrb[32].mxu0 }
 0x146   : > { %v1331_v37 = vpop.f32.mrb[32].mxu1  ;;  %v1262_v38 = vpop.f32.mrb[33].mxu0 }
 0x147   : > { %v1193_v39 = vpack.c.bf16 %v909_v34, %v909_v34  ;;  %v910_v40 = vmax.f32 %v884_v35, 0.0  ;;  %v1263_v41 = vadd.f32 %v1262_v38, %v1261_v36  ;;  %v1332_v42 = vpop.f32.mrb[33].mxu1  ;;  %v1264_v43 = vpop.f32.mrb[34].mxu0 }
 0x148   : > { %v1333_v44 = vadd.f32 %v1332_v42, %v1331_v37  ;;  %v1334_v45 = vpop.f32.mrb[34].mxu1  ;;  %v1265_v46 = vpop.f32.mrb[35].mxu0 }
 0x149   : > { %1000 = vst.msk [vmem:[%s1563_s28 + $0x38] sm:$0xf] %vm985_vm0, %v1193_v39  ;;  %v1194_v47 = vpack.c.bf16 %v910_v40, %v910_v40  ;;  %v784_v48 = vadd.f32 %v1263_v41, %v1555_v6  ;;  %v1266_v49 = vadd.f32 %v1265_v46, %v1264_v43  ;;  %v1335_v50 = vpop.f32.mrb[35].mxu1 }
 0x14a   : > { %v1336_v51 = vadd.f32 %v1335_v50, %v1334_v45 }
 0x14b   : > { %1001 = vst.msk [vmem:[%s1563_s28 + $0x3c] sm:$0xf] %vm985_vm0, %v1194_v47  ;;  %v889_v52 = vadd.f32 %v1333_v44, %v784_v48  ;;  %v787_v53 = vadd.f32 %v1266_v49, %v1555_v6 }
 0x14d   : > { %v911_v54 = vmax.f32 %v889_v52, 0.0  ;;  %v892_v55 = vadd.f32 %v1336_v51, %v787_v53 }
 0x14f   : > { %v1195_v56 = vpack.c.bf16 %v911_v54, %v911_v54  ;;  %v912_v57 = vmax.f32 %v892_v55, 0.0 }
 0x151   : > { %1002 = vst.msk [vmem:[%s1563_s28 + $0x40] sm:$0xf] %vm985_vm0, %v1195_v56  ;;  %v1196_v58 = vpack.c.bf16 %v912_v57, %v912_v57 }
 0x153   : > { %1003 = vst.msk [vmem:[%s1563_s28 + $0x44] sm:$0xf] %vm985_vm0, %v1196_v58 }
 0x154 PF: > { %s13_s12 = sadd.s32 1, %s1439_s12  }
 0x155   : > { %p10_p4 = scmp.ge.s32.totalorder %s13_s12, 4  }
 0x157   :  { %12 = sbr.rel (!%p10_p4) target bundleno = 1 (0x1), region = 68 }

// kernel: forward.7
= control target key start
LH: loop header
LB: loop body
LE: loop exit
PB: predicated region body
PF: predicated region fallthrough
CT: control target
= control target key end

     0   :  { %s1261_s12 = smov 0   ;;  %s1361_s0 = inlined_call_operand.vmem [shape: bf16[2,64,576], index: 0, kind: input, shape index: {}]   ;;  %s1362_s1 = inlined_call_operand.vmem [shape: bf16[2,576,64], index: 1, kind: input, shape index: {}]   ;;  %s1363_s2 = inlined_call_operand.vmem [shape: f32[2,1,64], index: 2, kind: input, shape index: {}]   ;;  %s1364_s3 = inlined_call_operand.vmem [shape: bf16[2,64,64], index: 3, kind: output, shape index: {}]  }
   0x1 LB: > { %s958_s13 = sadd.s32 4294967295, %s1239_s12   ;;  %p962_p0 = scmp.ge.s32.totalorder %s1239_s12, 1  ;;  %s1239_s12 = sphi %s1261_s12, %s13_s12  }
   0x2   : > { %p155_p1 = scmp.lt.s32.totalorder %s1239_s12, 3 }
   0x4   : > { %p156_p2 = pnand %p962_p0, %p155_p1 }
   0x5   : > { %p187_p3 = scmp.lt.s32.totalorder (!%p156_p2), %s958_s13, 1  ;;  %vm625_vm0 = vcmask (!%p156_p2), 523264   ;;  %vm873_vm1 = vcmask (!%p156_p2), 519168  }
   0x6   : > { %159 = sbr.rel (%p156_p2) target bundleno = 306 (0x132), region = 32 }
   0xd   : > { %s1366_s13 = smov (!%p187_p3, %s958_s13), 1 }
   0xe   : > { %s1160_s14 = smul.u32 288, %s1366_s13  ;;  %s199_s24 = scalar_lea.vmem %s1363_s2, %s1366_s13 }
   0xf   : > { %s1159_s18 = smul.u32 160, %s1366_s13  ;;  %v967_v58 = vld [vmem:[%s199_s24] ss:$0 sm:$0xff]  ;;  %s1038_s25 = sshll.u32 %s1366_s13, 5 }
  0x10   : > { %s1275_s17 = scalar_lea.vmem %s1362_s1, %s1160_s14  ;;  %s204_s28 = scalar_lea.vmem %s1364_s3, %s1038_s25 }
  0x11   : > { %v1169_v0 = vld [vmem:[%s1275_s17 + $0x40] sm:$0xff]   ;;  %v1173_v4 = vld [vmem:[%s1275_s17 + $0x48] sm:$0xff]   ;;  %v1177_v8 = vld [vmem:[%s1275_s17 + $0x50] sm:$0xff]   ;;  %s1311_s21 = scalar_lea.vmem %s1361_s0, %s1159_s18 }
  0x12   : > { %v1170_v1 = vld [vmem:[%s1275_s17 + $0xc0] sm:$0xff]   ;;  %1047 = vmatprep.subr.bf16.mxu0 %v1169_v0  ;;  %v1174_v5 = vld [vmem:[%s1275_s17 + $0xc8] sm:$0xff]   ;;  %v1178_v9 = vld [vmem:[%s1275_s17 + $0xd0] sm:$0xff]  }
  0x13   : > { %v1171_v2 = vld [vmem:[%s1275_s17] sm:$0xff]   ;;  %1087 = vmatprep.subr.bf16.mxu1 %v1170_v1  ;;  %v1175_v6 = vld [vmem:[%s1275_s17 + $0x8] sm:$0xff]   ;;  %v1179_v10 = vld [vmem:[%s1275_s17 + $0x10] sm:$0xff]  }
  0x14   : > { %v1172_v3 = vld [vmem:[%s1275_s17 + $0x80] sm:$0xff]   ;;  %1048 = vmatpush3.bf16.msra.mxu0 %v1171_v2  ;;  %v1176_v7 = vld [vmem:[%s1275_s17 + $0x88] sm:$0xff]   ;;  %v1180_v11 = vld [vmem:[%s1275_s17 + $0x90] sm:$0xff]  }
  0x15   : > { %1088 = vmatpush3.bf16.msra.mxu1 %v1172_v3  ;;  %1049 = vmatprep.subr.bf16.mxu0 %v1173_v4  ;;  %v1181_v12 = vld [vmem:[%s1275_s17 + $0x58] sm:$0xff]   ;;  %v1185_v16 = vld [vmem:[%s1275_s17 + $0x60] sm:$0xff]   ;;  %v1189_v20 = vld [vmem:[%s1275_s17 + $0x68] sm:$0xff]  }
  0x16   : > { %1089 = vmatprep.subr.bf16.mxu1 %v1174_v5  ;;  %v1182_v13 = vld [vmem:[%s1275_s17 + $0xd8] sm:$0xff]   ;;  %v1186_v17 = vld [vmem:[%s1275_s17 + $0xe0] sm:$0xff]   ;;  %v1190_v21 = vld [vmem:[%s1275_s17 + $0xe8] sm:$0xff]  }
  0x17   : > { %v1183_v14 = vld [vmem:[%s1275_s17 + $0x18] sm:$0xff]   ;;  %v1187_v18 = vld [vmem:[%s1275_s17 + $0x20] sm:$0xff]   ;;  %v1191_v22 = vld [vmem:[%s1275_s17 + $0x28] sm:$0xff]  }
  0x18   : > { %1050 = vmatpush3.bf16.msra.mxu0 %v1175_v6  ;;  %v1184_v15 = vld [vmem:[%s1275_s17 + $0x98] sm:$0xff]   ;;  %v1188_v19 = vld [vmem:[%s1275_s17 + $0xa0] sm:$0xff]   ;;  %v1192_v23 = vld [vmem:[%s1275_s17 + $0xa8] sm:$0xff]  }
  0x19   : > { %1090 = vmatpush3.bf16.msra.mxu1 %v1176_v7  ;;  %1051 = vmatprep.subr.bf16.mxu0 %v1177_v8  ;;  %v1193_v24 = vld [vmem:[%s1275_s17 + $0x70] sm:$0xff]   ;;  %v1197_v28 = vld [vmem:[%s1275_s17 + $0x78] sm:$0xff]   ;;  %v1206_v35 = vld [vmem:[%s1311_s21 + $0xc] ss:$20 sps:$4 sm:$0xff]  }
  0x1a   : > { %1091 = vmatprep.subr.bf16.mxu1 %v1178_v9  ;;  %v1194_v25 = vld [vmem:[%s1275_s17 + $0xf0] sm:$0xff]   ;;  %v1198_v29 = vld [vmem:[%s1275_s17 + $0xf8] sm:$0xff]   ;;  %v1207_v36 = vld [vmem:[%s1275_s17 + $0x100] sm:$0xff]   ;;  %735 = vmatprep.mubr.bf16.mxu1 %v1206_v35 }
  0x1b   : > { %v1195_v26 = vld [vmem:[%s1275_s17 + $0x30] sm:$0xff]   ;;  %v1199_v30 = vld [vmem:[%s1275_s17 + $0x38] sm:$0xff]   ;;  %v1208_v37 = vld [vmem:[%s1311_s21 + $0x2c] ss:$20 sps:$4 sm:$0xff]  }
  0x1c   : > { %1052 = vmatpush3.bf16.msra.mxu0 %v1179_v10  ;;  %v1196_v27 = vld [vmem:[%s1275_s17 + $0xb0] sm:$0xff]   ;;  %v1200_v31 = vld [vmem:[%s1275_s17 + $0xb8] sm:$0xff]   ;;  %v1214_v39 = vld [vmem:[%s1275_s17 + $0x108] sm:$0xff]  }
  0x1d   : > { %1092 = vmatpush3.bf16.msra.mxu1 %v1180_v11  ;;  %1053 = vmatprep.subr.bf16.mxu0 %v1181_v12  ;;  %v1201_v32 = vld [vmem:[%s1311_s21] ss:$20 sps:$4 sm:$0xff]   ;;  %v1203_v33 = vld [vmem:[%s1311_s21 + $0x4] ss:$20 sps:$4 sm:$0xff]   ;;  %v1204_v34 = vld [vmem:[%s1311_s21 + $0x8] ss:$20 sps:$4 sm:$0xff]  }
  0x1e   : > { %1093 = vmatprep.subr.bf16.mxu1 %v1182_v13  ;;  %670 = vmatprep.mubr.bf16.mxu0 %v1203_v33  ;;  %v1210_v38 = vld [vmem:[%s1311_s21 + $0x34] ss:$20 sps:$4 sm:$0xff]   ;;  %v1213_v41 = vld [vmem:[%s1311_s21 + $0x30] ss:$20 sps:$4 sm:$0xff]   ;;  %v1228_v45 = vld [vmem:[%s1275_s17 + $0x118] sm:$0xff]  }
  0x1f   : > { %v1212_v40 = vld [vmem:[%s1311_s21 + $0x28] ss:$20 sps:$4 sm:$0xff]   ;;  %v1221_v44 = vld [vmem:[%s1275_s17 + $0x110] sm:$0xff]   ;;  %v1220_v47 = vld [vmem:[%s1311_s21 + $0x58] ss:$20 sps:$4 sm:$0xff]  }
  0x20   : > { %1054 = vmatpush3.bf16.msra.mxu0 %v1183_v14  ;;  %v1215_v42 = vld [vmem:[%s1311_s21 + $0x54] ss:$20 sps:$4 sm:$0xff]   ;;  %v1217_v43 = vld [vmem:[%s1311_s21 + $0x5c] ss:$20 sps:$4 sm:$0xff]   ;;  %v1224_v49 = vld [vmem:[%s1311_s21 + $0x84] ss:$20 sps:$4 sm:$0xff]  }
  0x21   : > { %1094 = vmatpush3.bf16.msra.mxu1 %v1184_v15  ;;  %1055 = vmatprep.subr.bf16.mxu0 %v1185_v16  ;;  %v1219_v46 = vld [vmem:[%s1311_s21 + $0x50] ss:$20 sps:$4 sm:$0xff]   ;;  %v1226_v50 = vld [vmem:[%s1311_s21 + $0x78] ss:$20 sps:$4 sm:$0xff]   ;;  %v1227_v51 = vld [vmem:[%s1311_s21 + $0x80] ss:$20 sps:$4 sm:$0xff]  }
  0x22   : > { %1095 = vmatprep.subr.bf16.mxu1 %v1186_v17  ;;  %v1222_v48 = vld [vmem:[%s1311_s21 + $0x7c] ss:$20 sps:$4 sm:$0xff]   ;;  %v1230_v53 = vld [vmem:[%s1311_s21 + $0x60] ss:$20 sps:$4 sm:$0xff]   ;;  %v1231_v54 = vld [vmem:[%s1311_s21 + $0x38] ss:$20 sps:$4 sm:$0xff]  }
  0x23   : > { %v1229_v52 = vld [vmem:[%s1311_s21 + $0x10] ss:$20 sps:$4 sm:$0xff]   ;;  %v1232_v55 = vld [vmem:[%s1311_s21 + $0x88] ss:$20 sps:$4 sm:$0xff]  }
  0x24   : > { %1056 = vmatpush3.bf16.msra.mxu0 %v1187_v18 }
  0x25   : > { %1096 = vmatpush3.bf16.msra.mxu1 %v1188_v19  ;;  %1057 = vmatprep.subr.bf16.mxu0 %v1189_v20 }
  0x26   : > { %1097 = vmatprep.subr.bf16.mxu1 %v1190_v21 }
  0x28   : > { %1058 = vmatpush3.bf16.msra.mxu0 %v1191_v22 }
  0x29   : > { %1098 = vmatpush3.bf16.msra.mxu1 %v1192_v23  ;;  %1059 = vmatprep.subr.bf16.mxu0 %v1193_v24 }
  0x2a   : > { %1099 = vmatprep.subr.bf16.mxu1 %v1194_v25 }
  0x2c   : > { %1060 = vmatpush3.bf16.msra.mxu0 %v1195_v26 }
  0x2d   : > { %1100 = vmatpush3.bf16.msra.mxu1 %v1196_v27  ;;  %1061 = vmatprep.subr.bf16.mxu0 %v1197_v28 }
  0x2e   : > { %1101 = vmatprep.subr.bf16.mxu1 %v1198_v29 }
  0x30   : > { %1062 = vmatpush3.bf16.msra.mxu0 %v1199_v30 }
  0x31   : > { %1102 = vmatpush3.bf16.msra.mxu1 %v1200_v31  ;;  %1135 = vmatprep.subr.bf16.mxu0 %v1207_v36 }
  0x32   : > { %1151 = vmatprep.subr.bf16.mxu1 %v1207_v36 }
  0x33   : > { %671 = vmatmul.mubr.bf16.vlgmr.msra.gmra.mrb[0].mxu0 %v1201_v32 }
  0x34   : > { %736 = vmatmul.mubr.bf16.vlgmr.msra.gmra.mrb[0].mxu1 %v1204_v34  ;;  %1136 = vmatpush3.bf16.msra.mxu0 %v1207_v36 }
  0x35   : > { %1155 = vmatpush3.bf16.msra.mxu1 %v1207_v36  ;;  %678 = vmatprep.mubr.bf16.mxu0 %v1208_v37 }
  0x36   : > { %743 = vmatprep.mubr.bf16.mxu1 %v1210_v38  ;;  %1137 = vmatprep.subr.bf16.mxu0 %v1214_v39 }
  0x37   : > { %1152 = vmatprep.subr.bf16.mxu1 %v1214_v39 }
  0x38   : > { %1138 = vmatpush3.bf16.msra.mxu0 %v1214_v39 }
  0x39   : > { %1156 = vmatpush3.bf16.msra.mxu1 %v1214_v39  ;;  %1139 = vmatprep.subr.bf16.mxu0 %v1221_v44 }
  0x3a   : > { %1153 = vmatprep.subr.bf16.mxu1 %v1221_v44 }
  0x3b   : > { %679 = vmatmul.mubr.bf16.gmra.mrb[4].mxu0 %v1212_v40 }
  0x3c   : > { %744 = vmatmul.mubr.bf16.gmra.mrb[4].mxu1 %v1213_v41  ;;  %686 = vmatprep.mubr.bf16.mxu0 %v1215_v42 }
  0x3d   : > { %751 = vmatprep.mubr.bf16.mxu1 %v1217_v43  ;;  %1140 = vmatpush3.bf16.msra.mxu0 %v1221_v44 }
  0x3e   : > { %1157 = vmatpush3.bf16.msra.mxu1 %v1221_v44  ;;  %1141 = vmatprep.subr.bf16.mxu0 %v1228_v45 }
  0x3f   : > { %1154 = vmatprep.subr.bf16.mxu1 %v1228_v45 }
  0x41   : > { %1142 = vmatpush3.bf16.msra.mxu0 %v1228_v45 }
  0x42   : > { %1158 = vmatpush3.bf16.msra.mxu1 %v1228_v45 }
  0x43   : > { %687 = vmatmul.mubr.bf16.gmra.mrb[8].mxu0 %v1219_v46 }
  0x44   : > { %752 = vmatmul.mubr.bf16.gmra.mrb[8].mxu1 %v1220_v47  ;;  %694 = vmatprep.mubr.bf16.mxu0 %v1222_v48 }
  0x45   : > { %759 = vmatprep.mubr.bf16.mxu1 %v1224_v49 }
  0x4b   : > { %695 = vmatmul.mubr.bf16.gmra.mrb[12].mxu0 %v1226_v50 }
  0x4c   : > { %760 = vmatmul.mubr.bf16.gmra.mrb[12].mxu1 %v1227_v51  ;;  %1143 = vmatprep.mubr.msk.bf16.mxu0 %vm625_vm0, %v1229_v52 }
  0x4d   : > { %1147 = vmatprep.mubr.msk.bf16.mxu1 %vm625_vm0, %v1230_v53 }
  0x53   : > { %1144 = vmatmul.mubr.msk.bf16.vlgmr.msra.gmra.mrb[16].mxu0 %vm625_vm0, %v1231_v54 }
  0x54   : > { %1148 = vmatmul.mubr.msk.bf16.vlgmr.msra.gmra.mrb[16].mxu1 %vm625_vm0, %v1232_v55 }
 0x106   : > { %v1063_v56 = vpop.f32.mrb[0].mxu0 }
 0x107   : > { %v1103_v57 = vpop.f32.mrb[0].mxu1  ;;  %v1064_v59 = vpop.f32.mrb[1].mxu0 }
 0x108   : > { %v1065_v60 = vadd.f32 %v1064_v59, %v1063_v56  ;;  %v1104_v61 = vpop.f32.mrb[1].mxu1  ;;  %v1066_v62 = vpop.f32.mrb[2].mxu0 }
 0x109   : > { %v1105_v63 = vadd.f32 %v1104_v61, %v1103_v57  ;;  %v1106_v0 = vpop.f32.mrb[2].mxu1  ;;  %v1067_v1 = vpop.f32.mrb[3].mxu0 }
 0x10a   : > { %v673_v2 = vadd.f32 %v1065_v60, %v967_v58  ;;  %v1068_v3 = vadd.f32 %v1067_v1, %v1066_v62  ;;  %v1107_v4 = vpop.f32.mrb[3].mxu1 }
 0x10b   : > { %v1108_v5 = vadd.f32 %v1107_v4, %v1106_v0 }
 0x10c   : > { %v676_v6 = vadd.f32 %v1068_v3, %v967_v58  ;;  %v738_v7 = vadd.f32 %v1105_v63, %v673_v2 }
 0x10e   : > { %v1069_v8 = vpop.f32.mrb[4].mxu0  ;;  %v1343_v9 = vadd.f32 %v1108_v5, %v676_v6 }
 0x10f   : > { %v1109_v10 = vpop.f32.mrb[4].mxu1  ;;  %v1070_v11 = vpop.f32.mrb[5].mxu0 }
 0x110   : > { %v1071_v12 = vadd.f32 %v1070_v11, %v1069_v8  ;;  %v1110_v13 = vpop.f32.mrb[5].mxu1  ;;  %v1072_v14 = vpop.f32.mrb[6].mxu0 }
 0x111   : > { %v1111_v15 = vadd.f32 %v1110_v13, %v1109_v10  ;;  %v1112_v16 = vpop.f32.mrb[6].mxu1  ;;  %v1073_v17 = vpop.f32.mrb[7].mxu0 }
 0x112   : > { %v681_v18 = vadd.f32 %v1071_v12, %v967_v58  ;;  %v1074_v19 = vadd.f32 %v1073_v17, %v1072_v14  ;;  %v1113_v20 = vpop.f32.mrb[7].mxu1 }
 0x113   : > { %v1114_v21 = vadd.f32 %v1113_v20, %v1112_v16 }
 0x114   : > { %v684_v22 = vadd.f32 %v1074_v19, %v967_v58  ;;  %v746_v23 = vadd.f32 %v1111_v15, %v681_v18 }
 0x116   : > { %v1075_v24 = vpop.f32.mrb[8].mxu0  ;;  %v749_v25 = vadd.f32 %v1114_v21, %v684_v22 }
 0x117   : > { %v1115_v26 = vpop.f32.mrb[8].mxu1  ;;  %v1076_v27 = vpop.f32.mrb[9].mxu0 }
 0x118   : > { %v1077_v28 = vadd.f32 %v1076_v27, %v1075_v24  ;;  %v1116_v29 = vpop.f32.mrb[9].mxu1  ;;  %v1078_v30 = vpop.f32.mrb[10].mxu0 }
 0x119   : > { %v1117_v31 = vadd.f32 %v1116_v29, %v1115_v26  ;;  %v1118_v32 = vpop.f32.mrb[10].mxu1  ;;  %v1079_v33 = vpop.f32.mrb[11].mxu0 }
 0x11a   : > { %v689_v34 = vadd.f32 %v1077_v28, %v967_v58  ;;  %v1080_v35 = vadd.f32 %v1079_v33, %v1078_v30  ;;  %v1119_v36 = vpop.f32.mrb[11].mxu1 }
 0x11b   : > { %v1120_v37 = vadd.f32 %v1119_v36, %v1118_v32 }
 0x11c   : > { %v692_v38 = vadd.f32 %v1080_v35, %v967_v58  ;;  %v754_v39 = vadd.f32 %v1117_v31, %v689_v34 }
 0x11e   : > { %v1081_v40 = vpop.f32.mrb[12].mxu0  ;;  %v757_v41 = vadd.f32 %v1120_v37, %v692_v38 }
 0x11f   : > { %v1121_v42 = vpop.f32.mrb[12].mxu1  ;;  %v1082_v43 = vpop.f32.mrb[13].mxu0 }
 0x120   : > { %v1083_v44 = vadd.f32 %v1082_v43, %v1081_v40  ;;  %v1122_v45 = vpop.f32.mrb[13].mxu1  ;;  %v1084_v46 = vpop.f32.mrb[14].mxu0 }
 0x121   : > { %v1123_v47 = vadd.f32 %v1122_v45, %v1121_v42  ;;  %v1124_v48 = vpop.f32.mrb[14].mxu1  ;;  %v1085_v49 = vpop.f32.mrb[15].mxu0 }
 0x122   : > { %v697_v50 = vadd.f32 %v1083_v44, %v967_v58  ;;  %v1086_v51 = vadd.f32 %v1085_v49, %v1084_v46  ;;  %v1125_v52 = vpop.f32.mrb[15].mxu1 }
 0x123   : > { %v1126_v53 = vadd.f32 %v1125_v52, %v1124_v48 }
 0x124   : > { %v700_v54 = vadd.f32 %v1086_v51, %v967_v58  ;;  %v762_v55 = vadd.f32 %v1123_v47, %v697_v50 }
 0x126   : > { %v1145_v56 = vpop.f32.mrb[16].mxu0  ;;  %v765_v57 = vadd.f32 %v1126_v53, %v700_v54 }
 0x127   : > { %v811_v59 = vadd.f32 %v1145_v56, %v746_v23  ;;  %v1149_v60 = vpop.f32.mrb[16].mxu1  ;;  %v802_v61 = vpop.f32.mrb[17].mxu0 }
 0x128   : > { %v827_v62 = vadd.f32 %v1149_v60, %v762_v55  ;;  %v803_v63 = vadd.f32 %v802_v61, %v738_v7  ;;  %v818_v0 = vpop.f32.mrb[17].mxu1  ;;  %v1146_v1 = vpop.f32.mrb[18].mxu0 }
 0x129   : > { %v835_v2 = vmax.f32 %v811_v59, 0.0  ;;  %v819_v3 = vadd.f32 %v818_v0, %v754_v39  ;;  %v814_v4 = vadd.f32 %v1146_v1, %v749_v25  ;;  %v1150_v5 = vpop.f32.mrb[18].mxu1  ;;  %v805_v6 = vpop.f32.mrb[19].mxu0 }
 0x12a   : > { %v839_v58 = vmax.f32 %v827_v62, 0.0  ;;  %v833_v8 = vmax.f32 %v803_v63, 0.0  ;;  %v830_v10 = vadd.f32 %v1150_v5, %v765_v57  ;;  %v806_v11 = vadd.f32 %v805_v6, %v1343_v9  ;;  %v821_v12 = vpop.f32.mrb[19].mxu1 }
 0x12b   : > { %v1041_v13 = vpack.c.bf16 %v835_v2, %v835_v2  ;;  %v837_v7 = vmax.f32 %v819_v3, 0.0  ;;  %v836_v14 = vmax.f32 %v814_v4, 0.0  ;;  %v822_v15 = vadd.f32 %v821_v12, %v757_v41 }
 0x12c   : > { %v1045_v16 = vpack.c.bf16 %v839_v58, %v839_v58  ;;  %v1039_v17 = vpack.c.bf16 %v833_v8, %v833_v8  ;;  %v840_v18 = vmax.f32 %v830_v10, 0.0  ;;  %v834_v19 = vmax.f32 %v806_v11, 0.0 }
 0x12d   : > { %876 = vst.msk [vmem:[%s204_s28 + $0x8] sm:$0xf] %vm873_vm1, %v1041_v13  ;;  %v1043_v20 = vpack.c.bf16 %v837_v7, %v837_v7  ;;  %v1042_v21 = vpack.c.bf16 %v836_v14, %v836_v14  ;;  %v838_v22 = vmax.f32 %v822_v15, 0.0 }
 0x12e   : > { %880 = vst.msk [vmem:[%s204_s28 + $0x18] sm:$0xf] %vm873_vm1, %v1045_v16  ;;  %874 = vst.msk [vmem:[%s204_s28] sm:$0xf] %vm873_vm1, %v1039_v17  ;;  %v1046_v23 = vpack.c.bf16 %v840_v18, %v840_v18  ;;  %v1040_v9 = vpack.c.bf16 %v834_v19, %v834_v19 }
 0x12f   : > { %878 = vst.msk [vmem:[%s204_s28 + $0x10] sm:$0xf] %vm873_vm1, %v1043_v20  ;;  %877 = vst.msk [vmem:[%s204_s28 + $0xc] sm:$0xf] %vm873_vm1, %v1042_v21  ;;  %v1044_v24 = vpack.c.bf16 %v838_v22, %v838_v22 }
 0x130   : > { %881 = vst.msk [vmem:[%s204_s28 + $0x1c] sm:$0xf] %vm873_vm1, %v1046_v23  ;;  %875 = vst.msk [vmem:[%s204_s28 + $0x4] sm:$0xf] %vm873_vm1, %v1040_v9 }
 0x131   : > { %879 = vst.msk [vmem:[%s204_s28 + $0x14] sm:$0xf] %vm873_vm1, %v1044_v24 }
 0x132 PF: > { %s13_s12 = sadd.s32 1, %s1239_s12  }
 0x133   : > { %p10_p4 = scmp.ge.s32.totalorder %s13_s12, 4  }
 0x135   :  { %12 = sbr.rel (!%p10_p4) target bundleno = 1 (0x1), region = 68 }

// kernel: forward.9
= control target key start
LH: loop header
LB: loop body
LE: loop exit
PB: predicated region body
PF: predicated region fallthrough
CT: control target
= control target key end

     0   :  { %17 = vsyncpa [#allocation5], 0  ;;  %s1738_s0 = inlined_call_operand.vmem [shape: f32[2,4,2,64], index: 0, kind: input, shape index: {}]   ;;  %s1739_s1 = inlined_call_operand.vmem [shape: f32[2,2,64], index: 1, kind: input, shape index: {}]   ;;  %s1740_s2 = inlined_call_operand.vmem [shape: f32[2,64], index: 2, kind: input, shape index: {}]   ;;  %s1741_s3 = inlined_call_operand.vmem [shape: f32[2,64], index: 3, kind: input, shape index: {}]   ;;  %s1742_s4 = inlined_call_operand.vmem [shape: f32[4,64,64], index: 4, kind: input, shape index: {}]   ;;  %s1743_s5 = inlined_call_operand.vmem [shape: f32[4,1,64], index: 5, kind: input, shape index: {}]   ;;  %s1744_s6 = inlined_call_operand.vmem [shape: f32[4,1,64], index: 6, kind: input, shape index: {}]   ;;  %s1745_s7 = inlined_call_operand.vmem [shape: f32[1,64], index: 7, kind: input, shape index: {}]   ;;  %s1746_s8 = inlined_call_operand.vmem [shape: f32[1,64], index: 8, kind: input, shape index: {}]   ;;  %s1747_s9 = inlined_call_operand.hbm [shape: f32[2,2,64], index: 9, kind: output, shape index: {0}]   ;;  %s1748_s10 = inlined_call_operand.vmem [shape: f32[2,64], index: 10, kind: output, shape index: {1}]   ;;  %s1749_s11 = inlined_call_operand.vmem [shape: f32[2,64], index: 11, kind: output, shape index: {2}]  }
   0x1   :  { %19 = vsyncpa [#allocation5 + $0x1], 0  ;;  %s1428_s17 = smov 0   ;;  %s1430_s18 = smov 0  }
   0x2   :  { %s1432_s19 = smov 0   ;;  %s1434_s20 = smov 0  }
   0x3 LB: > { %1755 = sst [smem:[#allocation7_spill]] %s1358_s19  ;;  %s1449_s21 = sadd.s32 4294967295, %s1362_s20   ;;  %s1362_s20 = sphi %s1434_s20, %s1763_s20   ;;  %s1358_s19 = sphi %s1432_s19, %s1765_s19   ;;  %s1354_s18 = sphi %s1430_s18, %s1767_s18   ;;  %s1350_s17 = sphi %s1428_s17, %s1766_s17  }
   0x4   : > { %s1014_s22 = sadd.s32 4294967294, %s1362_s20   ;;  %s1453_s23 = sadd.s32 1, %s1362_s20  }
   0x5   : > { %1756 = sst [smem:[#allocation8_spill]] %s1453_s23  ;;  %s231_s24 = sadd.s32 1, %s1358_s19 }
   0x6   : > { %s228_s25 = ssub.s32 %s1362_s20, %s1453_s23  ;;  %p241_p0 = scmp.ne.s32.totalorder %s1358_s19, %s1354_s18 }
   0x7   : > { %p229_p1 = scmp.eq.s32.totalorder %s228_s25, 0  ;;  %p242_p2 = scmp.eq.s32.totalorder %s1449_s21, 1 }
   0x8   : > { %p247_p3 = scmp.ne.s32.totalorder %s1354_s18, %s1350_s17  ;;  %p248_p4 = scmp.eq.s32.totalorder %s1014_s22, 1 }
   0x9   : > { %s1464_s26 = scalar_select %p229_p1, %s1358_s19, %s231_s24  }
   0xa   : > { %p1466_p5 = por %p242_p2, %p241_p0  ;;  %p1470_p6 = por %p248_p4, %p247_p3 }
   0xb   : > { %1757 = sst [smem:[#allocation9_spill]] %s1464_s26  ;;  %p1017_p7 = scmp.ge.s32.totalorder %s1362_s20, 1 }
   0xc   : > { %s1759_s28 = scalar_select %p1470_p6, 1, 0 }
   0xd   : > { %p344_p8 = scmp.lt.s32.totalorder %s1362_s20, 3 }
   0xe   : > { %1760 = sst [smem:[#allocation10_spill]] %s1759_s28 }
   0xf   : > { %p345_p9 = pnand %p1017_p7, %p344_p8 }
  0x10   : > { %s1751_s29 = sand.u32 (!%p345_p9), 1, %s1354_s18   ;;  %p388_p10 = scmp.lt.s32.totalorder (!%p345_p9), %s1449_s21, 1 }
  0x11   : > { %348 = sbr.rel (%p345_p9) target bundleno = 979 (0x3d3), region = 56  ;;  %s1480_s30 = sshll.u32 (!%p345_p9), %s1751_s29, 1 }
  0x12   : > { %s383_s19 = scalar_lea.vmem (!%p345_p9), [#allocation4], %s1480_s30  ;;  %p1022_p11 = scmp.ne.s32.totalorder (!%p345_p9), %s1449_s21, 0 }
  0x18   : > { %s389_s12 = scalar_select %p388_p10, %s1449_s21, 1 }
  0x19   : > { %400 = sbr.rel (%p1022_p11) target bundleno = 32 (0x20), region = 60  ;;  %v401_v0 = vld [vmem:[%s1740_s2] sm:$0x3] (!%p1022_p11)  ;;  %vm402_vm0 = vcmask (!%p1022_p11), 517120  }
  0x1a   : > { %s1077_s13 = sshll.u32 %s389_s12, 3  ;;  %s1021_s14 = sshll.u32 %s389_s12, 1  ;;  %v404_v1 = vld [vmem:[%s1741_s3] sm:$0x3] (!%p1022_p11)  ;;  %403 = vst.msk [vmem:[#allocation2] sm:$0x3] (!%p1022_p11), %vm402_vm0, %v401_v0 }
  0x1b   : > { %s1486_s22 = scalar_lea.vmem %s1738_s0, %s1077_s13  ;;  %s1491_s26 = scalar_lea.vmem %s1739_s1, %s1021_s14  ;;  %405 = vst.msk [vmem:[#allocation3] sm:$0x3] (!%p1022_p11), %vm402_vm0, %v404_v1 }
  0x20 PF: > { %v411_v2 = vld [vmem:[%s1742_s4] sm:$0xff]  ;;  %v412_v3 = vld [vmem:[%s1742_s4 + $0x8] sm:$0xff]  ;;  %v1364_v5 = vmov 0.0|0.0   ;;  %v413_v8 = vld [vmem:[%s1742_s4 + $0x10] sm:$0xff]  ;;  %vm1365_vm1 = vmmov 0   ;;  %v1366_v13 = vmov 0.0  }
  0x21   : > { %v1024_v4 = vld [vmem:[%s1742_s4 + $0x40] sm:$0xff]  ;;  %1190 = vmatprep.subr.bf16.mxu0 %v1364_v5  ;;  %v1191_v6 = vpack.c.bf16 %v412_v3, %v411_v2  ;;  %1202 = vmatprep.subr.bf16.mxu1 %v1364_v5  ;;  %v1025_v7 = vld [vmem:[%s1742_s4 + $0x48] sm:$0xff]  ;;  %v414_v9 = vld [vmem:[%s1742_s4 + $0x18] sm:$0xff]  ;;  %vm419_vm2 = vcmask 523264   ;;  %vm730_vm3 = vcmask 517120   ;;  %s931_s15 = sshll.u32 %s383_s19, 4  ;;  %s1688_s15 = int_to_ptr.vmem [resolvable:$true] %s931_s15 }
  0x22   : > { %v1203_v10 = vpack.c.bf16 %v1025_v7, %v1024_v4  ;;  %v1026_v11 = vld [vmem:[%s1742_s4 + $0x50] sm:$0xff]  ;;  %v1027_v12 = vld [vmem:[%s1742_s4 + $0x58] sm:$0xff]  ;;  %1130 = vmatprep.mubr.msk.f32.mxu0 %vm1365_vm1, %v1366_v13  ;;  %1149 = vmatprep.mubr.msk.f32.mxu1 %vm1365_vm1, %v1366_v13  ;;  %v1194_v14 = vpack.c.bf16 %v414_v9, %v413_v8  ;;  %v415_v16 = vld [vmem:[%s1742_s4 + $0x20] sm:$0xff]  ;;  %s1761_s23 = sand.u32 1, %s1354_s18   ;;  %s1367_s29 = smov [#allocation4]  }
  0x23   : > { %1192 = vmatpush3.bf16.msra.mxu0 %v1191_v6  ;;  %v1206_v15 = vpack.c.bf16 %v1027_v12, %v1026_v11  ;;  %v416_v17 = vld [vmem:[%s1742_s4 + $0x28] sm:$0xff]  ;;  %v1028_v18 = vld [vmem:[%s1742_s4 + $0x60] sm:$0xff]  ;;  %v417_v22 = vld [vmem:[%s1742_s4 + $0x30] sm:$0xff]  ;;  %s918_s28 = scalar_lea.sflag [#allocation5], %s1761_s23  ;;  %s1304_s12 = sshll.u32 %s1367_s29, 4  ;;  %s1305_s12 = int_to_ptr.vmem [resolvable:$false] %s1304_s12 }
  0x24   : > { %1193 = vmatprep.subr.bf16.mxu0 %v1364_v5  ;;  %1204 = vmatpush3.bf16.msra.mxu1 %v1203_v10  ;;  %v1029_v19 = vld [vmem:[%s1742_s4 + $0x68] sm:$0xff]  ;;  %v1197_v20 = vpack.c.bf16 %v416_v17, %v415_v16  ;;  %v418_v23 = vld [vmem:[%s1742_s4 + $0x38] sm:$0xff]  ;;  %v1030_v24 = vld [vmem:[%s1742_s4 + $0x70] sm:$0xff]  ;;  %s1306_s13 = scalar_lea.vmem %s1305_s12, 64  ;;  %p1307_p1 = scmp.lt.s32.totalorder %s1688_s15, %s1305_s12 }
  0x25   : > { %1205 = vmatprep.subr.bf16.mxu1 %v1364_v5  ;;  %v1209_v21 = vpack.c.bf16 %v1029_v19, %v1028_v18  ;;  %v1031_v25 = vld [vmem:[%s1742_s4 + $0x78] sm:$0xff]  ;;  %v1200_v26 = vpack.c.bf16 %v418_v23, %v417_v22  ;;  %v1558_v27 = vld [vmem:[%s1491_s26] sm:$0x3]  ;;  %v1034_v31 = vld [vmem:[%s1742_s4 + $0x88] sm:$0xff]  ;;  %s1300_s26 = scalar_lea.vmem %s1688_s15, 32 }
  0x26   : > { %v407_v28 = vld [vmem:[#allocation2] sm:$0x3]  ;;  %v1212_v29 = vpack.c.bf16 %v1031_v25, %v1030_v24  ;;  %v1043_v33 = vld [vmem:[%s1742_s4 + $0xc8] sm:$0xff]  ;;  %v1035_v37 = vld [vmem:[%s1742_s4 + $0x90] sm:$0xff]  ;;  %p1301_p12 = scmp.ne.s32.totalorder %s1688_s15, %s1300_s26  ;;  %p1308_p2 = scmp.lt.s32.totalorder %s1306_s13, %s1300_s26 }
  0x27   : > { %1195 = vmatpush3.bf16.msra.mxu0 %v1194_v14  ;;  %v1033_v30 = vld [vmem:[%s1742_s4 + $0x80] sm:$0xff]  ;;  %v408_v34 = vmul.f32 %v407_v28, %v1558_v27  ;;  %v1036_v38 = vld [vmem:[%s1742_s4 + $0x98] sm:$0xff]  ;;  %v1044_v39 = vld [vmem:[%s1742_s4 + $0xd0] sm:$0xff] }
  0x28   : > { %1196 = vmatprep.subr.bf16.mxu0 %v1364_v5  ;;  %1207 = vmatpush3.bf16.msra.mxu1 %v1206_v15  ;;  %v1042_v32 = vld [vmem:[%s1742_s4 + $0xc0] sm:$0xff]  ;;  %v1215_v35 = vpack.c.bf16 %v1034_v31, %v1033_v30  ;;  %v1045_v40 = vld [vmem:[%s1742_s4 + $0xd8] sm:$0xff]  ;;  %v1218_v41 = vpack.c.bf16 %v1036_v38, %v1035_v37  ;;  %v1038_v44 = vld [vmem:[%s1742_s4 + $0xa8] sm:$0xff]  ;;  %p1302_p13 = pnand %p1301_p12, %p1466_p5  ;;  %p1309_p3 = por %p1308_p2, %p1307_p1 }
  0x29   : > { %1208 = vmatprep.subr.bf16.mxu1 %v1364_v5  ;;  %v1227_v36 = vpack.c.bf16 %v1043_v33, %v1042_v32  ;;  %v1230_v42 = vpack.c.bf16 %v1045_v40, %v1044_v39  ;;  %v1037_v43 = vld [vmem:[%s1742_s4 + $0xa0] sm:$0xff]  ;;  %v1047_v46 = vld [vmem:[%s1742_s4 + $0xe8] sm:$0xff]  ;;  %v1039_v49 = vld [vmem:[%s1742_s4 + $0xb0] sm:$0xff] }
  0x2a   : > { %v1046_v45 = vld [vmem:[%s1742_s4 + $0xe0] sm:$0xff]  ;;  %v1221_v47 = vpack.c.bf16 %v1038_v44, %v1037_v43  ;;  %v1040_v50 = vld [vmem:[%s1742_s4 + $0xb8] sm:$0xff]  ;;  %v1048_v51 = vld [vmem:[%s1742_s4 + $0xf0] sm:$0xff]  ;;  %p1303_p0 = pneg %p1302_p13 }
  0x2b   : > { %1198 = vmatpush3.bf16.msra.mxu0 %v1197_v20  ;;  %v1233_v48 = vpack.c.bf16 %v1047_v46, %v1046_v45  ;;  %v1049_v52 = vld [vmem:[%s1742_s4 + $0xf8] sm:$0xff]  ;;  %v1224_v53 = vpack.c.bf16 %v1040_v50, %v1039_v49  ;;  %v1052_v38 = vld [vmem:[%s1744_s6] ss:$0 sm:$0xff]  ;;  %v1056_v39 = vld [vmem:[%s1744_s6 + $0x1] ss:$0 sm:$0xff] }
  0x2c   : > { %1199 = vmatprep.subr.bf16.mxu0 %v1364_v5  ;;  %1210 = vmatpush3.bf16.msra.mxu1 %v1209_v21  ;;  %v1236_v54 = vpack.c.bf16 %v1049_v52, %v1048_v51  ;;  %v1057_v43 = vld [vmem:[%s1486_s22 + $0x2] sm:$0x3]  ;;  %p1310_p4 = pnand %p1309_p3, %p1303_p0 }
  0x2d   : > { %1211 = vmatprep.subr.bf16.mxu1 %v1364_v5  ;;  %v1064_v49 = vld [vmem:[%s1743_s5 + $0x3] ss:$0 sm:$0xff] }
  0x2f   : > { %1201 = vmatpush3.bf16.msra.mxu0 %v1200_v26 }
  0x30   : > { %1213 = vmatpush3.bf16.msra.mxu1 %v1212_v29  ;;  %1214 = vmatprep.subr.bf16.mxu0 %v1364_v5 }
  0x31   : > { %1226 = vmatprep.subr.bf16.mxu1 %v1364_v5 }
  0x32   : > { %1131 = vmatmul.mubr.msk.f32.vlgmr.msra.gmra.mrb[0].mxu0 %vm419_vm2, %v408_v34 }
  0x33   : > { %1216 = vmatpush3.bf16.msra.mxu0 %v1215_v35  ;;  %1150 = vmatmul.mubr.msk.f32.vlgmr.msra.gmra.mrb[0].mxu1 %vm419_vm2, %v408_v34  ;;  %v1054_v35 = vld [vmem:[%s1743_s5 + $0x1] ss:$0 sm:$0xff] }
  0x34   : > { %1217 = vmatprep.subr.bf16.mxu0 %v1364_v5  ;;  %1228 = vmatpush3.bf16.msra.mxu1 %v1227_v36 }
  0x35   : > { %1229 = vmatprep.subr.bf16.mxu1 %v1364_v5  ;;  %1168 = vmatprep.mubr.msk.f32.mxu0 %vm1365_vm1, %v1366_v13 }
  0x36   : > { %1187 = vmatprep.mubr.msk.f32.mxu1 %vm1365_vm1, %v1366_v13 }
  0x37   : > { %1219 = vmatpush3.bf16.msra.mxu0 %v1218_v41 }
  0x38   : > { %1220 = vmatprep.subr.bf16.mxu0 %v1364_v5  ;;  %1231 = vmatpush3.bf16.msra.mxu1 %v1230_v42  ;;  %v790_v42 = vld [vmem:[%s1486_s22] sm:$0x3] }
  0x39   : > { %1232 = vmatprep.subr.bf16.mxu1 %v1364_v5 }
  0x3b   : > { %1222 = vmatpush3.bf16.msra.mxu0 %v1221_v47 }
  0x3c   : > { %1223 = vmatprep.subr.bf16.mxu0 %v1364_v5  ;;  %1234 = vmatpush3.bf16.msra.mxu1 %v1233_v48 }
  0x3d   : > { %1235 = vmatprep.subr.bf16.mxu1 %v1364_v5 }
  0x3f   : > { %1225 = vmatpush3.bf16.msra.mxu0 %v1224_v53  ;;  %v1066_v53 = vld [vmem:[%s1744_s6 + $0x3] ss:$0 sm:$0xff] }
  0x40   : > { %1237 = vmatpush3.bf16.msra.mxu1 %v1236_v54 }
  0x42   : > { %1169 = vmatmul.mubr.msk.f32.vlgmr.msra.gmra.mrb[2].mxu0 %vm419_vm2, %v408_v34 }
  0x43   : > { %1188 = vmatmul.mubr.msk.f32.vlgmr.msra.gmra.mrb[2].mxu1 %vm419_vm2, %v408_v34  ;;  %v1051_v34 = vld [vmem:[%s1743_s5] ss:$0 sm:$0xff] }
 0x105   : > { %v489_v55 = vpop.f32.mrb[0].mxu0 }
 0x106   : > { %v1132_v56 = vpop.f32.mrb[1].mxu0  ;;  %v731_v57 = vsel %vm730_vm3, %v489_v55, 0.0  ;;  %v568_v58 = vpop.f32.mrb[0].mxu1 }
 0x107   : > { %732 = vadd.xlane.f32.xlu0 %v731_v57  ;;  %v1151_v59 = vpop.f32.mrb[1].mxu1  ;;  %v734_v60 = vsel %vm730_vm3, %v568_v58, 0.0 }
 0x10b   : > { %735 = vadd.xlane.f32.xlu0 %v734_v60 }
 0x115   : > { %v647_v61 = vpop.f32.mrb[2].mxu0 }
 0x116   : > { %v1170_v62 = vpop.f32.mrb[3].mxu0  ;;  %v738_v63 = vsel %vm730_vm3, %v647_v61, 0.0  ;;  %v726_v0 = vpop.f32.mrb[2].mxu1 }
 0x117   : > { %739 = vadd.xlane.f32.xlu1 %v738_v63  ;;  %v1189_v1 = vpop.f32.mrb[3].mxu1  ;;  %v742_v2 = vsel %vm730_vm3, %v726_v0, 0.0 }
 0x11b   : > { %743 = vadd.xlane.f32.xlu1 %v742_v2 }
 0x194   : > { %v733_v3 = vpop.xlane.xlu0 %732 }
 0x198   : > { %v736_v4 = vpop.xlane.xlu0 %735 }
 0x199   : > { %v737_v6 = vadd.f32 %v736_v4, %v733_v3 }
 0x1a4   : > { %v740_v5 = vpop.xlane.xlu1 %739 }
 0x1a5   : > { %v741_v7 = vadd.f32 %v740_v5, %v737_v6 }
 0x1a8   : > { %v744_v8 = vpop.xlane.xlu1 %743 }
 0x1a9   : > { %v745_v9 = vadd.f32 %v744_v8, %v741_v7 }
 0x1ab   : > { %v746_v10 = vmul.f32 0.00390625, %v745_v9 }
 0x1ad   : > { %v752_v11 = vsub.f32 %v568_v58, %v746_v10  ;;  %v747_v12 = vsub.f32 %v489_v55, %v746_v10  ;;  %v764_v13 = vsub.f32 %v726_v0, %v746_v10  ;;  %v1629_v14 = vsub.f32 %v647_v61, %v746_v10  ;;  %v1067_v55 = vld [vmem:[%s1486_s22 + $0x6] sm:$0x3]  ;;  %v409_v61 = vld [vmem:[#allocation3] sm:$0x3] }
 0x1ae   : > { %v410_v62 = vmul.f32 %v409_v61, %v1558_v27 }
 0x1af   : > { %v753_v15 = vmul.f32 %v752_v11, %v752_v11  ;;  %v748_v16 = vmul.f32 %v747_v12, %v747_v12  ;;  %v765_v19 = vmul.f32 %v764_v13, %v764_v13  ;;  %v759_v20 = vmul.f32 %v1629_v14, %v1629_v14 }
 0x1b1   : > { %v754_v17 = vsel %vm730_vm3, %v753_v15, 0.0  ;;  %v749_v18 = vsel %vm730_vm3, %v748_v16, 0.0  ;;  %v766_v21 = vsel %vm730_vm3, %v765_v19, 0.0  ;;  %v760_v22 = vsel %vm730_vm3, %v759_v20, 0.0  ;;  %v1062_v16 = vld [vmem:[%s1486_s22 + $0x4] sm:$0x3] }
 0x1b2   : > { %755 = vadd.xlane.f32.xlu1 %v754_v17  ;;  %750 = vadd.xlane.f32.xlu0 %v749_v18  ;;  %s1074_s22 = sshll.u32 %s1449_s21, 5 }
 0x1b3   : > { %s1686_s24 = scalar_lea.hbm %s1747_s9, %s1074_s22 }
 0x1b6   : > { %767 = vadd.xlane.f32.xlu1 %v766_v21  ;;  %761 = vadd.xlane.f32.xlu0 %v760_v22 }
 0x23f   : > { %v756_v23 = vpop.xlane.xlu1 %755  ;;  %v751_v24 = vpop.xlane.xlu0 %750 }
 0x240   : > { %v757_v25 = vadd.f32 %v756_v23, %v751_v24  ;;  %v1071_v23 = vld [vmem:[%s1745_s7] ss:$0 sm:$0xff] }
 0x243   : > { %v762_v26 = vpop.xlane.xlu0 %761  ;;  %v768_v29 = vpop.xlane.xlu1 %767 }
 0x244   : > { %v763_v28 = vadd.f32 %v762_v26, %v757_v25  ;;  %v1072_v25 = vld [vmem:[%s1746_s8] ss:$0 sm:$0xff] }
 0x246   : > { %v769_v30 = vadd.f32 %v768_v29, %v763_v28 }
 0x248   : > { %v770_v31 = vmul.f32 0.00390625, %v769_v30 }
 0x24a   : > { %v771_v32 = vadd.f32 1e-05, %v770_v31 }
 0x24c   : > { %1280 = vrsqrt.f32 %v771_v32 }
 0x256   : > { %v1281_v33 = vpop.eup %1280 }
 0x257   : > { %v773_v36 = vmul.f32 %v1281_v33, %v747_v12  ;;  %v792_v37 = vmul.f32 %v1281_v33, %v752_v11  ;;  %v836_v48 = vmul.f32 %v1281_v33, %v764_v13  ;;  %v814_v10 = vmul.f32 %v1281_v33, %v1629_v14  ;;  %v1059_v11 = vld [vmem:[%s1743_s5 + $0x2] ss:$0 sm:$0xff] }
 0x258   : > { %v1061_v13 = vld [vmem:[%s1744_s6 + $0x2] ss:$0 sm:$0xff] }
 0x259   : > { %v781_v40 = vmul.f32 %v1051_v34, %v773_v36  ;;  %v801_v41 = vmul.f32 %v1054_v35, %v792_v37  ;;  %v845_v52 = vmul.f32 %v1064_v49, %v836_v48  ;;  %v823_v12 = vmul.f32 %v1059_v11, %v814_v10 }
 0x25b   : > { %v789_v44 = vadd.f32 %v1052_v38, %v781_v40  ;;  %v810_v45 = vadd.f32 %v1056_v39, %v801_v41  ;;  %v854_v54 = vadd.f32 %v1066_v53, %v845_v52  ;;  %v832_v15 = vadd.f32 %v1061_v13, %v823_v12 }
 0x25d   : > { %v791_v46 = vadd.f32 %v790_v42, %v789_v44  ;;  %v813_v47 = vadd.f32 %v1057_v43, %v810_v45  ;;  %v857_v56 = vadd.f32 %v1067_v55, %v854_v54  ;;  %v835_v17 = vadd.f32 %v1062_v16, %v832_v15 }
 0x25f   : > { %v1068_v50 = vmul.f32 -1.442695, %v791_v46  ;;  %v1069_v51 = vmul.f32 -1.442695, %v813_v47  ;;  %v1070_v19 = vmul.f32 -1.442695, %v835_v17 }
 0x261   : > { %1282 = vpow2.f32 %v1068_v50 }
 0x262   : > { %1284 = vpow2.f32 %v1069_v51 }
 0x263   : > { %1286 = vtanh.f32 %v857_v56 }
 0x26b   : > { %v1283_v57 = vpop.eup %1282 }
 0x26c   : > { %v1285_v58 = vpop.eup %1284  ;;  %v861_v59 = vadd.f32 1.0, %v1283_v57 }
 0x26d   : > { %v867_v60 = vadd.f32 1.0, %v1285_v58  ;;  %v1287_v63 = vpop.eup %1286 }
 0x26e   : > { %1288 = vrcp.f32 %v861_v59 }
 0x26f   : > { %1290 = vrcp.f32 %v867_v60 }
 0x270   : > { %1292 = vpow2.f32 %v1070_v19 }
 0x278   : > { %v1289_v0 = vpop.eup %1288 }
 0x279   : > { %v1291_v1 = vpop.eup %1290  ;;  %v878_v2 = vmul.f32 %v1289_v0, %v1287_v63 }
 0x27a   : > { %v877_v3 = vmul.f32 %v1291_v1, %v410_v62  ;;  %v1293_v14 = vpop.eup %1292 }
 0x27b   : > { %v873_v26 = vadd.f32 1.0, %v1293_v14 }
 0x27c   : > { %v879_v4 = vadd.f32 %v878_v2, %v877_v3 }
 0x27e   : > { %v880_v5 = vsel %vm730_vm3, %v879_v4, 0.0  ;;  %913 = vst.msk [vmem:[#allocation3] sm:$0x3] %vm730_vm3, %v879_v4  ;;  %916 = vst.msk [vmem:[%s1749_s11] sm:$0x3] %vm730_vm3, %v879_v4 }
 0x27f   : > { %881 = vadd.xlane.f32.xlu0 %v880_v5 }
 0x30c   : > { %v882_v6 = vpop.xlane.xlu0 %881 }
 0x30d   : > { %v884_v7 = vmul.f32 0.015625, %v882_v6 }
 0x30f   : > { %v885_v27 = vsub.f32 %v879_v4, %v884_v7 }
 0x311   : > { %v886_v8 = vmul.f32 %v885_v27, %v885_v27 }
 0x313   : > { %v887_v9 = vsel %vm730_vm3, %v886_v8, 0.0 }
 0x314   : > { %888 = vadd.xlane.f32.xlu1 %v887_v9 }
 0x3a1   : > { %v889_v18 = vpop.xlane.xlu1 %888 }
 0x3a2   : > { %v890_v20 = vmul.f32 0.015625, %v889_v18 }
 0x3a4   : > { %v891_v21 = vadd.f32 1e-05, %v890_v20 }
 0x3a6   : > { %1294 = vrsqrt.f32 %v891_v21 }
 0x3a7   : > { %1296 = vrcp.f32 %v873_v26 }
 0x3b0   : > { %v1295_v22 = vpop.eup %1294 }
 0x3b1   : > { %v893_v24 = vmul.f32 %v1295_v22, %v885_v27  ;;  %v1297_v30 = vpop.eup %1296 }
 0x3b3   : > { %v901_v28 = vmul.f32 %v1071_v23, %v893_v24 }
 0x3b5   : > { %v909_v29 = vadd.f32 %v1072_v25, %v901_v28 }
 0x3b7   : > { %1298 = vtanh.f32 %v909_v29 }
 0x3c1   : > { %v1299_v31 = vpop.eup %1298 }
 0x3c2   : > { %v911_v32 = vmul.f32 %v1299_v31, %v1297_v30 }
 0x3c4   : > { %912 = vst.msk [vmem:[#allocation2] sm:$0x3] %vm730_vm3, %v911_v32  ;;  %914 = vst.msk [vmem:[%s383_s19] sm:$0x3] %vm730_vm3, %v911_v32 }
 0x3c5   : > { %915 = vst.msk [vmem:[%s1748_s10] sm:$0x3] %vm730_vm3, %v911_v32 }
 0x3c6   : > { %1313 = shalt.err (!%p1310_p4)
}
 0x3c7   : > { %s1314_s19 = scalar_lea.hbm %s1686_s24, 32  ;;  %s1318_s14 = scalar_lea.hbm %s1747_s9, 64 }
 0x3c8   : > { %p1315_p7 = scmp.ne.s32.totalorder %s1686_s24, %s1314_s19  ;;  %p1319_p10 = scmp.lt.u32.totalorder %s1686_s24, %s1747_s9 }
 0x3c9   : > { %p1320_p11 = scmp.lt.u32.totalorder %s1318_s14, %s1314_s19  ;;  %p1322_p13 = scmp.lt.u32.totalorder %s1314_s19, %s1686_s24 }
 0x3ca   : > { %p1316_p8 = pnand %p1315_p7, %p1466_p5 }
 0x3cb   : > { %p1321_p12 = por %p1320_p11, %p1319_p10 }
 0x3cc   : > { %p1317_p9 = pneg %p1316_p8 }
 0x3cd   : > { %p1323_p0 = por %p1322_p13, %p1321_p12 }
 0x3cf   : > { %p1324_p1 = pnand %p1323_p0, %p1317_p9 }
 0x3d1   : > { %1327 = shalt.err (!%p1324_p1)
}
 0x3d2   : > { %1238 = dma.vmem_to_hbm [thread:$0]  (%p1466_p5), %s1688_s15, 32, %s1686_s24, %s918_s28  }
 0x3d3 PF: > { %p1244_p2 = scmp.ge.s32.totalorder %s1362_s20, 2  ;;  %s955_s23 = sand.u32 1, %s1350_s17  }
 0x3d4   : > { %s956_s26 = scalar_lea.sflag [#allocation5], %s955_s23 }
 0x3d5   : > { %p1241_p3 = pnand %p1244_p2, %p1470_p6 }
 0x3d7   : > { %1345 = dma.done.wait (!%p1241_p3), %s956_s26, 32  }
 0x3d8   : > { %1347 = vsyncadd (!%p1241_p3), %s956_s26, 4294967264  ;;  %s1763_s20 = sld [smem:[#allocation8_spill]]  ;;  %s1764_s29 = sld [smem:[#allocation7_spill]] }
 0x3d9   : > { %s1765_s19 = sld [smem:[#allocation9_spill]]  ;;  %s1766_s17 = smov %s1354_s18 }
 0x3de   : > { %p22_p4 = scmp.ge.s32.totalorder %s1763_s20, 4   ;;  %s1767_s18 = smov %s1764_s29 }
 0x3e0   :  { %24 = sbr.rel (!%p22_p4) target bundleno = 3 (0x3), region = 126 }
 0x3e7   :  { %961 = vsyncpa [#allocation5], 1 }
 0x3e8   :  { %963 = vsyncpa [#allocation5 + $0x1], 1 }

// kernel: forward.8
= control target key start
LH: loop header
LB: loop body
LE: loop exit
PB: predicated region body
PF: predicated region fallthrough
CT: control target
= control target key end

     0   :  { %v2569_v22 = vmov 1983009808   ;;  %v310_v24 = vlaneseq  ;;  %vm2572_vm0 = vmmov 0   ;;  %vm1499_vm1 = vcmask 130048   ;;  %s3203_s2 = inlined_call_operand.vmem [shape: bf16[2,1024,64], index: 2, kind: input, shape index: {}]   ;;  %s3204_s0 = inlined_call_operand.vmem [shape: bf16[2,4,1024], index: 0, kind: input, shape index: {}]   ;;  %s3205_s4 = inlined_call_operand.vmem [shape: f32[16,64], index: 4, kind: input, shape index: {}]   ;;  %s3206_s1 = inlined_call_operand.vmem [shape: f32[4,16], index: 1, kind: input, shape index: {}]   ;;  %s3207_s6 = inlined_call_operand.vmem [shape: f32[64,64], index: 6, kind: input, shape index: {}]   ;;  %s3208_s9 = inlined_call_operand.vmem [shape: f32[64,256], index: 9, kind: input, shape index: {}]   ;;  %s3209_s5 = inlined_call_operand.vmem [shape: f32[1,64], index: 5, kind: input, shape index: {}]   ;;  %s3210_s8 = inlined_call_operand.vmem [shape: f32[64,256], index: 8, kind: input, shape index: {}]   ;;  %s3211_s7 = inlined_call_operand.vmem [shape: f32[1,64], index: 7, kind: input, shape index: {}]   ;;  %s3212_s3 = inlined_call_operand.vmem [shape: f32[1,64], index: 3, kind: input, shape index: {}]   ;;  %s3213_s10 = inlined_call_operand.vmem [shape: f32[1,256], index: 10, kind: input, shape index: {}]   ;;  %s3214_s11 = inlined_call_operand.vmem [shape: f32[1,256], index: 11, kind: input, shape index: {}]   ;;  %s3215_s12 = inlined_call_operand.vmem [shape: f32[4,256], index: 12, kind: output, shape index: {}]  }
   0x1   :  { %v2435_v0 = vld [vmem:[%s3203_s2 + $0x240] sm:$0xff]   ;;  %v2439_v4 = vld [vmem:[%s3203_s2 + $0x248] sm:$0xff]   ;;  %v2443_v8 = vld [vmem:[%s3203_s2 + $0x250] sm:$0xff]   ;;  %v308_v23 = vunpack.c.l.s4 %v2569_v22  ;;  %vm1589_vm2 = vcmask 523264   ;;  %vm1844_vm3 = vcmask 1043456  }
   0x2   :  { %v2436_v1 = vld [vmem:[%s3203_s2 + $0x2c0] sm:$0xff]   ;;  %2168 = vmatprep.subr.bf16.mxu0 %v2435_v0  ;;  %v2440_v5 = vld [vmem:[%s3203_s2 + $0x2c8] sm:$0xff]   ;;  %v2444_v9 = vld [vmem:[%s3203_s2 + $0x2d0] sm:$0xff]   ;;  %v2716_v30 = vshrl.u32 %v310_v24, 7 }
   0x3   :  { %v2437_v2 = vld [vmem:[%s3203_s2 + $0x200] sm:$0xff]   ;;  %2190 = vmatprep.subr.bf16.mxu1 %v2436_v1  ;;  %v2441_v6 = vld [vmem:[%s3203_s2 + $0x208] sm:$0xff]   ;;  %v2445_v10 = vld [vmem:[%s3203_s2 + $0x210] sm:$0xff]   ;;  %v309_v29 = vunpack.c.0.s8 %v308_v23 }
   0x4   :  { %v2438_v3 = vld [vmem:[%s3203_s2 + $0x280] sm:$0xff]   ;;  %2169 = vmatpush3.bf16.msra.mxu0 %v2437_v2  ;;  %v2442_v7 = vld [vmem:[%s3203_s2 + $0x288] sm:$0xff]   ;;  %v2446_v11 = vld [vmem:[%s3203_s2 + $0x290] sm:$0xff]  }
   0x5   :  { %2191 = vmatpush3.bf16.msra.mxu1 %v2438_v3  ;;  %2170 = vmatprep.subr.bf16.mxu0 %v2439_v4  ;;  %v2447_v12 = vld [vmem:[%s3203_s2 + $0x258] sm:$0xff]   ;;  %v2451_v16 = vld [vmem:[%s3203_s2 + $0x260] sm:$0xff]   ;;  %v2455_v20 = vld [vmem:[%s3203_s2 + $0x268] sm:$0xff]   ;;  %v2731_v35 = vsub.s32 %v309_v29, %v2716_v30 }
   0x6   :  { %2192 = vmatprep.subr.bf16.mxu1 %v2440_v5  ;;  %v2448_v13 = vld [vmem:[%s3203_s2 + $0x2d8] sm:$0xff]   ;;  %v2452_v17 = vld [vmem:[%s3203_s2 + $0x2e0] sm:$0xff]   ;;  %v2456_v21 = vld [vmem:[%s3203_s2 + $0x2e8] sm:$0xff]  }
   0x7   :  { %v2449_v14 = vld [vmem:[%s3203_s2 + $0x218] sm:$0xff]   ;;  %v2453_v18 = vld [vmem:[%s3203_s2 + $0x220] sm:$0xff]   ;;  %v2457_v25 = vld [vmem:[%s3203_s2 + $0x228] sm:$0xff]  }
   0x8   :  { %2171 = vmatpush3.bf16.msra.mxu0 %v2441_v6  ;;  %v2450_v15 = vld [vmem:[%s3203_s2 + $0x298] sm:$0xff]   ;;  %v2454_v19 = vld [vmem:[%s3203_s2 + $0x2a0] sm:$0xff]   ;;  %v2458_v26 = vld [vmem:[%s3203_s2 + $0x2a8] sm:$0xff]  }
   0x9   :  { %2193 = vmatpush3.bf16.msra.mxu1 %v2442_v7  ;;  %2172 = vmatprep.subr.bf16.mxu0 %v2443_v8  ;;  %v2459_v27 = vld [vmem:[%s3203_s2 + $0x270] sm:$0xff]   ;;  %v2463_v33 = vld [vmem:[%s3203_s2 + $0x278] sm:$0xff]   ;;  %v2468_v41 = vld [vmem:[%s3203_s2 + $0x340] sm:$0xff]  }
   0xa   :  { %2194 = vmatprep.subr.bf16.mxu1 %v2444_v9  ;;  %v2460_v28 = vld [vmem:[%s3203_s2 + $0x2f0] sm:$0xff]   ;;  %v2464_v34 = vld [vmem:[%s3203_s2 + $0x2f8] sm:$0xff]   ;;  %v2469_v42 = vld [vmem:[%s3203_s2 + $0x3c0] sm:$0xff]  }
   0xb   :  { %v2461_v31 = vld [vmem:[%s3203_s2 + $0x230] sm:$0xff]   ;;  %v2465_v36 = vld [vmem:[%s3203_s2 + $0x238] sm:$0xff]   ;;  %v2470_v45 = vld [vmem:[%s3203_s2 + $0x300] sm:$0xff]  }
   0xc   :  { %2173 = vmatpush3.bf16.msra.mxu0 %v2445_v10  ;;  %v2462_v32 = vld [vmem:[%s3203_s2 + $0x2b0] sm:$0xff]   ;;  %v2466_v37 = vld [vmem:[%s3203_s2 + $0x2b8] sm:$0xff]   ;;  %v2471_v46 = vld [vmem:[%s3203_s2 + $0x380] sm:$0xff]  }
   0xd   :  { %2195 = vmatpush3.bf16.msra.mxu1 %v2446_v11  ;;  %2174 = vmatprep.subr.bf16.mxu0 %v2447_v12  ;;  %v1903_v38 = vld [vmem:[%s3204_s0 + $0x10] sm:$0xff]  ;;  %v2472_v48 = vld [vmem:[%s3203_s2 + $0x348] sm:$0xff]   ;;  %v2480_v56 = vld [vmem:[%s3203_s2 + $0x358] sm:$0xff]  }
   0xe   :  { %2196 = vmatprep.subr.bf16.mxu1 %v2448_v13  ;;  %v313_v39 = vrot.slane %v1903_v38, %v2731_v35  ;;  %v306_v40 = vcombine.high %v1903_v38, %v1903_v38  ;;  %v2473_v49 = vld [vmem:[%s3203_s2 + $0x3c8] sm:$0xff]   ;;  %v2476_v52 = vld [vmem:[%s3203_s2 + $0x350] sm:$0xff]   ;;  %v2481_v57 = vld [vmem:[%s3203_s2 + $0x3d8] sm:$0xff]  }
   0xf   :  { %v2474_v50 = vld [vmem:[%s3203_s2 + $0x308] sm:$0xff]   ;;  %v2477_v53 = vld [vmem:[%s3203_s2 + $0x3d0] sm:$0xff]   ;;  %v2482_v58 = vld [vmem:[%s3203_s2 + $0x318] sm:$0xff]  }
  0x10   :  { %2175 = vmatpush3.bf16.msra.mxu0 %v2449_v14  ;;  %v321_v43 = vcombine.high %v313_v39, %v313_v39  ;;  %v320_v44 = vrot.slane %v306_v40, %v2731_v35  ;;  %v2475_v51 = vld [vmem:[%s3203_s2 + $0x388] sm:$0xff]   ;;  %v2478_v54 = vld [vmem:[%s3203_s2 + $0x310] sm:$0xff]   ;;  %v2483_v59 = vld [vmem:[%s3203_s2 + $0x398] sm:$0xff]  }
  0x11   :  { %2197 = vmatpush3.bf16.msra.mxu1 %v2450_v15  ;;  %2176 = vmatprep.subr.bf16.mxu0 %v2451_v16  ;;  %v2479_v55 = vld [vmem:[%s3203_s2 + $0x390] sm:$0xff]   ;;  %v2484_v60 = vld [vmem:[%s3203_s2 + $0x360] sm:$0xff]   ;;  %v2488_v0 = vld [vmem:[%s3203_s2 + $0x368] sm:$0xff]  }
  0x12   :  { %2198 = vmatprep.subr.bf16.mxu1 %v2452_v17  ;;  %764 = vmatprep.mubr.bf16.mxu0 %v321_v43  ;;  %v322_v47 = vcombine.high %v320_v44, %v320_v44  ;;  %v2485_v61 = vld [vmem:[%s3203_s2 + $0x3e0] sm:$0xff]   ;;  %v2489_v1 = vld [vmem:[%s3203_s2 + $0x3e8] sm:$0xff]   ;;  %v2492_v4 = vld [vmem:[%s3203_s2 + $0x370] sm:$0xff]  }
  0x13   :  { %v2486_v62 = vld [vmem:[%s3203_s2 + $0x320] sm:$0xff]   ;;  %v2490_v2 = vld [vmem:[%s3203_s2 + $0x328] sm:$0xff]   ;;  %v2493_v5 = vld [vmem:[%s3203_s2 + $0x3f0] sm:$0xff]  }
  0x14   :  { %2177 = vmatpush3.bf16.msra.mxu0 %v2453_v18  ;;  %804 = vmatprep.mubr.bf16.mxu1 %v322_v47  ;;  %v2487_v63 = vld [vmem:[%s3203_s2 + $0x3a0] sm:$0xff]   ;;  %v2491_v3 = vld [vmem:[%s3203_s2 + $0x3a8] sm:$0xff]   ;;  %v2494_v6 = vld [vmem:[%s3203_s2 + $0x330] sm:$0xff]  }
  0x15   :  { %2199 = vmatpush3.bf16.msra.mxu1 %v2454_v19  ;;  %2178 = vmatprep.subr.bf16.mxu0 %v2455_v20  ;;  %v2495_v7 = vld [vmem:[%s3203_s2 + $0x3b0] sm:$0xff]   ;;  %v2496_v8 = vld [vmem:[%s3203_s2 + $0x378] sm:$0xff]   ;;  %v2501_v15 = vld [vmem:[%s3203_s2 + $0x40] sm:$0xff]  }
  0x16   :  { %2200 = vmatprep.subr.bf16.mxu1 %v2456_v21  ;;  %v2497_v9 = vld [vmem:[%s3203_s2 + $0x3f8] sm:$0xff]   ;;  %v2502_v16 = vld [vmem:[%s3203_s2 + $0xc0] sm:$0xff]   ;;  %v2505_v22 = vld [vmem:[%s3203_s2 + $0x48] sm:$0xff]  }
  0x17   :  { %v2498_v10 = vld [vmem:[%s3203_s2 + $0x338] sm:$0xff]   ;;  %v2503_v19 = vld [vmem:[%s3203_s2] sm:$0xff]   ;;  %v2506_v23 = vld [vmem:[%s3203_s2 + $0xc8] sm:$0xff]  }
  0x18   :  { %2179 = vmatpush3.bf16.msra.mxu0 %v2457_v25  ;;  %v2499_v11 = vld [vmem:[%s3203_s2 + $0x3b8] sm:$0xff]   ;;  %v2504_v20 = vld [vmem:[%s3203_s2 + $0x80] sm:$0xff]   ;;  %v2507_v24 = vld [vmem:[%s3203_s2 + $0x8] sm:$0xff]  }
  0x19   :  { %2201 = vmatpush3.bf16.msra.mxu1 %v2458_v26  ;;  %2180 = vmatprep.subr.bf16.mxu0 %v2459_v27  ;;  %v1904_v12 = vld [vmem:[%s3204_s0 + $0x18] sm:$0xff]  ;;  %v2508_v25 = vld [vmem:[%s3203_s2 + $0x88] sm:$0xff]   ;;  %v2509_v26 = vld [vmem:[%s3203_s2 + $0x50] sm:$0xff]  }
  0x1a   :  { %2202 = vmatprep.subr.bf16.mxu1 %v2460_v28  ;;  %v330_v13 = vrot.slane %v1904_v12, %v2731_v35  ;;  %v323_v14 = vcombine.high %v1904_v12, %v1904_v12  ;;  %v2510_v27 = vld [vmem:[%s3203_s2 + $0xd0] sm:$0xff]   ;;  %v2519_v38 = vld [vmem:[%s3203_s2 + $0x20] sm:$0xff]   ;;  %v2521_v40 = vld [vmem:[%s3203_s2 + $0x68] sm:$0xff]  }
  0x1b   :  { %v2511_v28 = vld [vmem:[%s3203_s2 + $0x10] sm:$0xff]   ;;  %v2524_v43 = vld [vmem:[%s3203_s2 + $0xa8] sm:$0xff]   ;;  %v2552_v12 = vld [vmem:[%s3203_s2 + $0x120] sm:$0xff]  }
  0x1c   :  { %2181 = vmatpush3.bf16.msra.mxu0 %v2461_v31  ;;  %v338_v17 = vcombine.high %v330_v13, %v330_v13  ;;  %v337_v18 = vrot.slane %v323_v14, %v2731_v35  ;;  %v2512_v29 = vld [vmem:[%s3203_s2 + $0x90] sm:$0xff]   ;;  %v2513_v31 = vld [vmem:[%s3203_s2 + $0x58] sm:$0xff]   ;;  %v2554_v14 = vld [vmem:[%s3203_s2 + $0x168] sm:$0xff]  }
  0x1d   :  { %2203 = vmatpush3.bf16.msra.mxu1 %v2462_v32  ;;  %2182 = vmatprep.subr.bf16.mxu0 %v2463_v33  ;;  %v2514_v32 = vld [vmem:[%s3203_s2 + $0xd8] sm:$0xff]   ;;  %v2528_v47 = vld [vmem:[%s3203_s2 + $0xb0] sm:$0xff]  }
  0x1e   :  { %2204 = vmatprep.subr.bf16.mxu1 %v2464_v34  ;;  %v339_v21 = vcombine.high %v337_v18, %v337_v18  ;;  %v2515_v33 = vld [vmem:[%s3203_s2 + $0x18] sm:$0xff]  }
  0x1f   :  { %v2516_v34 = vld [vmem:[%s3203_s2 + $0x98] sm:$0xff]  }
  0x20   :  { %2183 = vmatpush3.bf16.msra.mxu0 %v2465_v36  ;;  %v2517_v36 = vld [vmem:[%s3203_s2 + $0x60] sm:$0xff]  }
  0x21   :  { %2205 = vmatpush3.bf16.msra.mxu1 %v2466_v37  ;;  %2212 = vmatprep.subr.bf16.mxu0 %v2468_v41  ;;  %v2518_v37 = vld [vmem:[%s3203_s2 + $0xe0] sm:$0xff]   ;;  %v2522_v41 = vld [vmem:[%s3203_s2 + $0xe8] sm:$0xff]  }
  0x22   :  { %2234 = vmatprep.subr.bf16.mxu1 %v2469_v42  ;;  %v2523_v42 = vld [vmem:[%s3203_s2 + $0x28] sm:$0xff]  }
  0x23   :  { %765 = vmatmul.mubr.bf16.vlgmr.msra.gmra.mrb[0].mxu0 %v313_v39  ;;  %v2520_v39 = vld [vmem:[%s3203_s2 + $0xa0] sm:$0xff]  }
  0x24   :  { %2213 = vmatpush3.bf16.msra.mxu0 %v2470_v45  ;;  %805 = vmatmul.mubr.bf16.vlgmr.msra.gmra.mrb[0].mxu1 %v320_v44  ;;  %v2525_v44 = vld [vmem:[%s3203_s2 + $0x70] sm:$0xff]  }
  0x25   :  { %2214 = vmatprep.subr.bf16.mxu0 %v2472_v48  ;;  %2235 = vmatpush3.bf16.msra.mxu1 %v2471_v46  ;;  %v2526_v45 = vld [vmem:[%s3203_s2 + $0xf0] sm:$0xff]   ;;  %v2529_v48 = vld [vmem:[%s3203_s2 + $0x78] sm:$0xff]  }
  0x26   :  { %2236 = vmatprep.subr.bf16.mxu1 %v2473_v49  ;;  %844 = vmatprep.mubr.bf16.mxu0 %v338_v17  ;;  %v2527_v46 = vld [vmem:[%s3203_s2 + $0x30] sm:$0xff]   ;;  %v2530_v49 = vld [vmem:[%s3203_s2 + $0xf8] sm:$0xff]   ;;  %v2557_v17 = vld [vmem:[%s3203_s2 + $0x1a8] sm:$0xff]  }
  0x27   :  { %884 = vmatprep.mubr.bf16.mxu1 %v339_v21  ;;  %v2561_v21 = vld [vmem:[%s3203_s2 + $0x1b0] sm:$0xff]  }
  0x28   :  { %2215 = vmatpush3.bf16.msra.mxu0 %v2474_v50  ;;  %v2531_v50 = vld [vmem:[%s3203_s2 + $0x38] sm:$0xff]  }
  0x29   :  { %2216 = vmatprep.subr.bf16.mxu0 %v2476_v52  ;;  %2237 = vmatpush3.bf16.msra.mxu1 %v2475_v51  ;;  %v2532_v51 = vld [vmem:[%s3203_s2 + $0xb8] sm:$0xff]   ;;  %v42_v52 = vld [vmem:[%s3204_s0] sm:$0xff] }
  0x2a   :  { %2238 = vmatprep.subr.bf16.mxu1 %v2477_v53  ;;  %v901_v53 = vrot.slane %v42_v52, %v2731_v35 }
  0x2c   :  { %2217 = vmatpush3.bf16.msra.mxu0 %v2478_v54  ;;  %v894_v54 = vcombine.high %v42_v52, %v42_v52  ;;  %v1683_v52 = vld [vmem:[%s3208_s9 + $0x18] sm:$0xff] }
  0x2d   :  { %2218 = vmatprep.subr.bf16.mxu0 %v2480_v56  ;;  %2239 = vmatpush3.bf16.msra.mxu1 %v2479_v55  ;;  %v2534_v55 = vld [vmem:[%s3203_s2 + $0x140] sm:$0xff]  }
  0x2e   :  { %2240 = vmatprep.subr.bf16.mxu1 %v2481_v57  ;;  %v2535_v56 = vld [vmem:[%s3203_s2 + $0x1c0] sm:$0xff]   ;;  %v909_v57 = vcombine.high %v901_v53, %v901_v53 }
  0x30   :  { %2219 = vmatpush3.bf16.msra.mxu0 %v2482_v58  ;;  %v908_v58 = vrot.slane %v894_v54, %v2731_v35 }
  0x31   :  { %2220 = vmatprep.subr.bf16.mxu0 %v2484_v60  ;;  %2241 = vmatpush3.bf16.msra.mxu1 %v2483_v59  ;;  %v2536_v59 = vld [vmem:[%s3203_s2 + $0x100] sm:$0xff]  }
  0x32   :  { %2242 = vmatprep.subr.bf16.mxu1 %v2485_v61  ;;  %v2537_v60 = vld [vmem:[%s3203_s2 + $0x180] sm:$0xff]   ;;  %v910_v61 = vcombine.high %v908_v58, %v908_v58 }
  0x34   :  { %2221 = vmatpush3.bf16.msra.mxu0 %v2486_v62  ;;  %v2538_v62 = vld [vmem:[%s3203_s2 + $0x148] sm:$0xff]  }
  0x35   :  { %2222 = vmatprep.subr.bf16.mxu0 %v2488_v0  ;;  %2243 = vmatpush3.bf16.msra.mxu1 %v2487_v63  ;;  %v2539_v63 = vld [vmem:[%s3203_s2 + $0x1c8] sm:$0xff]  }
  0x36   :  { %2244 = vmatprep.subr.bf16.mxu1 %v2489_v1  ;;  %v2540_v0 = vld [vmem:[%s3203_s2 + $0x108] sm:$0xff]  }
  0x37   :  { %v2541_v1 = vld [vmem:[%s3203_s2 + $0x188] sm:$0xff]  }
  0x38   :  { %2223 = vmatpush3.bf16.msra.mxu0 %v2490_v2  ;;  %v2542_v2 = vld [vmem:[%s3203_s2 + $0x150] sm:$0xff]  }
  0x39   :  { %2224 = vmatprep.subr.bf16.mxu0 %v2492_v4  ;;  %2245 = vmatpush3.bf16.msra.mxu1 %v2491_v3  ;;  %v2543_v3 = vld [vmem:[%s3203_s2 + $0x1d0] sm:$0xff]  }
  0x3a   :  { %2246 = vmatprep.subr.bf16.mxu1 %v2493_v5  ;;  %v2544_v4 = vld [vmem:[%s3203_s2 + $0x110] sm:$0xff]  }
  0x3b   :  { %v2545_v5 = vld [vmem:[%s3203_s2 + $0x190] sm:$0xff]  }
  0x3c   :  { %2225 = vmatpush3.bf16.msra.mxu0 %v2494_v6  ;;  %v2546_v6 = vld [vmem:[%s3203_s2 + $0x158] sm:$0xff]  }
  0x3d   :  { %2226 = vmatprep.subr.bf16.mxu0 %v2496_v8  ;;  %2247 = vmatpush3.bf16.msra.mxu1 %v2495_v7  ;;  %v2547_v7 = vld [vmem:[%s3203_s2 + $0x1d8] sm:$0xff]  }
  0x3e   :  { %2248 = vmatprep.subr.bf16.mxu1 %v2497_v9  ;;  %v2548_v8 = vld [vmem:[%s3203_s2 + $0x118] sm:$0xff]  }
  0x3f   :  { %v2549_v9 = vld [vmem:[%s3203_s2 + $0x198] sm:$0xff]  }
  0x40   :  { %2227 = vmatpush3.bf16.msra.mxu0 %v2498_v10  ;;  %v2550_v10 = vld [vmem:[%s3203_s2 + $0x160] sm:$0xff]  }
  0x41   :  { %2256 = vmatprep.subr.bf16.mxu0 %v2501_v15  ;;  %2249 = vmatpush3.bf16.msra.mxu1 %v2499_v11  ;;  %v2551_v11 = vld [vmem:[%s3203_s2 + $0x1e0] sm:$0xff]   ;;  %v2555_v15 = vld [vmem:[%s3203_s2 + $0x1e8] sm:$0xff]  }
  0x42   :  { %2278 = vmatprep.subr.bf16.mxu1 %v2502_v16  ;;  %v2556_v16 = vld [vmem:[%s3203_s2 + $0x128] sm:$0xff]  }
  0x43   :  { %845 = vmatmul.mubr.bf16.vlgmr.msra.gmra.mrb[4].mxu0 %v330_v13  ;;  %v2553_v13 = vld [vmem:[%s3203_s2 + $0x1a0] sm:$0xff]  }
  0x44   :  { %2257 = vmatpush3.bf16.msra.mxu0 %v2503_v19  ;;  %885 = vmatmul.mubr.bf16.vlgmr.msra.gmra.mrb[4].mxu1 %v337_v18  ;;  %v2558_v18 = vld [vmem:[%s3203_s2 + $0x170] sm:$0xff]  }
  0x45   :  { %2258 = vmatprep.subr.bf16.mxu0 %v2505_v22  ;;  %2279 = vmatpush3.bf16.msra.mxu1 %v2504_v20  ;;  %v2559_v19 = vld [vmem:[%s3203_s2 + $0x1f0] sm:$0xff]   ;;  %v2562_v22 = vld [vmem:[%s3203_s2 + $0x178] sm:$0xff]  }
  0x46   :  { %2280 = vmatprep.subr.bf16.mxu1 %v2506_v23  ;;  %1352 = vmatprep.mubr.bf16.mxu0 %v909_v57  ;;  %v2560_v20 = vld [vmem:[%s3203_s2 + $0x130] sm:$0xff]   ;;  %v2563_v23 = vld [vmem:[%s3203_s2 + $0x1f8] sm:$0xff]  }
  0x47   :  { %1392 = vmatprep.mubr.bf16.mxu1 %v910_v61  ;;  %v1687_v57 = vld [vmem:[%s3208_s9 + $0x38] sm:$0xff]  ;;  %v1686_v61 = vld [vmem:[%s3208_s9 + $0x30] sm:$0xff] }
  0x48   :  { %2259 = vmatpush3.bf16.msra.mxu0 %v2507_v24  ;;  %v2564_v24 = vld [vmem:[%s3203_s2 + $0x138] sm:$0xff]  }
  0x49   :  { %2260 = vmatprep.subr.bf16.mxu0 %v2509_v26  ;;  %2281 = vmatpush3.bf16.msra.mxu1 %v2508_v25  ;;  %v2565_v25 = vld [vmem:[%s3203_s2 + $0x1b8] sm:$0xff]   ;;  %v43_v26 = vld [vmem:[%s3204_s0 + $0x8] sm:$0xff] }
  0x4a   :  { %2282 = vmatprep.subr.bf16.mxu1 %v2510_v27  ;;  %v918_v27 = vrot.slane %v43_v26, %v2731_v35 }
  0x4c   :  { %2261 = vmatpush3.bf16.msra.mxu0 %v2511_v28  ;;  %v911_v28 = vcombine.high %v43_v26, %v43_v26 }
  0x4d   :  { %2262 = vmatprep.subr.bf16.mxu0 %v2513_v31  ;;  %2283 = vmatpush3.bf16.msra.mxu1 %v2512_v29  ;;  %v1490_v29 = vld [vmem:[%s3205_s4] sm:$0xff]  ;;  %v1491_v31 = vld [vmem:[%s3205_s4 + $0x8] sm:$0xff] }
  0x4e   :  { %2284 = vmatprep.subr.bf16.mxu1 %v2514_v32  ;;  %v926_v32 = vcombine.high %v918_v27, %v918_v27 }
  0x50   :  { %2263 = vmatpush3.bf16.msra.mxu0 %v2515_v33  ;;  %v925_v33 = vrot.slane %v911_v28, %v2731_v35  ;;  %v1489_v35 = vld [vmem:[%s3206_s1] sm:$0xf] }
  0x51   :  { %2264 = vmatprep.subr.bf16.mxu0 %v2517_v36  ;;  %2285 = vmatpush3.bf16.msra.mxu1 %v2516_v34  ;;  %v2570_v36 = vmov 0.0|0.0  }
  0x52   :  { %2286 = vmatprep.subr.bf16.mxu1 %v2518_v37  ;;  %v927_v34 = vcombine.high %v925_v33, %v925_v33  ;;  %v2383_v37 = vpack.c.bf16 %v1491_v31, %v1490_v29 }
  0x54   :  { %2265 = vmatpush3.bf16.msra.mxu0 %v2519_v38  ;;  %v2571_v38 = vmov 0.0  }
  0x55   :  { %2266 = vmatprep.subr.bf16.mxu0 %v2521_v40  ;;  %2287 = vmatpush3.bf16.msra.mxu1 %v2520_v39  ;;  %v1574_v39 = vld [vmem:[%s3207_s6] sm:$0xff]  ;;  %v1575_v40 = vld [vmem:[%s3207_s6 + $0x8] sm:$0xff] }
  0x56   :  { %2288 = vmatprep.subr.bf16.mxu1 %v2522_v41  ;;  %v2386_v41 = vpack.c.bf16 %v1575_v40, %v1574_v39 }
  0x58   :  { %2267 = vmatpush3.bf16.msra.mxu0 %v2523_v42  ;;  %v1576_v42 = vld [vmem:[%s3207_s6 + $0x10] sm:$0xff] }
  0x59   :  { %2268 = vmatprep.subr.bf16.mxu0 %v2525_v44  ;;  %2289 = vmatpush3.bf16.msra.mxu1 %v2524_v43  ;;  %v1577_v43 = vld [vmem:[%s3207_s6 + $0x18] sm:$0xff] }
  0x5a   :  { %2290 = vmatprep.subr.bf16.mxu1 %v2526_v45  ;;  %v2389_v44 = vpack.c.bf16 %v1577_v43, %v1576_v42  ;;  %v1578_v45 = vld [vmem:[%s3207_s6 + $0x20] sm:$0xff] }
  0x5c   :  { %2269 = vmatpush3.bf16.msra.mxu0 %v2527_v46  ;;  %v1579_v46 = vld [vmem:[%s3207_s6 + $0x28] sm:$0xff] }
  0x5d   :  { %2270 = vmatprep.subr.bf16.mxu0 %v2529_v48  ;;  %2291 = vmatpush3.bf16.msra.mxu1 %v2528_v47  ;;  %v2392_v47 = vpack.c.bf16 %v1579_v46, %v1578_v45  ;;  %v1580_v48 = vld [vmem:[%s3207_s6 + $0x30] sm:$0xff] }
  0x5e   :  { %2292 = vmatprep.subr.bf16.mxu1 %v2530_v49  ;;  %v1581_v49 = vld [vmem:[%s3207_s6 + $0x38] sm:$0xff] }
  0x60   :  { %2271 = vmatpush3.bf16.msra.mxu0 %v2531_v50  ;;  %v2395_v50 = vpack.c.bf16 %v1581_v49, %v1580_v48 }
  0x61   :  { %2300 = vmatprep.subr.bf16.mxu0 %v2534_v55  ;;  %2293 = vmatpush3.bf16.msra.mxu1 %v2532_v51  ;;  %v1681_v51 = vld [vmem:[%s3208_s9 + $0x8] sm:$0xff]  ;;  %v1682_v55 = vld [vmem:[%s3208_s9 + $0x10] sm:$0xff] }
  0x62   :  { %2322 = vmatprep.subr.bf16.mxu1 %v2535_v56  ;;  %v2397_v54 = vpack.c.bf16 %v1683_v52, %v1681_v51  ;;  %v1685_v56 = vld [vmem:[%s3208_s9 + $0x28] sm:$0xff] }
  0x63   :  { %1353 = vmatmul.mubr.bf16.vlgmr.msra.gmra.mrb[8].mxu0 %v901_v53  ;;  %v1680_v53 = vld [vmem:[%s3208_s9] sm:$0xff] }
  0x64   :  { %2301 = vmatpush3.bf16.msra.mxu0 %v2536_v59  ;;  %1393 = vmatmul.mubr.bf16.vlgmr.msra.gmra.mrb[8].mxu1 %v908_v58  ;;  %v2399_v58 = vpack.c.bf16 %v1682_v55, %v1680_v53  ;;  %v2401_v59 = vpack.c.bf16 %v1687_v57, %v1685_v56 }
  0x65   :  { %2302 = vmatprep.subr.bf16.mxu0 %v2538_v62  ;;  %2323 = vmatpush3.bf16.msra.mxu1 %v2537_v60  ;;  %v1684_v60 = vld [vmem:[%s3208_s9 + $0x20] sm:$0xff]  ;;  %v1689_v62 = vld [vmem:[%s3208_s9 + $0x48] sm:$0xff] }
  0x66   :  { %2324 = vmatprep.subr.bf16.mxu1 %v2539_v63  ;;  %1432 = vmatprep.mubr.bf16.mxu0 %v926_v32  ;;  %v1691_v63 = vld [vmem:[%s3208_s9 + $0x58] sm:$0xff] }
  0x67   :  { %1472 = vmatprep.mubr.bf16.mxu1 %v927_v34 }
  0x68   :  { %2303 = vmatpush3.bf16.msra.mxu0 %v2540_v0  ;;  %v2403_v0 = vpack.c.bf16 %v1686_v61, %v1684_v60  ;;  %v1695_v60 = vld [vmem:[%s3208_s9 + $0x78] sm:$0xff] }
  0x69   :  { %2304 = vmatprep.subr.bf16.mxu0 %v2542_v2  ;;  %2325 = vmatpush3.bf16.msra.mxu1 %v2541_v1  ;;  %v2405_v1 = vpack.c.bf16 %v1691_v63, %v1689_v62  ;;  %v1688_v2 = vld [vmem:[%s3208_s9 + $0x40] sm:$0xff]  ;;  %v1694_v63 = vld [vmem:[%s3208_s9 + $0x70] sm:$0xff] }
  0x6a   :  { %2326 = vmatprep.subr.bf16.mxu1 %v2543_v3  ;;  %v1690_v3 = vld [vmem:[%s3208_s9 + $0x50] sm:$0xff]  ;;  %v1692_v62 = vld [vmem:[%s3208_s9 + $0x60] sm:$0xff] }
  0x6c   :  { %2305 = vmatpush3.bf16.msra.mxu0 %v2544_v4  ;;  %v2407_v4 = vpack.c.bf16 %v1690_v3, %v1688_v2  ;;  %v1667_v2 = vld [vmem:[%s3210_s8 + $0x18] sm:$0xff] }
  0x6d   :  { %2306 = vmatprep.subr.bf16.mxu0 %v2546_v6  ;;  %2327 = vmatpush3.bf16.msra.mxu1 %v2545_v5 }
  0x6e   :  { %2328 = vmatprep.subr.bf16.mxu1 %v2547_v7 }
  0x70   :  { %2307 = vmatpush3.bf16.msra.mxu0 %v2548_v8 }
  0x71   :  { %2308 = vmatprep.subr.bf16.mxu0 %v2550_v10  ;;  %2329 = vmatpush3.bf16.msra.mxu1 %v2549_v9 }
  0x72   :  { %2330 = vmatprep.subr.bf16.mxu1 %v2551_v11 }
  0x74   :  { %2309 = vmatpush3.bf16.msra.mxu0 %v2552_v12 }
  0x75   :  { %2310 = vmatprep.subr.bf16.mxu0 %v2554_v14  ;;  %2331 = vmatpush3.bf16.msra.mxu1 %v2553_v13 }
  0x76   :  { %2332 = vmatprep.subr.bf16.mxu1 %v2555_v15 }
  0x78   :  { %2311 = vmatpush3.bf16.msra.mxu0 %v2556_v16 }
  0x79   :  { %2312 = vmatprep.subr.bf16.mxu0 %v2558_v18  ;;  %2333 = vmatpush3.bf16.msra.mxu1 %v2557_v17 }
  0x7a   :  { %2334 = vmatprep.subr.bf16.mxu1 %v2559_v19 }
  0x7c   :  { %2313 = vmatpush3.bf16.msra.mxu0 %v2560_v20 }
  0x7d   :  { %2314 = vmatprep.subr.bf16.mxu0 %v2562_v22  ;;  %2335 = vmatpush3.bf16.msra.mxu1 %v2561_v21 }
  0x7e   :  { %2336 = vmatprep.subr.bf16.mxu1 %v2563_v23 }
  0x80   :  { %2315 = vmatpush3.bf16.msra.mxu0 %v2564_v24 }
  0x81   :  { %2337 = vmatpush3.bf16.msra.mxu1 %v2565_v25  ;;  %2398 = vmatprep.subr.bf16.mxu0 %v2397_v54  ;;  %v2162_v54 = vld [vmem:[%s3209_s5] ss:$0 sm:$0xff] }
  0x82   :  { %2382 = vmatprep.subr.bf16.mxu1 %v2570_v36 }
  0x83   :  { %1433 = vmatmul.mubr.bf16.vlgmr.msra.gmra.mrb[12].mxu0 %v918_v27 }
  0x84   :  { %1763 = vmatprep.mubr.f32.mxu0 %v2571_v38  ;;  %1473 = vmatmul.mubr.bf16.vlgmr.msra.gmra.mrb[12].mxu1 %v925_v33 }
  0x85   :  { %2384 = vmatpush3.bf16.msra.mxu1 %v2383_v37  ;;  %2360 = vmatprep.mubr.msk.f32.mxu1 %vm2572_vm0, %v2571_v38 }
  0x86   :  { %2385 = vmatprep.subr.bf16.mxu1 %v2570_v36  ;;  %2400 = vmatpush1.bf16.msra.mxu0 %v2399_v58 }
  0x87   :  { %2402 = vmatprep.subr.bf16.mxu0 %v2401_v59  ;;  %v1693_v59 = vld [vmem:[%s3208_s9 + $0x68] sm:$0xff] }
  0x88   :  { %v2409_v61 = vpack.c.bf16 %v1695_v60, %v1693_v59 }
  0x8a   :  { %2404 = vmatpush1.bf16.msra.mxu0 %v2403_v0  ;;  %v2411_v0 = vpack.c.bf16 %v1694_v63, %v1692_v62 }
  0x8b   :  { %2406 = vmatprep.subr.bf16.mxu0 %v2405_v1  ;;  %v1665_v1 = vld [vmem:[%s3210_s8 + $0x8] sm:$0xff] }
  0x8c   :  { %2361 = vmatmul.mubr.msk.f32.vlgmr.msra.gmra.mrb[16].mxu1 %vm1499_vm1, %v1489_v35  ;;  %v2413_v3 = vpack.c.bf16 %v1667_v2, %v1665_v1 }
  0x8d   :  { %2379 = vmatprep.mubr.msk.f32.mxu1 %vm2572_vm0, %v2571_v38  ;;  %2387 = vmatpush3.bf16.msra.mxu1 %v2386_v41 }
  0x8e   :  { %2388 = vmatprep.subr.bf16.mxu1 %v2570_v36  ;;  %2408 = vmatpush1.bf16.msra.mxu0 %v2407_v4  ;;  %v2164_v4 = vld [vmem:[%s3211_s7] ss:$0 sm:$0xff] }
  0x8f   :  { %2410 = vmatprep.subr.bf16.mxu0 %v2409_v61 }
  0x91   :  { %2390 = vmatpush3.bf16.msra.mxu1 %v2389_v44 }
  0x92   :  { %2391 = vmatprep.subr.bf16.mxu1 %v2570_v36  ;;  %2412 = vmatpush1.bf16.msra.mxu0 %v2411_v0 }
  0x93   :  { %2414 = vmatprep.subr.bf16.mxu0 %v2413_v3 }
  0x95   :  { %2393 = vmatpush3.bf16.msra.mxu1 %v2392_v47 }
  0x96   :  { %2394 = vmatprep.subr.bf16.mxu1 %v2570_v36 }
  0x99   :  { %2396 = vmatpush3.bf16.msra.mxu1 %v2395_v50 }
  0xf6   :  { %v2184_v5 = vpop.f32.mrb[0].mxu0 }
  0xf7   :  { %v2185_v6 = vpop.f32.mrb[1].mxu0  ;;  %v2206_v7 = vpop.f32.mrb[0].mxu1 }
  0xf8   :  { %v2186_v8 = vadd.f32 %v2185_v6, %v2184_v5  ;;  %v2187_v9 = vpop.f32.mrb[2].mxu0  ;;  %v2207_v10 = vpop.f32.mrb[1].mxu1  ;;  %v1664_v5 = vld [vmem:[%s3210_s8] sm:$0xff]  ;;  %v1666_v6 = vld [vmem:[%s3210_s8 + $0x10] sm:$0xff] }
  0xf9   :  { %v2188_v11 = vpop.f32.mrb[3].mxu0  ;;  %v2208_v12 = vadd.f32 %v2207_v10, %v2206_v7  ;;  %v2209_v13 = vpop.f32.mrb[2].mxu1  ;;  %v1671_v9 = vld [vmem:[%s3210_s8 + $0x38] sm:$0xff] }
  0xfa   :  { %v2210_v14 = vpop.f32.mrb[3].mxu1 }
  0xfb   :  { %v807_v15 = vadd.f32 %v2208_v12, %v2186_v8  ;;  %v1669_v8 = vld [vmem:[%s3210_s8 + $0x28] sm:$0xff]  ;;  %v2415_v12 = vpack.c.bf16 %v1666_v6, %v1664_v5 }
  0xfc   :  { %v2417_v14 = vpack.c.bf16 %v1671_v9, %v1669_v8 }
 0x116   :  { %v2228_v16 = vpop.f32.mrb[4].mxu0 }
 0x117   :  { %v2229_v17 = vpop.f32.mrb[5].mxu0  ;;  %v2250_v18 = vpop.f32.mrb[4].mxu1 }
 0x118   :  { %v2230_v19 = vadd.f32 %v2229_v17, %v2228_v16  ;;  %v2231_v20 = vpop.f32.mrb[6].mxu0  ;;  %v2251_v21 = vpop.f32.mrb[5].mxu1  ;;  %v1670_v16 = vld [vmem:[%s3210_s8 + $0x30] sm:$0xff]  ;;  %v1673_v17 = vld [vmem:[%s3210_s8 + $0x48] sm:$0xff] }
 0x119   :  { %v2232_v22 = vpop.f32.mrb[7].mxu0  ;;  %v2252_v24 = vadd.f32 %v2251_v21, %v2250_v18  ;;  %v2253_v25 = vpop.f32.mrb[6].mxu1  ;;  %v1675_v18 = vld [vmem:[%s3210_s8 + $0x58] sm:$0xff]  ;;  %v1672_v21 = vld [vmem:[%s3210_s8 + $0x40] sm:$0xff] }
 0x11a   :  { %v847_v23 = vadd.f32 %v2230_v19, %v807_v15  ;;  %v2254_v26 = vpop.f32.mrb[7].mxu1  ;;  %v1668_v15 = vld [vmem:[%s3210_s8 + $0x20] sm:$0xff]  ;;  %v2421_v20 = vpack.c.bf16 %v1675_v18, %v1673_v17  ;;  %v1674_v22 = vld [vmem:[%s3210_s8 + $0x50] sm:$0xff] }
 0x11b   :  { %v2419_v19 = vpack.c.bf16 %v1670_v16, %v1668_v15  ;;  %v1676_v26 = vld [vmem:[%s3210_s8 + $0x60] sm:$0xff] }
 0x11c   :  { %v887_v27 = vadd.f32 %v2252_v24, %v847_v23  ;;  %v1677_v23 = vld [vmem:[%s3210_s8 + $0x68] sm:$0xff]  ;;  %v1679_v24 = vld [vmem:[%s3210_s8 + $0x78] sm:$0xff] }
 0x11d   :  { %v2425_v25 = vpack.c.bf16 %v1679_v24, %v1677_v23 }
 0x136   :  { %v2272_v28 = vpop.f32.mrb[8].mxu0 }
 0x137   :  { %v2273_v29 = vpop.f32.mrb[9].mxu0  ;;  %v2294_v31 = vpop.f32.mrb[8].mxu1 }
 0x138   :  { %v2274_v32 = vadd.f32 %v2273_v29, %v2272_v28  ;;  %v2275_v33 = vpop.f32.mrb[10].mxu0  ;;  %v2295_v34 = vpop.f32.mrb[9].mxu1  ;;  %v2161_v28 = vld [vmem:[%s3212_s3] ss:$0 sm:$0xff] }
 0x139   :  { %v2276_v36 = vpop.f32.mrb[11].mxu0  ;;  %v2296_v35 = vadd.f32 %v2295_v34, %v2294_v31  ;;  %v2297_v39 = vpop.f32.mrb[10].mxu1 }
 0x13a   :  { %v1355_v37 = vadd.f32 %v2274_v32, %v887_v27  ;;  %v2298_v40 = vpop.f32.mrb[11].mxu1  ;;  %v1678_v27 = vld [vmem:[%s3210_s8 + $0x70] sm:$0xff] }
 0x13b   :  { %v2427_v29 = vpack.c.bf16 %v1678_v27, %v1676_v26 }
 0x13c   :  { %v1395_v41 = vadd.f32 %v2296_v35, %v1355_v37 }
 0x156   :  { %v2316_v42 = vpop.f32.mrb[12].mxu0 }
 0x157   :  { %v2317_v43 = vpop.f32.mrb[13].mxu0  ;;  %v2338_v44 = vpop.f32.mrb[12].mxu1 }
 0x158   :  { %v2318_v45 = vadd.f32 %v2317_v43, %v2316_v42  ;;  %v2319_v46 = vpop.f32.mrb[14].mxu0  ;;  %v2339_v47 = vpop.f32.mrb[13].mxu1 }
 0x159   :  { %v2320_v48 = vpop.f32.mrb[15].mxu0  ;;  %v2340_v50 = vadd.f32 %v2339_v47, %v2338_v44  ;;  %v2341_v51 = vpop.f32.mrb[14].mxu1 }
 0x15a   :  { %v1435_v49 = vadd.f32 %v2318_v45, %v1395_v41  ;;  %v2342_v52 = vpop.f32.mrb[15].mxu1  ;;  %v1870_v51 = vsub.s32 0, %v2716_v30 }
 0x15b   :  { %v1874_v52 = vsub.s32 1, %v2716_v30 }
 0x15c   :  { %v1475_v53 = vadd.f32 %v2340_v50, %v1435_v49 }
 0x15e   :  { %v1487_v31 = vadd.f32 %v2161_v28, %v1475_v53  ;;  %v1866_v53 = vld [vmem:[%s3213_s10] sm:$0x3] }
 0x15f   :  { %v1569_v55 = vpop.f32.mrb[16].mxu1 }
 0x160   :  { %v1570_v56 = vadd.f32 %v2162_v54, %v1569_v55  ;;  %v2362_v57 = vpop.f32.mrb[17].mxu1  ;;  %v1488_v32 = vmax.f32 %v1487_v31, 0.0  ;;  %v1880_v54 = vld [vmem:[%s3214_s11] sm:$0x3]  ;;  %v1871_v55 = vrot.slane %v1866_v53, %v1870_v51 }
 0x161   :  { %v1889_v59 = vrot.slane %v1880_v54, %v1874_v52 }
 0x162   :  { %v1573_v58 = vmax.f32 %v1570_v56, 0.0  ;;  %v1875_v56 = vrot.slane %v1866_v53, %v1874_v52 }
 0x164   :  { %2380 = vmatmul.mubr.msk.f32.vlgmr.msra.gmra.mrb[18].mxu1 %vm1589_vm2, %v1573_v58  ;;  %v1885_v58 = vrot.slane %v1880_v54, %v1870_v51 }
 0x237   :  { %v1659_v7 = vpop.f32.mrb[18].mxu1 }
 0x238   :  { %v1660_v10 = vadd.f32 %v2164_v4, %v1659_v7  ;;  %v2381_v11 = vpop.f32.mrb[19].mxu1 }
 0x23a   :  { %v1663_v13 = vmax.f32 %v1660_v10, 0.0 }
 0x23c   :  { %2166 = vmatmul.mubr.msk.f32.vlgmr.msra.gmra.mrb[16].mxu0 %vm1589_vm2, %v1663_v13 }
 0x23d   :  { %2416 = vmatpush1.bf16.msra.mxu0 %v2415_v12  ;;  %1837 = vmatprep.mubr.f32.mxu0 %v2571_v38  ;;  %v2423_v38 = vpack.c.bf16 %v1674_v22, %v1672_v21 }
 0x23e   :  { %2418 = vmatprep.subr.bf16.mxu0 %v2417_v14 }
 0x241   :  { %2420 = vmatpush1.bf16.msra.mxu0 %v2419_v19 }
 0x242   :  { %2422 = vmatprep.subr.bf16.mxu0 %v2421_v20 }
 0x245   :  { %2424 = vmatpush1.bf16.msra.mxu0 %v2423_v38 }
 0x246   :  { %2426 = vmatprep.subr.bf16.mxu0 %v2425_v25 }
 0x249   :  { %2428 = vmatpush1.bf16.msra.mxu0 %v2427_v29 }
 0x24c   :  { %2167 = vmatmul.mubr.msk.f32.vlgmr.msra.gmra.mrb[16].mxu0 %vm1589_vm2, %v1488_v32 }
 0x31f   :  { %v1839_v33 = vpop.f32.mrb[16].mxu0 }
 0x320   :  { %v1841_v34 = vpop.f32.mrb[17].mxu0  ;;  %v1845_v36 = vsel %vm1844_vm3, %v1839_v33, 0.0 }
 0x321   :  { %v1846_v37 = vsel %vm1844_vm3, %v1841_v34, 0.0 }
 0x322   :  { %v1847_v35 = vadd.f32 %v1846_v37, %v1845_v36 }
 0x324   :  { %1848 = vadd.xlane.f32.xlu0 %v1847_v35 }
 0x3b1   :  { %v1849_v39 = vpop.xlane.xlu0 %1848 }
 0x3b2   :  { %v1851_v40 = vmul.f32 0.00390625, %v1849_v39 }
 0x3b4   :  { %v1852_v41 = vsub.f32 %v1839_v33, %v1851_v40  ;;  %v1853_v42 = vsub.f32 %v1841_v34, %v1851_v40 }
 0x3b6   :  { %v1854_v43 = vmul.f32 %v1852_v41, %v1852_v41  ;;  %v1855_v44 = vmul.f32 %v1853_v42, %v1853_v42 }
 0x3b8   :  { %v1856_v45 = vsel %vm1844_vm3, %v1854_v43, 0.0  ;;  %v1857_v46 = vsel %vm1844_vm3, %v1855_v44, 0.0 }
 0x3b9   :  { %v1858_v47 = vadd.f32 %v1857_v46, %v1856_v45 }
 0x3bb   :  { %1859 = vadd.xlane.f32.xlu0 %v1858_v47 }
 0x448   :  { %v1860_v48 = vpop.xlane.xlu0 %1859 }
 0x449   :  { %v1861_v49 = vmul.f32 0.00390625, %v1860_v48 }
 0x44b   :  { %v1862_v50 = vadd.f32 1e-05, %v1861_v49 }
 0x44d   :  { %2567 = vrsqrt.f32 %v1862_v50 }
 0x457   :  { %v2568_v57 = vpop.eup %2567 }
 0x458   :  { %v1864_v60 = vmul.f32 %v2568_v57, %v1852_v41  ;;  %v1865_v61 = vmul.f32 %v2568_v57, %v1853_v42 }
 0x45a   :  { %v1878_v62 = vmul.f32 %v1871_v55, %v1864_v60  ;;  %v1879_v63 = vmul.f32 %v1875_v56, %v1865_v61 }
 0x45c   :  { %v1892_v0 = vadd.f32 %v1885_v58, %v1878_v62  ;;  %v1893_v1 = vadd.f32 %v1889_v59, %v1879_v63 }
 0x45e   :  { %v1896_v30 = vcombine.low %v1892_v0, %v1893_v1 }
 0x460   :  { %1898 = vst [vmem:[%s3215_s12] sm:$0xff] %v1896_v30 }

</bundles_post_ra>
